<compile_context>
chip_gen: v6e
topology: v6e:2x2x1
jax: 0.10.0
libtpu: 0.0.40
codegen_flags: <defaults>
</compile_context>

<pallas_src>
import functools

import jax
import jax.numpy as jnp
from jax import lax
from jax.experimental import pallas as pl
from jax.experimental.pallas import tpu as pltpu

_LANE = 128        # lane width: H / E / S padded to multiples of this
_TILE_V = 256      # vocab tile width (256-aligned for v6e/v7x MXU)
_NEG = -1e30       # finite "-inf" used for padding / masking


def _round_up(x, m):
    return ((x + m - 1) // m) * m


# ------------------------------ fused kernel ------------------------------- #

def _fused_decoder_kernel(
        ids_ref,                                   # SMEM (B,) int32 token ids (scalar prefetch)
        emb_ref,                                   # VMEM (V, Ep) embedding table
        h0_ref, c0_ref,                            # VMEM (B, Hp) each
        enc_ref,                                   # VMEM (B, Sp, Hp) batch-major, padded
        w_ih_ref, w_hh_ref, b_lstm_ref,            # (Ep, 4Hp) (Hp, 4Hp) (1, 4Hp)
        w_attn_ref, b_attn_ref,                    # (Hp, Hp)  (Hp, 1)
        w_ch_ref, w_cc_ref, b_c_ref,               # (Hp, Hp)  (Hp, Hp)  (1, Hp)
        w_out_ref, b_out_ref,                      # (Hp, TILE_V) (1, TILE_V) — vocab tile j
        logp_ref, h1_ref, c1_ref, attn_ref, rep_ref,
        rep_sc, m_sc, l_sc,                        # VMEM scratch: (B,Hp) (B,1) (B,1)
        *, seq_len):
    p = pl.program_id(0)          # 0 = accumulate log-sum-exp, 1 = finalize log-probs
    j = pl.program_id(1)          # vocab tile index

    B, Hp = h0_ref.shape

    # ---------------- recurrent / attention part: once, at (0, 0) ----------------
    @pl.when((p == 0) & (j == 0))
    def _():
        # Embedding gather: dynamic row slices of the VMEM-resident table
        # (ids must be < vocab size; no runtime bounds check on VMEM refs).
        rows = [emb_ref[pl.ds(ids_ref[b], 1), :] for b in range(B)]
        emb = jnp.concatenate(rows, axis=0)                        # (B, Ep)

        # LSTM cell: two fused lane-dense matmuls, gate slices are tile-aligned.
        gates = (jnp.dot(emb, w_ih_ref[...], preferred_element_type=jnp.float32)
                 + jnp.dot(h0_ref[...], w_hh_ref[...], preferred_element_type=jnp.float32)
                 + b_lstm_ref[...])                                # (B, 4*Hp)
        i_g = jax.nn.sigmoid(gates[:, 0 * Hp:1 * Hp])
        f_g = jax.nn.sigmoid(gates[:, 1 * Hp:2 * Hp])
        g_g = jnp.tanh(gates[:, 2 * Hp:3 * Hp])
        o_g = jax.nn.sigmoid(gates[:, 3 * Hp:4 * Hp])
        c1 = f_g * c0_ref[...] + i_g * g_g
        h1 = o_g * jnp.tanh(c1)
        h1_ref[...] = h1
        c1_ref[...] = c1

        # Luong 'general' attention: project the hidden state (one (B,Hp)x(Hp,Hp)
        # matmul), then VPU broadcast-multiply + reductions — no M=1 MXU einsums.
        enc = enc_ref[...]                                         # (B, Sp, Hp)
        Sp = enc.shape[1]
        hproj = jnp.dot(h1, w_attn_ref[...], preferred_element_type=jnp.float32)   # (B, Hp)
        hbias = jnp.dot(h1, b_attn_ref[...], preferred_element_type=jnp.float32)   # (B, 1)
        scores = jnp.sum(enc * hproj[:, None, :], axis=-1) + hbias                 # (B, Sp)
        s_idx = lax.broadcasted_iota(jnp.int32, (B, Sp), 1)
        scores = jnp.where(s_idx < seq_len, scores, _NEG)          # mask padded positions
        m = jnp.max(scores, axis=-1, keepdims=True)
        e = jnp.exp(scores - m)
        attn = e / jnp.sum(e, axis=-1, keepdims=True)              # exact (sums to 1)
        attn_ref[...] = attn[:, None, :]                           # (B, 1, Sp) lane-dense

        ctx = jnp.sum(attn[:, :, None] * enc, axis=1)              # (B, Hp)

        # concat -> Linear -> ReLU, with the concat weight split into two matmuls
        # sharing one accumulator (no lane-axis concat / relayout).
        cc = (jnp.dot(h1, w_ch_ref[...], preferred_element_type=jnp.float32)
              + jnp.dot(ctx, w_cc_ref[...], preferred_element_type=jnp.float32)
              + b_c_ref[...])
        rep = jnp.maximum(cc, 0.0)                                 # (B, Hp)
        rep_ref[...] = rep
        rep_sc[...] = rep

        # init online log-sum-exp state for the vocab sweep
        m_sc[...] = jnp.full_like(m_sc, _NEG)
        l_sc[...] = jnp.zeros_like(l_sc)

    # ---------------- vocab tile projection (streamed, double-buffered) ----------
    logits = (jnp.dot(rep_sc[...], w_out_ref[...], preferred_element_type=jnp.float32)
              + b_out_ref[...])                                    # (B, TILE_V)
    # (padded vocab columns carry bias -1e30 => excluded from the log-sum-exp)

    @pl.when(p == 0)
    def _():
        m_new = jnp.maximum(m_sc[...], jnp.max(logits, axis=-1, keepdims=True))
        l_sc[...] = (l_sc[...] * jnp.exp(m_sc[...] - m_new)
                     + jnp.sum(jnp.exp(logits - m_new), axis=-1, keepdims=True))
        m_sc[...] = m_new
        logp_ref[...] = logits        # placeholder; overwritten in pass 1

    @pl.when(p == 1)
    def _():
        logp_ref[...] = logits - m_sc[...] - jnp.log(l_sc[...])


# ------------------------- parameter prep (one-time) ------------------------ #

def prepare_params(p):
    """One-time re-layout / lane-padding of PyTorch-style weights.
    Kept in f32 here to match the reference bit-for-bit at small sizes; at
    production sizes store the big operands (w_out_t, embedding) in bf16."""
    H = p['w_hh'].shape[1]
    E = p['w_ih'].shape[1]
    V = p['w_out'].shape[0]
    Hp = _round_up(H, _LANE)
    Ep = _round_up(E, _LANE)
    Vp = _round_up(V, _TILE_V)

    def pad2(x, rows, cols, val=0.0):
        return jnp.pad(x, ((0, rows - x.shape[0]), (0, cols - x.shape[1])),
                       constant_values=val)

    # LSTM weights: per-gate (in, out), padded, then fused to (in, 4*Hp).
    # PyTorch gate order i, f, g, o is preserved.
    w_ih4 = jnp.transpose(p['w_ih'].reshape(4, H, E), (0, 2, 1))       # (4, E, H)
    w_ih4 = jnp.pad(w_ih4, ((0, 0), (0, Ep - E), (0, Hp - H)))
    w_hh4 = jnp.transpose(p['w_hh'].reshape(4, H, H), (0, 2, 1))       # (4, H, H)
    w_hh4 = jnp.pad(w_hh4, ((0, 0), (0, Hp - H), (0, Hp - H)))
    b4 = jnp.pad(p['b_lstm'].reshape(4, H), ((0, 0), (0, Hp - H)))

    return {
        'embedding':    pad2(p['embedding'].astype(jnp.float32),
                             p['embedding'].shape[0], Ep),             # (V, Ep)
        'w_ih_f':       jnp.transpose(w_ih4, (1, 0, 2)).reshape(Ep, 4 * Hp),
        'w_hh_f':       jnp.transpose(w_hh4, (1, 0, 2)).reshape(Hp, 4 * Hp),
        'b_lstm_f':     b4.reshape(1, 4 * Hp),
        'w_attn':       pad2(p['w_attn'], Hp, Hp),                     # used as h1 @ W_a
        'b_attn_col':   pad2(p['b_attn'], 1, Hp).T,                    # (Hp, 1)
        'w_concat_h_t': pad2(p['w_concat'][:, :H].T, Hp, Hp),
        'w_concat_c_t': pad2(p['w_concat'][:, H:].T, Hp, Hp),
        'b_concat':     pad2(p['b_concat'], 1, Hp),
        'w_out_t':      pad2(p['w_out'].T, Hp, Vp),                    # (Hp, Vp)
        'b_out':        pad2(p['b_out'], 1, Vp, val=_NEG),             # mask padded vocab
    }


# --------------------------------- wrapper ---------------------------------- #

@functools.partial(jax.jit, static_argnames=("hidden_size", "output_size"))
def luong_attn_decoder_step(prepped, input_step, last_hidden, encoder_outputs,
                            *, hidden_size, output_size):
    """One decode step; mirrors LuongAttnDecoderRNN.forward.
    encoder_outputs is PyTorch-layout (S, B, H)."""
    h0, c0 = last_hidden                                  # (1, B, H) each
    B = input_step.shape[0]
    S = encoder_outputs.shape[0]
    H, V = hidden_size, output_size
    Hp = prepped['w_hh_f'].shape[0]
    Vt, Ep = prepped['embedding'].shape
    Vp = prepped['w_out_t'].shape[1]
    Sp = _round_up(S, _LANE)
    tile_v = min(_TILE_V, Vp)
    nv = Vp // tile_v

    # TODO(synk): in a real decode loop, hoist this (step-invariant) transpose/pad
    # out of the per-step call — or move the time loop into the kernel entirely.
    enc_p = jnp.pad(jnp.transpose(encoder_outputs, (1, 0, 2)),
                    ((0, 0), (0, Sp - S), (0, Hp - H)))   # (B, Sp, Hp)
    h0_p = jnp.pad(h0[0], ((0, 0), (0, Hp - H)))
    c0_p = jnp.pad(c0[0], ((0, 0), (0, Hp - H)))
    ids = input_step.astype(jnp.int32)

    kernel = functools.partial(_fused_decoder_kernel, seq_len=S)

    grid_spec = pltpu.PrefetchScalarGridSpec(
        num_scalar_prefetch=1,
        grid=(2, nv),                 # (lse-accumulate pass, finalize pass) x vocab tiles
        in_specs=[
            pl.BlockSpec((Vt, Ep),       lambda p, j, _ids: (0, 0)),      # embedding table
            pl.BlockSpec((B, Hp),        lambda p, j, _ids: (0, 0)),      # h0
            pl.BlockSpec((B, Hp),        lambda p, j, _ids: (0, 0)),      # c0
            pl.BlockSpec((B, Sp, Hp),    lambda p, j, _ids: (0, 0, 0)),   # encoder outputs
            pl.BlockSpec((Ep, 4 * Hp),   lambda p, j, _ids: (0, 0)),      # fused w_ih
            pl.BlockSpec((Hp, 4 * Hp),   lambda p, j, _ids: (0, 0)),      # fused w_hh
            pl.BlockSpec((1, 4 * Hp),    lambda p, j, _ids: (0, 0)),      # fused b_lstm
            pl.BlockSpec((Hp, Hp),       lambda p, j, _ids: (0, 0)),      # w_attn
            pl.BlockSpec((Hp, 1),        lambda p, j, _ids: (0, 0)),      # b_attn (column)
            pl.BlockSpec((Hp, Hp),       lambda p, j, _ids: (0, 0)),      # w_concat (h half)
            pl.BlockSpec((Hp, Hp),       lambda p, j, _ids: (0, 0)),      # w_concat (ctx half)
            pl.BlockSpec((1, Hp),        lambda p, j, _ids: (0, 0)),      # b_concat
            pl.BlockSpec((Hp, tile_v),   lambda p, j, _ids: (0, j)),      # w_out vocab tile
            pl.BlockSpec((1, tile_v),    lambda p, j, _ids: (0, j)),      # b_out vocab tile
        ],
        out_specs=(
            pl.BlockSpec((B, tile_v),    lambda p, j, _ids: (0, j)),      # log-probs
            pl.BlockSpec((B, Hp),        lambda p, j, _ids: (0, 0)),      # h1
            pl.BlockSpec((B, Hp),        lambda p, j, _ids: (0, 0)),      # c1
            pl.BlockSpec((B, 1, Sp),     lambda p, j, _ids: (0, 0, 0)),   # attn weights
            pl.BlockSpec((B, Hp),        lambda p, j, _ids: (0, 0)),      # representation
        ),
        scratch_shapes=[
            pltpu.VMEM((B, Hp), jnp.float32),    # rep (resident across vocab tiles)
            pltpu.VMEM((B, 1), jnp.float32),     # running max
            pltpu.VMEM((B, 1), jnp.float32),     # running sum(exp)
        ],
    )

    logp_p, h1_p, c1_p, attn_p, rep_p = pl.pallas_call(
        kernel,
        out_shape=(jax.ShapeDtypeStruct((B, Vp), jnp.float32),
                   jax.ShapeDtypeStruct((B, Hp), jnp.float32),
                   jax.ShapeDtypeStruct((B, Hp), jnp.float32),
                   jax.ShapeDtypeStruct((B, 1, Sp), jnp.float32),
                   jax.ShapeDtypeStruct((B, Hp), jnp.float32)),
        grid_spec=grid_spec,
        compiler_params=pltpu.CompilerParams(
            # Both axes sequential: pass 1 depends on pass-0 scratch, and the
            # online log-sum-exp is sequential over vocab tiles.
            # TODO(synk): on v7x, split vocab tiles across the 2 TensorCores via
            # per-core partial lse + combine.
            dimension_semantics=("arbitrary", "arbitrary")),
    )(ids, prepped['embedding'], h0_p, c0_p, enc_p,
      prepped['w_ih_f'], prepped['w_hh_f'], prepped['b_lstm_f'],
      prepped['w_attn'], prepped['b_attn_col'],
      prepped['w_concat_h_t'], prepped['w_concat_c_t'], prepped['b_concat'],
      prepped['w_out_t'], prepped['b_out'])

    log_probs = logp_p[:, :V]
    hidden = (h1_p[None, :, :H], c1_p[None, :, :H])       # (1, B, H) each
    attn_weights = attn_p[:, :, :S]                       # (B, 1, S)
    representation = rep_p[:, :H]                         # (B, H)
    return log_probs, hidden, attn_weights, representation


# ---------------------------- pure-JAX reference ---------------------------- #

def reference_step(params, input_step, last_hidden, encoder_outputs):
    emb = params['embedding'][input_step]
    h0, c0 = last_hidden
    H = params['w_hh'].shape[1]
    gates = emb @ params['w_ih'].T + h0[0] @ params['w_hh'].T + params['b_lstm']
    i = jax.nn.sigmoid(gates[:, 0:H])
    f = jax.nn.sigmoid(gates[:, H:2 * H])
    g = jnp.tanh(gates[:, 2 * H:3 * H])
    o = jax.nn.sigmoid(gates[:, 3 * H:4 * H])
    c1 = f * c0[0] + i * g
    h1 = o * jnp.tanh(c1)
    energy = encoder_outputs @ params['w_attn'].T + params['b_attn'][0]
    scores = jnp.sum(h1[None] * energy, axis=2).T
    attn = jax.nn.softmax(scores, axis=1)
    ctx = jnp.einsum('bs,sbh->bh', attn, encoder_outputs)
    cc = jnp.concatenate([h1, ctx], axis=1) @ params['w_concat'].T + params['b_concat'][0]
    rep = jnp.maximum(cc, 0.0)
    logits = rep @ params['w_out'].T + params['b_out'][0]
    logp = jax.nn.log_softmax(logits, axis=1)
    return logp, (h1[None], c1[None]), attn[:, None, :], rep


# ---------------------------------- main ------------------------------------ #

if __name__ == "__main__":
    B, S, H, E, V = 4, 8, 32, 32, 48   # batch, src len, hidden, emb2_size, voc2.nwords
    key = jax.random.PRNGKey(0)
    ks = jax.random.split(key, 12)

    def unif(k, shape, scale):
        return jax.random.uniform(k, shape, jnp.float32, -scale, scale)

    init_range = 0.1
    s = 1.0 / jnp.sqrt(H)
    params = {
        'embedding': unif(ks[0], (V, E), init_range),
        'w_ih':      unif(ks[1], (4 * H, E), s),
        'w_hh':      unif(ks[2], (4 * H, H), s),
        'b_lstm':    unif(ks[3], (1, 4 * H), s) + unif(ks[4], (1, 4 * H), s),  # b_ih + b_hh
        'w_attn':    unif(ks[5], (H, H), s),          # Attn 'general' Linear(H, H)
        'b_attn':    unif(ks[6], (1, H), s),
        'w_concat':  unif(ks[7], (H, 2 * H), 1.0 / jnp.sqrt(2 * H)),
        'b_concat':  unif(ks[8], (1, H), 1.0 / jnp.sqrt(2 * H)),
        'w_out':     unif(ks[9], (V, H), s),
        'b_out':     unif(ks[10], (1, V), s),
    }

    input_step = jax.random.randint(ks[11], (B,), 0, V, dtype=jnp.int32)
    kh = jax.random.split(jax.random.PRNGKey(1), 3)
    last_hidden = (jax.random.normal(kh[0], (1, B, H), jnp.float32) * 0.1,
                   jax.random.normal(kh[1], (1, B, H), jnp.float32) * 0.1)
    encoder_outputs = jax.random.normal(kh[2], (S, B, H), jnp.float32) * 0.5

    # one-time prep (outside the decode loop): weight re-layout + lane padding
    prepped = prepare_params(params)

    out = luong_attn_decoder_step(prepped, input_step, last_hidden, encoder_outputs,
                                  hidden_size=H, output_size=V)
    out = jax.block_until_ready(out)
    log_probs, hidden, attn_weights, representation = out

    ref = reference_step(params, input_step, last_hidden, encoder_outputs)
    for a, r in zip(jax.tree_util.tree_leaves(out), jax.tree_util.tree_leaves(ref)):
        assert a.shape == r.shape and a.dtype == r.dtype
        assert jnp.allclose(a, r, atol=2e-3, rtol=2e-3)

    assert log_probs.shape == (B, V)
    assert hidden[0].shape == (1, B, H) and hidden[1].shape == (1, B, H)
    assert attn_weights.shape == (B, 1, S)
    assert representation.shape == (B, H)
    print("KERNEL_OK")
</pallas_src>

<mosaic_0001>
module attributes {stable_mosaic.version = 11 : i64} {
  func.func @_fused_decoder_kernel(%arg0: i32, %arg1: i32, %arg2: memref<4xi32, #tpu.memory_space<smem>>, %arg3: memref<48x128xf32, #tpu.memory_space<vmem>>, %arg4: memref<4x128xf32, #tpu.memory_space<vmem>>, %arg5: memref<4x128xf32, #tpu.memory_space<vmem>>, %arg6: memref<4x128x128xf32, #tpu.memory_space<vmem>>, %arg7: memref<128x512xf32, #tpu.memory_space<vmem>>, %arg8: memref<128x512xf32, #tpu.memory_space<vmem>>, %arg9: memref<1x512xf32, #tpu.memory_space<vmem>>, %arg10: memref<128x128xf32, #tpu.memory_space<vmem>>, %arg11: memref<128x1xf32, #tpu.memory_space<vmem>>, %arg12: memref<128x128xf32, #tpu.memory_space<vmem>>, %arg13: memref<128x128xf32, #tpu.memory_space<vmem>>, %arg14: memref<1x128xf32, #tpu.memory_space<vmem>>, %arg15: memref<128x256xf32, #tpu.memory_space<vmem>>, %arg16: memref<1x256xf32, #tpu.memory_space<vmem>>, %arg17: memref<4x256xf32, #tpu.memory_space<vmem>>, %arg18: memref<4x128xf32, #tpu.memory_space<vmem>>, %arg19: memref<4x128xf32, #tpu.memory_space<vmem>>, %arg20: memref<4x1x128xf32, #tpu.memory_space<vmem>>, %arg21: memref<4x128xf32, #tpu.memory_space<vmem>>, %arg22: memref<4x128xf32, #tpu.memory_space<vmem>>, %arg23: memref<4x1xf32, #tpu.memory_space<vmem>>, %arg24: memref<4x1xf32, #tpu.memory_space<vmem>>) attributes {dimension_semantics = [#tpu.dimension_semantics<arbitrary>, #tpu.dimension_semantics<arbitrary>], iteration_bounds = array<i64: 2, 1>, scalar_prefetch = 1 : i64, scratch_operands = 3 : i64, tpu.core_type = #tpu.core_type<tc>, window_params = [{pipeline_mode = #tpu.pipeline_mode<synchronous>, transform_indices = @transform_0, window_bounds = array<i64: 48, 128>}, {pipeline_mode = #tpu.pipeline_mode<synchronous>, transform_indices = @transform_1, window_bounds = array<i64: 4, 128>}, {pipeline_mode = #tpu.pipeline_mode<synchronous>, transform_indices = @transform_2, window_bounds = array<i64: 4, 128>}, {pipeline_mode = #tpu.pipeline_mode<synchronous>, transform_indices = @transform_3, window_bounds = array<i64: 4, 128, 128>}, {pipeline_mode = #tpu.pipeline_mode<synchronous>, transform_indices = @transform_4, window_bounds = array<i64: 128, 512>}, {pipeline_mode = #tpu.pipeline_mode<synchronous>, transform_indices = @transform_5, window_bounds = array<i64: 128, 512>}, {pipeline_mode = #tpu.pipeline_mode<synchronous>, transform_indices = @transform_6, window_bounds = array<i64: 1, 512>}, {pipeline_mode = #tpu.pipeline_mode<synchronous>, transform_indices = @transform_7, window_bounds = array<i64: 128, 128>}, {pipeline_mode = #tpu.pipeline_mode<synchronous>, transform_indices = @transform_8, window_bounds = array<i64: 128, 1>}, {pipeline_mode = #tpu.pipeline_mode<synchronous>, transform_indices = @transform_9, window_bounds = array<i64: 128, 128>}, {pipeline_mode = #tpu.pipeline_mode<synchronous>, transform_indices = @transform_10, window_bounds = array<i64: 128, 128>}, {pipeline_mode = #tpu.pipeline_mode<synchronous>, transform_indices = @transform_11, window_bounds = array<i64: 1, 128>}, {transform_indices = @transform_12, window_bounds = array<i64: 128, 256>}, {transform_indices = @transform_13, window_bounds = array<i64: 1, 256>}, {transform_indices = @transform_14, window_bounds = array<i64: 4, 256>}, {pipeline_mode = #tpu.pipeline_mode<synchronous>, transform_indices = @transform_15, window_bounds = array<i64: 4, 128>}, {pipeline_mode = #tpu.pipeline_mode<synchronous>, transform_indices = @transform_16, window_bounds = array<i64: 4, 128>}, {pipeline_mode = #tpu.pipeline_mode<synchronous>, transform_indices = @transform_17, window_bounds = array<i64: 4, 1, 128>}, {pipeline_mode = #tpu.pipeline_mode<synchronous>, transform_indices = @transform_18, window_bounds = array<i64: 4, 128>}]} {
    %c0_i32 = arith.constant 0 : i32
    %0 = arith.cmpi eq, %arg0, %c0_i32 : i32
    %c0_i32_0 = arith.constant 0 : i32
    %1 = arith.cmpi eq, %arg1, %c0_i32_0 : i32
    %2 = arith.andi %0, %1 : i1
    %3 = arith.extui %2 : i1 to i32
    %c0_i32_1 = arith.constant 0 : i32
    %4 = arith.cmpi ne, %3, %c0_i32_1 : i32
    scf.if %4 {
      %c0_10 = arith.constant 0 : index
      %17 = memref.load %arg2[%c0_10] : memref<4xi32, #tpu.memory_space<smem>>
      %18 = arith.index_cast %17 : i32 to index
      %c0_11 = arith.constant 0 : index
      %19 = vector.load %arg3[%18, %c0_11] : memref<48x128xf32, #tpu.memory_space<vmem>>, vector<1x128xf32>
      %c1 = arith.constant 1 : index
      %20 = memref.load %arg2[%c1] : memref<4xi32, #tpu.memory_space<smem>>
      %21 = arith.index_cast %20 : i32 to index
      %c0_12 = arith.constant 0 : index
      %22 = vector.load %arg3[%21, %c0_12] : memref<48x128xf32, #tpu.memory_space<vmem>>, vector<1x128xf32>
      %c2 = arith.constant 2 : index
      %23 = memref.load %arg2[%c2] : memref<4xi32, #tpu.memory_space<smem>>
      %24 = arith.index_cast %23 : i32 to index
      %c0_13 = arith.constant 0 : index
      %25 = vector.load %arg3[%24, %c0_13] : memref<48x128xf32, #tpu.memory_space<vmem>>, vector<1x128xf32>
      %c3 = arith.constant 3 : index
      %26 = memref.load %arg2[%c3] : memref<4xi32, #tpu.memory_space<smem>>
      %27 = arith.index_cast %26 : i32 to index
      %c0_14 = arith.constant 0 : index
      %28 = vector.load %arg3[%27, %c0_14] : memref<48x128xf32, #tpu.memory_space<vmem>>, vector<1x128xf32>
      %29 = tpu.concatenate %19, %22, %25, %28 in 0 : vector<1x128xf32>, vector<1x128xf32>, vector<1x128xf32>, vector<1x128xf32> -> vector<4x128xf32>
      %c0_15 = arith.constant 0 : index
      %c0_16 = arith.constant 0 : index
      %30 = vector.load %arg7[%c0_15, %c0_16] : memref<128x512xf32, #tpu.memory_space<vmem>>, vector<128x512xf32>
      %cst_17 = arith.constant dense<0.000000e+00> : vector<4x512xf32>
      %31 = tpu.matmul %29, %30, %cst_17 {dimension_numbers = #tpu.dot_dimension_numbers<[1], [0], [0], [1], [0, 0, 1, 1], [], []>} : vector<4x128xf32>, vector<128x512xf32>, vector<4x512xf32> -> vector<4x512xf32>
      %c0_18 = arith.constant 0 : index
      %c0_19 = arith.constant 0 : index
      %32 = vector.load %arg4[%c0_18, %c0_19] : memref<4x128xf32, #tpu.memory_space<vmem>>, vector<4x128xf32>
      %c0_20 = arith.constant 0 : index
      %c0_21 = arith.constant 0 : index
      %33 = vector.load %arg8[%c0_20, %c0_21] : memref<128x512xf32, #tpu.memory_space<vmem>>, vector<128x512xf32>
      %cst_22 = arith.constant dense<0.000000e+00> : vector<4x512xf32>
      %34 = tpu.matmul %32, %33, %cst_22 {dimension_numbers = #tpu.dot_dimension_numbers<[1], [0], [0], [1], [0, 0, 1, 1], [], []>} : vector<4x128xf32>, vector<128x512xf32>, vector<4x512xf32> -> vector<4x512xf32>
      %35 = arith.addf %31, %34 : vector<4x512xf32>
      %c0_23 = arith.constant 0 : index
      %c0_24 = arith.constant 0 : index
      %36 = vector.load %arg9[%c0_23, %c0_24] : memref<1x512xf32, #tpu.memory_space<vmem>>, vector<1x512xf32>
      %37 = vector.broadcast %36 : vector<1x512xf32> to vector<4x512xf32>
      %38 = arith.addf %35, %37 : vector<4x512xf32>
      %39 = vector.extract_strided_slice %38 {offsets = [0, 0], sizes = [4, 128], strides = [1, 1]} : vector<4x512xf32> to vector<4x128xf32>
      %40 = arith.negf %39 : vector<4x128xf32>
      %41 = math.exp %40 : vector<4x128xf32>
      %cst_25 = arith.constant 1.000000e+00 : f32
      %42 = vector.broadcast %cst_25 : f32 to vector<4x128xf32>
      %43 = arith.addf %42, %41 : vector<4x128xf32>
      %44 = arith.divf %42, %43 : vector<4x128xf32>
      %45 = vector.extract_strided_slice %38 {offsets = [0, 128], sizes = [4, 128], strides = [1, 1]} : vector<4x512xf32> to vector<4x128xf32>
      %46 = arith.negf %45 : vector<4x128xf32>
      %47 = math.exp %46 : vector<4x128xf32>
      %cst_26 = arith.constant 1.000000e+00 : f32
      %48 = vector.broadcast %cst_26 : f32 to vector<4x128xf32>
      %49 = arith.addf %48, %47 : vector<4x128xf32>
      %50 = arith.divf %48, %49 : vector<4x128xf32>
      %51 = vector.extract_strided_slice %38 {offsets = [0, 256], sizes = [4, 128], strides = [1, 1]} : vector<4x512xf32> to vector<4x128xf32>
      %52 = math.tanh %51 : vector<4x128xf32>
      %53 = vector.extract_strided_slice %38 {offsets = [0, 384], sizes = [4, 128], strides = [1, 1]} : vector<4x512xf32> to vector<4x128xf32>
      %54 = arith.negf %53 : vector<4x128xf32>
      %55 = math.exp %54 : vector<4x128xf32>
      %cst_27 = arith.constant 1.000000e+00 : f32
      %56 = vector.broadcast %cst_27 : f32 to vector<4x128xf32>
      %57 = arith.addf %56, %55 : vector<4x128xf32>
      %58 = arith.divf %56, %57 : vector<4x128xf32>
      %c0_28 = arith.constant 0 : index
      %c0_29 = arith.constant 0 : index
      %59 = vector.load %arg5[%c0_28, %c0_29] : memref<4x128xf32, #tpu.memory_space<vmem>>, vector<4x128xf32>
      %60 = arith.mulf %50, %59 : vector<4x128xf32>
      %61 = arith.mulf %44, %52 : vector<4x128xf32>
      %62 = arith.addf %60, %61 : vector<4x128xf32>
      %63 = math.tanh %62 : vector<4x128xf32>
      %64 = arith.mulf %58, %63 : vector<4x128xf32>
      %c0_30 = arith.constant 0 : index
      %c0_31 = arith.constant 0 : index
      %65 = vector.load %arg18[%c0_30, %c0_31] : memref<4x128xf32, #tpu.memory_space<vmem>>, vector<4x128xf32>
      tpu.vector_store %arg18[%c0_30, %c0_31], %64 {strides = array<i32>} : memref<4x128xf32, #tpu.memory_space<vmem>>, vector<4x128xf32>,
      %c0_32 = arith.constant 0 : index
      %c0_33 = arith.constant 0 : index
      %66 = vector.load %arg19[%c0_32, %c0_33] : memref<4x128xf32, #tpu.memory_space<vmem>>, vector<4x128xf32>
      tpu.vector_store %arg19[%c0_32, %c0_33], %62 {strides = array<i32>} : memref<4x128xf32, #tpu.memory_space<vmem>>, vector<4x128xf32>,
      %c0_34 = arith.constant 0 : index
      %c0_35 = arith.constant 0 : index
      %c0_36 = arith.constant 0 : index
      %67 = vector.load %arg6[%c0_34, %c0_35, %c0_36] : memref<4x128x128xf32, #tpu.memory_space<vmem>>, vector<4x128x128xf32>
      %c0_37 = arith.constant 0 : index
      %c0_38 = arith.constant 0 : index
      %68 = vector.load %arg10[%c0_37, %c0_38] : memref<128x128xf32, #tpu.memory_space<vmem>>, vector<128x128xf32>
      %cst_39 = arith.constant dense<0.000000e+00> : vector<4x128xf32>
      %69 = tpu.matmul %64, %68, %cst_39 {dimension_numbers = #tpu.dot_dimension_numbers<[1], [0], [0], [1], [0, 0, 1, 1], [], []>} : vector<4x128xf32>, vector<128x128xf32>, vector<4x128xf32> -> vector<4x128xf32>
      %c0_40 = arith.constant 0 : index
      %c0_41 = arith.constant 0 : index
      %70 = vector.load %arg11[%c0_40, %c0_41] : memref<128x1xf32, #tpu.memory_space<vmem>>, vector<128x1xf32>
      %cst_42 = arith.constant dense<0.000000e+00> : vector<4x1xf32>
      %71 = tpu.matmul %64, %70, %cst_42 {dimension_numbers = #tpu.dot_dimension_numbers<[1], [0], [0], [1], [0, 0, 1, 1], [], []>} : vector<4x128xf32>, vector<128x1xf32>, vector<4x1xf32> -> vector<4x1xf32>
      %72 = vector.shape_cast %69 : vector<4x128xf32> to vector<4x1x128xf32>
      %73 = vector.broadcast %72 : vector<4x1x128xf32> to vector<4x128x128xf32>
      %74 = arith.mulf %67, %73 : vector<4x128x128xf32>
      %cst_43 = arith.constant dense<0.000000e+00> : vector<4x128xf32>
      %75 = vector.multi_reduction <add>, %74, %cst_43 [2] : vector<4x128x128xf32> to vector<4x128xf32>
      %76 = vector.broadcast %71 : vector<4x1xf32> to vector<4x128xf32>
      %77 = arith.addf %75, %76 : vector<4x128xf32>
      %78 = tpu.iota {dimensions = array<i32: 1>} : vector<4x128xi32>
      %c8_i32 = arith.constant 8 : i32
      %79 = vector.broadcast %c8_i32 : i32 to vector<4x128xi32>
      %80 = arith.cmpi slt, %78, %79 : vector<4x128xi32>
      %cst_44 = arith.constant -1.000000e+30 : f32
      %81 = vector.broadcast %cst_44 : f32 to vector<4x128xf32>
      %82 = arith.select %80, %77, %81 : vector<4x128xi1>, vector<4x128xf32>
      %cst_45 = arith.constant dense<0xFF800000> : vector<4xf32>
      %83 = vector.multi_reduction <maximumf>, %82, %cst_45 [1] : vector<4x128xf32> to vector<4xf32>
      %84 = vector.shape_cast %83 : vector<4xf32> to vector<4x1xf32>
      %85 = vector.broadcast %84 : vector<4x1xf32> to vector<4x128xf32>
      %86 = arith.subf %82, %85 : vector<4x128xf32>
      %87 = math.exp %86 : vector<4x128xf32>
      %cst_46 = arith.constant dense<0.000000e+00> : vector<4xf32>
      %88 = vector.multi_reduction <add>, %87, %cst_46 [1] : vector<4x128xf32> to vector<4xf32>
      %89 = vector.shape_cast %88 : vector<4xf32> to vector<4x1xf32>
      %90 = vector.broadcast %89 : vector<4x1xf32> to vector<4x128xf32>
      %91 = arith.divf %87, %90 : vector<4x128xf32>
      %92 = vector.shape_cast %91 : vector<4x128xf32> to vector<4x1x128xf32>
      %c0_47 = arith.constant 0 : index
      %c0_48 = arith.constant 0 : index
      %c0_49 = arith.constant 0 : index
      %93 = vector.load %arg20[%c0_47, %c0_48, %c0_49] : memref<4x1x128xf32, #tpu.memory_space<vmem>>, vector<4x1x128xf32>
      tpu.vector_store %arg20[%c0_47, %c0_48, %c0_49], %92 {strides = array<i32>} : memref<4x1x128xf32, #tpu.memory_space<vmem>>, vector<4x1x128xf32>,
      %94 = vector.shape_cast %91 : vector<4x128xf32> to vector<4x128x1xf32>
      %95 = vector.broadcast %94 : vector<4x128x1xf32> to vector<4x128x128xf32>
      %96 = arith.mulf %95, %67 : vector<4x128x128xf32>
      %cst_50 = arith.constant dense<0.000000e+00> : vector<4x128xf32>
      %97 = vector.multi_reduction <add>, %96, %cst_50 [1] : vector<4x128x128xf32> to vector<4x128xf32>
      %c0_51 = arith.constant 0 : index
      %c0_52 = arith.constant 0 : index
      %98 = vector.load %arg12[%c0_51, %c0_52] : memref<128x128xf32, #tpu.memory_space<vmem>>, vector<128x128xf32>
      %cst_53 = arith.constant dense<0.000000e+00> : vector<4x128xf32>
      %99 = tpu.matmul %64, %98, %cst_53 {dimension_numbers = #tpu.dot_dimension_numbers<[1], [0], [0], [1], [0, 0, 1, 1], [], []>} : vector<4x128xf32>, vector<128x128xf32>, vector<4x128xf32> -> vector<4x128xf32>
      %c0_54 = arith.constant 0 : index
      %c0_55 = arith.constant 0 : index
      %100 = vector.load %arg13[%c0_54, %c0_55] : memref<128x128xf32, #tpu.memory_space<vmem>>, vector<128x128xf32>
      %cst_56 = arith.constant dense<0.000000e+00> : vector<4x128xf32>
      %101 = tpu.matmul %97, %100, %cst_56 {dimension_numbers = #tpu.dot_dimension_numbers<[1], [0], [0], [1], [0, 0, 1, 1], [], []>} : vector<4x128xf32>, vector<128x128xf32>, vector<4x128xf32> -> vector<4x128xf32>
      %102 = arith.addf %99, %101 : vector<4x128xf32>
      %c0_57 = arith.constant 0 : index
      %c0_58 = arith.constant 0 : index
      %103 = vector.load %arg14[%c0_57, %c0_58] : memref<1x128xf32, #tpu.memory_space<vmem>>, vector<1x128xf32>
      %104 = vector.broadcast %103 : vector<1x128xf32> to vector<4x128xf32>
      %105 = arith.addf %102, %104 : vector<4x128xf32>
      %cst_59 = arith.constant 0.000000e+00 : f32
      %106 = vector.broadcast %cst_59 : f32 to vector<4x128xf32>
      %107 = arith.maximumf %105, %106 : vector<4x128xf32>
      %c0_60 = arith.constant 0 : index
      %c0_61 = arith.constant 0 : index
      %108 = vector.load %arg21[%c0_60, %c0_61] : memref<4x128xf32, #tpu.memory_space<vmem>>, vector<4x128xf32>
      tpu.vector_store %arg21[%c0_60, %c0_61], %107 {strides = array<i32>} : memref<4x128xf32, #tpu.memory_space<vmem>>, vector<4x128xf32>,
      %c0_62 = arith.constant 0 : index
      %c0_63 = arith.constant 0 : index
      %109 = vector.load %arg22[%c0_62, %c0_63] : memref<4x128xf32, #tpu.memory_space<vmem>>, vector<4x128xf32>
      tpu.vector_store %arg22[%c0_62, %c0_63], %107 {strides = array<i32>} : memref<4x128xf32, #tpu.memory_space<vmem>>, vector<4x128xf32>,
      %cst_64 = arith.constant -1.000000e+30 : f32
      %110 = vector.broadcast %cst_64 : f32 to vector<4x1xf32>
      %c0_65 = arith.constant 0 : index
      %c0_66 = arith.constant 0 : index
      %111 = vector.load %arg23[%c0_65, %c0_66] : memref<4x1xf32, #tpu.memory_space<vmem>>, vector<4x1xf32>
      tpu.vector_store %arg23[%c0_65, %c0_66], %110 {strides = array<i32>} : memref<4x1xf32, #tpu.memory_space<vmem>>, vector<4x1xf32>,
      %cst_67 = arith.constant 0.000000e+00 : f32
      %112 = vector.broadcast %cst_67 : f32 to vector<4x1xf32>
      %c0_68 = arith.constant 0 : index
      %c0_69 = arith.constant 0 : index
      %113 = vector.load %arg24[%c0_68, %c0_69] : memref<4x1xf32, #tpu.memory_space<vmem>>, vector<4x1xf32>
      tpu.vector_store %arg24[%c0_68, %c0_69], %112 {strides = array<i32>} : memref<4x1xf32, #tpu.memory_space<vmem>>, vector<4x1xf32>,
    } else {
    }
    %c0 = arith.constant 0 : index
    %c0_2 = arith.constant 0 : index
    %5 = vector.load %arg22[%c0, %c0_2] : memref<4x128xf32, #tpu.memory_space<vmem>>, vector<4x128xf32>
    %c0_3 = arith.constant 0 : index
    %c0_4 = arith.constant 0 : index
    %6 = vector.load %arg15[%c0_3, %c0_4] : memref<128x256xf32, #tpu.memory_space<vmem>>, vector<128x256xf32>
    %cst = arith.constant dense<0.000000e+00> : vector<4x256xf32>
    %7 = tpu.matmul %5, %6, %cst {dimension_numbers = #tpu.dot_dimension_numbers<[1], [0], [0], [1], [0, 0, 1, 1], [], []>} : vector<4x128xf32>, vector<128x256xf32>, vector<4x256xf32> -> vector<4x256xf32>
    %c0_5 = arith.constant 0 : index
    %c0_6 = arith.constant 0 : index
    %8 = vector.load %arg16[%c0_5, %c0_6] : memref<1x256xf32, #tpu.memory_space<vmem>>, vector<1x256xf32>
    %9 = vector.broadcast %8 : vector<1x256xf32> to vector<4x256xf32>
    %10 = arith.addf %7, %9 : vector<4x256xf32>
    %c0_i32_7 = arith.constant 0 : i32
    %11 = arith.cmpi eq, %arg0, %c0_i32_7 : i32
    %12 = arith.extui %11 : i1 to i32
    %c0_i32_8 = arith.constant 0 : i32
    %13 = arith.cmpi ne, %12, %c0_i32_8 : i32
    scf.if %13 {
      %c0_10 = arith.constant 0 : index
      %c0_11 = arith.constant 0 : index
      %17 = vector.load %arg23[%c0_10, %c0_11] : memref<4x1xf32, #tpu.memory_space<vmem>>, vector<4x1xf32>
      %cst_12 = arith.constant dense<0xFF800000> : vector<4xf32>
      %18 = vector.multi_reduction <maximumf>, %10, %cst_12 [1] : vector<4x256xf32> to vector<4xf32>
      %19 = vector.shape_cast %18 : vector<4xf32> to vector<4x1xf32>
      %20 = arith.maximumf %17, %19 : vector<4x1xf32>
      %c0_13 = arith.constant 0 : index
      %c0_14 = arith.constant 0 : index
      %21 = vector.load %arg24[%c0_13, %c0_14] : memref<4x1xf32, #tpu.memory_space<vmem>>, vector<4x1xf32>
      %c0_15 = arith.constant 0 : index
      %c0_16 = arith.constant 0 : index
      %22 = vector.load %arg23[%c0_15, %c0_16] : memref<4x1xf32, #tpu.memory_space<vmem>>, vector<4x1xf32>
      %23 = arith.subf %22, %20 : vector<4x1xf32>
      %24 = math.exp %23 : vector<4x1xf32>
      %25 = arith.mulf %21, %24 : vector<4x1xf32>
      %26 = vector.broadcast %20 : vector<4x1xf32> to vector<4x256xf32>
      %27 = arith.subf %10, %26 : vector<4x256xf32>
      %28 = math.exp %27 : vector<4x256xf32>
      %cst_17 = arith.constant dense<0.000000e+00> : vector<4xf32>
      %29 = vector.multi_reduction <add>, %28, %cst_17 [1] : vector<4x256xf32> to vector<4xf32>
      %30 = vector.shape_cast %29 : vector<4xf32> to vector<4x1xf32>
      %31 = arith.addf %25, %30 : vector<4x1xf32>
      %c0_18 = arith.constant 0 : index
      %c0_19 = arith.constant 0 : index
      %32 = vector.load %arg24[%c0_18, %c0_19] : memref<4x1xf32, #tpu.memory_space<vmem>>, vector<4x1xf32>
      tpu.vector_store %arg24[%c0_18, %c0_19], %31 {strides = array<i32>} : memref<4x1xf32, #tpu.memory_space<vmem>>, vector<4x1xf32>,
      %c0_20 = arith.constant 0 : index
      %c0_21 = arith.constant 0 : index
      %33 = vector.load %arg23[%c0_20, %c0_21] : memref<4x1xf32, #tpu.memory_space<vmem>>, vector<4x1xf32>
      tpu.vector_store %arg23[%c0_20, %c0_21], %20 {strides = array<i32>} : memref<4x1xf32, #tpu.memory_space<vmem>>, vector<4x1xf32>,
      %c0_22 = arith.constant 0 : index
      %c0_23 = arith.constant 0 : index
      %34 = vector.load %arg17[%c0_22, %c0_23] : memref<4x256xf32, #tpu.memory_space<vmem>>, vector<4x256xf32>
      tpu.vector_store %arg17[%c0_22, %c0_23], %10 {strides = array<i32>} : memref<4x256xf32, #tpu.memory_space<vmem>>, vector<4x256xf32>,
    } else {
    }
    %c1_i32 = arith.constant 1 : i32
    %14 = arith.cmpi eq, %arg0, %c1_i32 : i32
    %15 = arith.extui %14 : i1 to i32
    %c0_i32_9 = arith.constant 0 : i32
    %16 = arith.cmpi ne, %15, %c0_i32_9 : i32
    scf.if %16 {
      %c0_10 = arith.constant 0 : index
      %c0_11 = arith.constant 0 : index
      %17 = vector.load %arg23[%c0_10, %c0_11] : memref<4x1xf32, #tpu.memory_space<vmem>>, vector<4x1xf32>
      %18 = vector.broadcast %17 : vector<4x1xf32> to vector<4x256xf32>
      %19 = arith.subf %10, %18 : vector<4x256xf32>
      %c0_12 = arith.constant 0 : index
      %c0_13 = arith.constant 0 : index
      %20 = vector.load %arg24[%c0_12, %c0_13] : memref<4x1xf32, #tpu.memory_space<vmem>>, vector<4x1xf32>
      %21 = math.log %20 : vector<4x1xf32>
      %22 = vector.broadcast %21 : vector<4x1xf32> to vector<4x256xf32>
      %23 = arith.subf %19, %22 : vector<4x256xf32>
      %c0_14 = arith.constant 0 : index
      %c0_15 = arith.constant 0 : index
      %24 = vector.load %arg17[%c0_14, %c0_15] : memref<4x256xf32, #tpu.memory_space<vmem>>, vector<4x256xf32>
      tpu.vector_store %arg17[%c0_14, %c0_15], %23 {strides = array<i32>} : memref<4x256xf32, #tpu.memory_space<vmem>>, vector<4x256xf32>,
    } else {
    }
    return
  }
  func.func @transform_0(%arg0: i32, %arg1: i32, %arg2: memref<4xi32, #tpu.memory_space<smem>>) -> (i32, i32) {
    %c0_i32 = arith.constant 0 : i32
    %c0_i32_0 = arith.constant 0 : i32
    %c0_i32_1 = arith.constant 0 : i32
    return %c0_i32, %c0_i32_0 : i32, i32
  }
  func.func @transform_1(%arg0: i32, %arg1: i32, %arg2: memref<4xi32, #tpu.memory_space<smem>>) -> (i32, i32) {
    %c0_i32 = arith.constant 0 : i32
    %c0_i32_0 = arith.constant 0 : i32
    %c0_i32_1 = arith.constant 0 : i32
    return %c0_i32, %c0_i32_0 : i32, i32
  }
  func.func @transform_2(%arg0: i32, %arg1: i32, %arg2: memref<4xi32, #tpu.memory_space<smem>>) -> (i32, i32) {
    %c0_i32 = arith.constant 0 : i32
    %c0_i32_0 = arith.constant 0 : i32
    %c0_i32_1 = arith.constant 0 : i32
    return %c0_i32, %c0_i32_0 : i32, i32
  }
  func.func @transform_3(%arg0: i32, %arg1: i32, %arg2: memref<4xi32, #tpu.memory_space<smem>>) -> (i32, i32, i32) {
    %c0_i32 = arith.constant 0 : i32
    %c0_i32_0 = arith.constant 0 : i32
    %c0_i32_1 = arith.constant 0 : i32
    %c0_i32_2 = arith.constant 0 : i32
    return %c0_i32, %c0_i32_0, %c0_i32_1 : i32, i32, i32
  }
  func.func @transform_4(%arg0: i32, %arg1: i32, %arg2: memref<4xi32, #tpu.memory_space<smem>>) -> (i32, i32) {
    %c0_i32 = arith.constant 0 : i32
    %c0_i32_0 = arith.constant 0 : i32
    %c0_i32_1 = arith.constant 0 : i32
    return %c0_i32, %c0_i32_0 : i32, i32
  }
  func.func @transform_5(%arg0: i32, %arg1: i32, %arg2: memref<4xi32, #tpu.memory_space<smem>>) -> (i32, i32) {
    %c0_i32 = arith.constant 0 : i32
    %c0_i32_0 = arith.constant 0 : i32
    %c0_i32_1 = arith.constant 0 : i32
    return %c0_i32, %c0_i32_0 : i32, i32
  }
  func.func @transform_6(%arg0: i32, %arg1: i32, %arg2: memref<4xi32, #tpu.memory_space<smem>>) -> (i32, i32) {
    %c0_i32 = arith.constant 0 : i32
    %c0_i32_0 = arith.constant 0 : i32
    %c0_i32_1 = arith.constant 0 : i32
    return %c0_i32, %c0_i32_0 : i32, i32
  }
  func.func @transform_7(%arg0: i32, %arg1: i32, %arg2: memref<4xi32, #tpu.memory_space<smem>>) -> (i32, i32) {
    %c0_i32 = arith.constant 0 : i32
    %c0_i32_0 = arith.constant 0 : i32
    %c0_i32_1 = arith.constant 0 : i32
    return %c0_i32, %c0_i32_0 : i32, i32
  }
  func.func @transform_8(%arg0: i32, %arg1: i32, %arg2: memref<4xi32, #tpu.memory_space<smem>>) -> (i32, i32) {
    %c0_i32 = arith.constant 0 : i32
    %c0_i32_0 = arith.constant 0 : i32
    %c0_i32_1 = arith.constant 0 : i32
    return %c0_i32, %c0_i32_0 : i32, i32
  }
  func.func @transform_9(%arg0: i32, %arg1: i32, %arg2: memref<4xi32, #tpu.memory_space<smem>>) -> (i32, i32) {
    %c0_i32 = arith.constant 0 : i32
    %c0_i32_0 = arith.constant 0 : i32
    %c0_i32_1 = arith.constant 0 : i32
    return %c0_i32, %c0_i32_0 : i32, i32
  }
  func.func @transform_10(%arg0: i32, %arg1: i32, %arg2: memref<4xi32, #tpu.memory_space<smem>>) -> (i32, i32) {
    %c0_i32 = arith.constant 0 : i32
    %c0_i32_0 = arith.constant 0 : i32
    %c0_i32_1 = arith.constant 0 : i32
    return %c0_i32, %c0_i32_0 : i32, i32
  }
  func.func @transform_11(%arg0: i32, %arg1: i32, %arg2: memref<4xi32, #tpu.memory_space<smem>>) -> (i32, i32) {
    %c0_i32 = arith.constant 0 : i32
    %c0_i32_0 = arith.constant 0 : i32
    %c0_i32_1 = arith.constant 0 : i32
    return %c0_i32, %c0_i32_0 : i32, i32
  }
  func.func @transform_12(%arg0: i32, %arg1: i32, %arg2: memref<4xi32, #tpu.memory_space<smem>>) -> (i32, i32) {
    %c0_i32 = arith.constant 0 : i32
    %c0_i32_0 = arith.constant 0 : i32
    return %c0_i32, %arg1 : i32, i32
  }
  func.func @transform_13(%arg0: i32, %arg1: i32, %arg2: memref<4xi32, #tpu.memory_space<smem>>) -> (i32, i32) {
    %c0_i32 = arith.constant 0 : i32
    %c0_i32_0 = arith.constant 0 : i32
    return %c0_i32, %arg1 : i32, i32
  }
  func.func @transform_14(%arg0: i32, %arg1: i32, %arg2: memref<4xi32, #tpu.memory_space<smem>>) -> (i32, i32) {
    %c0_i32 = arith.constant 0 : i32
    %c0_i32_0 = arith.constant 0 : i32
    return %c0_i32, %arg1 : i32, i32
  }
  func.func @transform_15(%arg0: i32, %arg1: i32, %arg2: memref<4xi32, #tpu.memory_space<smem>>) -> (i32, i32) {
    %c0_i32 = arith.constant 0 : i32
    %c0_i32_0 = arith.constant 0 : i32
    %c0_i32_1 = arith.constant 0 : i32
    return %c0_i32, %c0_i32_0 : i32, i32
  }
  func.func @transform_16(%arg0: i32, %arg1: i32, %arg2: memref<4xi32, #tpu.memory_space<smem>>) -> (i32, i32) {
    %c0_i32 = arith.constant 0 : i32
    %c0_i32_0 = arith.constant 0 : i32
    %c0_i32_1 = arith.constant 0 : i32
    return %c0_i32, %c0_i32_0 : i32, i32
  }
  func.func @transform_17(%arg0: i32, %arg1: i32, %arg2: memref<4xi32, #tpu.memory_space<smem>>) -> (i32, i32, i32) {
    %c0_i32 = arith.constant 0 : i32
    %c0_i32_0 = arith.constant 0 : i32
    %c0_i32_1 = arith.constant 0 : i32
    %c0_i32_2 = arith.constant 0 : i32
    return %c0_i32, %c0_i32_0, %c0_i32_1 : i32, i32, i32
  }
  func.func @transform_18(%arg0: i32, %arg1: i32, %arg2: memref<4xi32, #tpu.memory_space<smem>>) -> (i32, i32) {
    %c0_i32 = arith.constant 0 : i32
    %c0_i32_0 = arith.constant 0 : i32
    %c0_i32_1 = arith.constant 0 : i32
    return %c0_i32, %c0_i32_0 : i32, i32
  }
}

</mosaic_0001>

<bundles_post_ra>
// kernel: luong_attn_decoder_step.1
= control target key start
LH: loop header
LB: loop body
LE: loop exit
PB: predicated region body
PF: predicated region fallthrough
CT: control target
= control target key end

     0   :  { %s5754_s0 = inlined_call_operand.vmem [shape: s32[4], index: 0, kind: input, shape index: {}]   ;;  %s5755_s1 = inlined_call_operand.vmem [shape: f32[48,128], index: 1, kind: input, shape index: {}]   ;;  %s5756_s2 = inlined_call_operand.vmem [shape: f32[4,128], index: 2, kind: input, shape index: {}]   ;;  %s5757_s3 = inlined_call_operand.vmem [shape: f32[4,128], index: 3, kind: input, shape index: {}]   ;;  %s5758_s4 = inlined_call_operand.vmem [shape: f32[4,128,128], index: 4, kind: input, shape index: {}]   ;;  %s5759_s5 = inlined_call_operand.vmem [shape: f32[128,512], index: 5, kind: input, shape index: {}]   ;;  %s5760_s6 = inlined_call_operand.hbm [shape: f32[128,512], index: 6, kind: input, shape index: {}]   ;;  %s5761_s7 = inlined_call_operand.vmem [shape: f32[1,512], index: 7, kind: input, shape index: {}]   ;;  %s5762_s8 = inlined_call_operand.vmem [shape: f32[128,128], index: 8, kind: input, shape index: {}]   ;;  %s5763_s9 = inlined_call_operand.vmem [shape: f32[128,1], index: 9, kind: input, shape index: {}]   ;;  %s5764_s10 = inlined_call_operand.hbm [shape: f32[128,128], index: 10, kind: input, shape index: {}]   ;;  %s5765_s11 = inlined_call_operand.hbm [shape: f32[128,128], index: 11, kind: input, shape index: {}]   ;;  %s5766_s12 = inlined_call_operand.vmem [shape: f32[1,128], index: 12, kind: input, shape index: {}]   ;;  %s5767_s13 = inlined_call_operand.hbm [shape: f32[128,256], index: 13, kind: input, shape index: {}]   ;;  %s5768_s14 = inlined_call_operand.vmem [shape: f32[1,256], index: 14, kind: input, shape index: {}]   ;;  %s5769_s15 = inlined_call_operand.vmem [shape: f32[4,256], index: 15, kind: output, shape index: {0}]   ;;  %s5770_s16 = inlined_call_operand.vmem [shape: f32[4,128], index: 16, kind: output, shape index: {1}]   ;;  %s5771_s17 = inlined_call_operand.vmem [shape: f32[4,128], index: 17, kind: output, shape index: {2}]   ;;  %s5772_s18 = inlined_call_operand.hbm [shape: f32[4,1,128], index: 18, kind: output, shape index: {3}]   ;;  %s5773_s19 = inlined_call_operand.hbm [shape: f32[4,128], index: 19, kind: output, shape index: {4}]  }
   0x1   :  { %5786 = sst [smem:[#allocation39_spill]] %s5754_s0 }
   0x2   :  { %5787 = sst [smem:[#allocation40_spill]] %s5755_s1 }
   0x3   :  { %5788 = sst [smem:[#allocation41_spill]] %s5756_s2 }
   0x4   :  { %5789 = sst [smem:[#allocation42_spill]] %s5757_s3 }
   0x5   :  { %5790 = sst [smem:[#allocation43_spill]] %s5760_s6 }
   0x6   :  { %5791 = sst [smem:[#allocation44_spill]] %s5764_s10 }
   0x7   :  { %5792 = sst [smem:[#allocation45_spill]] %s5765_s11 }
   0x8   :  { %5793 = sst [smem:[#allocation46_spill]] %s5766_s12 }
   0x9   :  { %s5794_s20 = sld [smem:[#allocation39_spill]] }
   0xf   :  { %s25_s12 = sshll.u32 %s5794_s20, 4  ;;  %s26_s12 = int_to_ptr.vmem [resolvable:$true] %s25_s12 }
  0x10   :  { %s3768_s21 = scalar_lea.vmem %s26_s12, 16  ;;  %p3773_p1 = scmp.lt.s32.totalorder %s26_s12, %s26_s12 }
  0x11   :  { %p3769_p0 = scmp.ne.s32.totalorder %s26_s12, %s3768_s21  ;;  %p3774_p2 = scmp.lt.s32.totalorder %s3768_s21, %s3768_s21 }
  0x13   :  { %p3775_p3 = por %p3774_p2, %p3773_p1 }
  0x15   :  { %p3776_p4 = pnand %p3775_p3, %p3769_p0 }
  0x17   :  { %3779 = shalt.err (!%p3776_p4)  }
  0x18   :  { %s3978_s1 = smov [#allocation6]  }
  0x19   :  { %28 = dma.vmem_to_smem %s26_s12, 16, %s3978_s1, [#allocation5] }
  0x1a   :  { %3944 = dma.done.wait [#allocation5], 16 }
  0x1b   :  { %3945 = vsyncadd [#allocation5], 4294967280 }
  0x1c   :  { %30 = sfence }
  0x1d   :  { %31 = vsyncpa [#allocation8], 0 }
  0x1e   :  { %32 = vsyncpa [#allocation11], 0 }
  0x1f   :  { %33 = vsyncpa [#allocation14], 0 }
  0x20   :  { %34 = vsyncpa [#allocation9], 0 }
  0x21   :  { %35 = vsyncpa [#allocation17], 0  ;;  %s4104_s22 = smov 0   ;;  %s4106_s2 = smov 0  }
  0x22   :  { %s4108_s23 = smov 0  }
  0x23 LB: > { %s3979_s12 = smov [#allocation10]   ;;  %s5775_s25 = sadd.s32 4294967295, %s3976_s23   ;;  %s3976_s23 = sphi %s4108_s23, %s41_s23   ;;  %s3972_s2 = sphi %s4106_s2, %s5842_s2   ;;  %s3968_s22 = sphi %s4104_s22, %s5841_s22  }
  0x24   : > { %s521_s24 = sshll.u32 %s3979_s12, 4  ;;  %p3336_p5 = scmp.ge.s32.totalorder %s3976_s23, 1  ;;  %s522_s24 = int_to_ptr.vmem [resolvable:$true] %s521_s24 }
  0x25   : > { %p472_p6 = scmp.lt.s32.totalorder %s3976_s23, 3  ;;  %p4124_p7 = scmp.eq.s32.totalorder %s5775_s25, 0 }
  0x26   : > { %s53_s28 = sadd.s32 1, %s3972_s2  ;;  %s3980_s0 = smov [#allocation7]  }
  0x27   : > { %p4128_p8 = pnand %p3336_p5, %p472_p6  ;;  %p4141_p11 = scmp.ge.s32.totalorder %s53_s28, 2 }
  0x28   : > { %s499_s30 = sshll.u32 %s3980_s0, 4  ;;  %s3791_s20 = scalar_lea.vmem %s522_s24, 2048  ;;  %s500_s30 = int_to_ptr.vmem [resolvable:$true] %s499_s30 }
  0x29   : > { %p3600_p9 = pneg %p4128_p8  ;;  %p3792_p13 = scmp.ne.s32.totalorder %s522_s24, %s3791_s20 }
  0x2a   : > { %p3799_p2 = scmp.lt.s32.totalorder %s522_s24, %s522_s24  ;;  %p3800_p3 = scmp.lt.s32.totalorder %s3791_s20, %s3791_s20 }
  0x2b   : > { %p4136_p10 = pnand %p4124_p7, %p3600_p9 }
  0x2c   : > { %p3801_p4 = por %p3800_p3, %p3799_p2 }
  0x2d   : > { %p3782_p12 = pneg %p4136_p10 }
  0x2f   : > { %p3794_p0 = pnand %p3792_p13, %p3782_p12 }
  0x31   : > { %p3795_p1 = pneg %p3794_p0 }
  0x33   : > { %p3802_p5 = pnand %p3801_p4, %p3795_p1 }
  0x35   : > { %3805 = shalt.err (!%p3802_p5)
}
  0x36   : > { %s5776_s21 = smov 128   ;;  %s5777_s1 = smov 8  }
  0x37   : > { %s5799_s10 = sld [smem:[#allocation44_spill]]  ;;  %s5844_s28 = smov (%p4141_p11, %s53_s28), 0 }
  0x38   : > { %5800 = sst [smem:[#allocation24_spill]] %s5844_s28  ;;  %s3817_s20 = scalar_lea.vmem %s500_s30, 8192 }
  0x39   : > { %p3818_p6 = scmp.ne.s32.totalorder %s500_s30, %s3817_s20  ;;  %p3825_p0 = scmp.lt.s32.totalorder %s500_s30, %s500_s30 }
  0x3a   : > { %p3826_p1 = scmp.lt.s32.totalorder %s3817_s20, %s3817_s20 }
  0x3b   : > { %p3820_p9 = pnand %p3818_p6, %p3782_p12 }
  0x3c   : > { %p3827_p2 = por %p3826_p1, %p3825_p0 }
  0x3d   : > { %3606 = dma.hbm_to_vmem [thread:$0]  (!%p4136_p10), %s5799_s10, 2048, %s522_s24, [#allocation11], %s5776_s21, %s5776_s21, %s5777_s1  }
  0x3e   : > { %p3821_p13 = pneg %p3820_p9 }
  0x40   : > { %p3828_p3 = pnand %p3827_p2, %p3821_p13 }
  0x42   : > { %3831 = shalt.err (!%p3828_p3)
}
  0x43   : > { %s3983_s25 = smov 512   ;;  %s3984_s12 = smov 32  }
  0x44   : > { %s5801_s6 = sld [smem:[#allocation43_spill]]  ;;  %s3985_s0 = smov [#allocation12]  }
  0x45   : > { %s534_s21 = sshll.u32 %s3985_s0, 4  ;;  %s3986_s1 = smov [#allocation13]   ;;  %s535_s21 = int_to_ptr.vmem [resolvable:$true] %s534_s21 }
  0x46   : > { %s553_s10 = sshll.u32 %s3986_s1, 4  ;;  %s3843_s28 = scalar_lea.vmem %s535_s21, 2048  ;;  %s554_s10 = int_to_ptr.vmem [resolvable:$true] %s553_s10 }
  0x47   : > { %p3844_p11 = scmp.ne.s32.totalorder %s535_s21, %s3843_s28  ;;  %p3851_p6 = scmp.lt.s32.totalorder %s535_s21, %s535_s21 }
  0x48   : > { %p3852_p9 = scmp.lt.s32.totalorder %s3843_s28, %s3843_s28 }
  0x49   : > { %p3846_p4 = pnand %p3844_p11, %p3782_p12 }
  0x4a   : > { %3603 = dma.hbm_to_vmem [thread:$0]  (!%p4136_p10), %s5801_s6, 8192, %s500_s30, [#allocation8], %s3983_s25, %s3983_s25, %s3984_s12  }
  0x4b   : > { %p3847_p5 = pneg %p3846_p4  ;;  %p3853_p13 = por %p3852_p9, %p3851_p6 }
  0x4d   : > { %p3854_p0 = pnand %p3853_p13, %p3847_p5 }
  0x4f   : > { %3857 = shalt.err (!%p3854_p0)
}
  0x50   : > { %s5802_s20 = smov 8   ;;  %s5803_s25 = smov 128  }
  0x51   : > { %s5804_s11 = sld [smem:[#allocation45_spill]]  ;;  %s3869_s1 = scalar_lea.vmem %s554_s10, 4096 }
  0x52   : > { %p3870_p1 = scmp.ne.s32.totalorder %s554_s10, %s3869_s1  ;;  %p3877_p11 = scmp.lt.s32.totalorder %s554_s10, %s554_s10 }
  0x53   : > { %p3878_p4 = scmp.lt.s32.totalorder %s3869_s1, %s3869_s1 }
  0x54   : > { %p3872_p2 = pnand %p3870_p1, %p3782_p12 }
  0x55   : > { %p3879_p5 = por %p3878_p4, %p3877_p11 }
  0x56   : > { %p3873_p3 = pneg %p3872_p2 }
  0x57   : > { %3609 = dma.hbm_to_vmem [thread:$0]  (!%p4136_p10), %s5804_s11, 2048, %s535_s21, [#allocation11], %s5803_s25, %s5803_s25, %s5802_s20  }
  0x58   : > { %p3880_p6 = pnand %p3879_p5, %p3873_p3 }
  0x5a   : > { %3883 = shalt.err (!%p3880_p6)
}
  0x5b   : > { %s3987_s28 = smov 256   ;;  %s3988_s24 = smov 16  }
  0x5c   : > { %3612 = dma.hbm_to_vmem [thread:$0]  (!%p4136_p10), %s5767_s13, 4096, %s554_s10, [#allocation14], %s3987_s28, %s3987_s28, %s3988_s24  }
  0x5d   : > { %577 = sbr.rel (%p4128_p8) target bundleno = 2703 (0xa8f), region = 76 }
  0x62   : > { %3947 = dma.done.wait (%p4124_p7), [#allocation8], 8192  }
  0x63   : > { %3949 = vsyncadd (%p4124_p7), [#allocation8], 4294959104 }
  0x64   : > { %3951 = dma.done.wait (%p4124_p7), [#allocation11], 4096  }
  0x65   : > { %3953 = vsyncadd (%p4124_p7), [#allocation11], 4294963200 }
  0x66   : > { %3955 = dma.done.wait (%p4124_p7), [#allocation14], 4096  }
  0x67   : > { %3957 = vsyncadd (%p4124_p7), [#allocation14], 4294963200  ;;  %p654_p8 = scmp.eq.s32.totalorder %s3968_s22, 0 }
  0x69   : > { %659 = sbr.rel (!%p654_p8) target bundleno = 1859 (0x743), region = 96 }
  0x6e   : > { %v813_v0 = vld [vmem:[#allocation7 + $0x1e8] sm:$0xff]  ;;  %v815_v1 = vld [vmem:[#allocation7 + $0x1f8] sm:$0xff]  ;;  %v812_v2 = vld [vmem:[#allocation7 + $0x1e0] sm:$0xff]  ;;  %s5805_s26 = sld [smem:[#allocation41_spill]]  ;;  %vm681_vm0 = vcmask 1040384   ;;  %vm683_vm1 = vcmask 1041408  }
  0x6f   : > { %816 = vmatprep.subr.mxu0 %v813_v0  ;;  %887 = vmatprep.subr.mxu1 %v815_v1  ;;  %v814_v3 = vld [vmem:[#allocation7 + $0x1f0] sm:$0xff]  ;;  %v809_v4 = vld [vmem:[#allocation7 + $0x1c8] sm:$0xff]  ;;  %v811_v5 = vld [vmem:[#allocation7 + $0x1d8] sm:$0xff]  ;;  %s4269_s3 = sld [smem:[#allocation6 + $0x1]]  ;;  %vm685_vm2 = vcmask 1042432   ;;  %vm3990_vm3 = vmmov 0  }
  0x70   : > { %817 = vmatpush1.msra.mxu0 %v812_v2  ;;  %888 = vmatpush1.msra.mxu1 %v814_v3  ;;  %v808_v6 = vld [vmem:[#allocation7 + $0x1c0] sm:$0xff]  ;;  %v810_v7 = vld [vmem:[#allocation7 + $0x1d0] sm:$0xff]  ;;  %v805_v8 = vld [vmem:[#allocation7 + $0x1a8] sm:$0xff]  ;;  %v5778_v2 = vmov 0.0   ;;  %s4289_s10 = sld [smem:[#allocation6 + $0x2]]  ;;  %vm1982_vm4 = vcmask 130112  }
  0x71   : > { %818 = vmatprep.subr.mxu0 %v809_v4  ;;  %889 = vmatprep.subr.mxu1 %v811_v5  ;;  %v807_v9 = vld [vmem:[#allocation7 + $0x1b8] sm:$0xff]  ;;  %v804_v10 = vld [vmem:[#allocation7 + $0x1a0] sm:$0xff]  ;;  %v806_v11 = vld [vmem:[#allocation7 + $0x1b0] sm:$0xff]  ;;  %s4297_s25 = sld [smem:[#allocation6]]  ;;  %vm1989_vm5 = vcmask 195712   ;;  %vm1996_vm6 = vcmask 261312  }
  0x72   : > { %819 = vmatpush1.msra.mxu0 %v808_v6  ;;  %890 = vmatpush1.msra.mxu1 %v810_v7  ;;  %v801_v12 = vld [vmem:[#allocation7 + $0x188] sm:$0xff]  ;;  %v803_v13 = vld [vmem:[#allocation7 + $0x198] sm:$0xff]  ;;  %v800_v14 = vld [vmem:[#allocation7 + $0x180] sm:$0xff]  ;;  %s4311_s27 = sld [smem:[#allocation6 + $0x3]]  ;;  %vm2003_vm7 = vcmask 326912   ;;  %vm2010_vm8 = vcmask 392512  }
  0x73   : > { %820 = vmatprep.subr.mxu0 %v805_v8  ;;  %891 = vmatprep.subr.mxu1 %v807_v9  ;;  %v802_v15 = vld [vmem:[#allocation7 + $0x190] sm:$0xff]  ;;  %v797_v16 = vld [vmem:[#allocation7 + $0x168] sm:$0xff]  ;;  %v799_v17 = vld [vmem:[#allocation7 + $0x178] sm:$0xff]  ;;  %s5806_s6 = sld [smem:[#allocation40_spill]]  ;;  %vm2017_vm9 = vcmask 458112   ;;  %vm2024_vm10 = vcmask 523712  }
  0x74   : > { %821 = vmatpush1.msra.mxu0 %v804_v10  ;;  %892 = vmatpush1.msra.mxu1 %v806_v11  ;;  %v796_v18 = vld [vmem:[#allocation7 + $0x160] sm:$0xff]  ;;  %v798_v19 = vld [vmem:[#allocation7 + $0x170] sm:$0xff]  ;;  %v793_v20 = vld [vmem:[#allocation7 + $0x148] sm:$0xff]  ;;  %s5811_s24 = sld [smem:[#allocation42_spill]]  ;;  %vm2031_vm11 = vcmask 589312   ;;  %vm2038_vm12 = vcmask 654912  }
  0x75   : > { %822 = vmatprep.subr.mxu0 %v801_v12  ;;  %893 = vmatprep.subr.mxu1 %v803_v13  ;;  %v795_v21 = vld [vmem:[#allocation7 + $0x158] sm:$0xff]  ;;  %v792_v22 = vld [vmem:[#allocation7 + $0x140] sm:$0xff]  ;;  %v794_v23 = vld [vmem:[#allocation7 + $0x150] sm:$0xff]  ;;  %vm2045_vm13 = vcmask 720512   ;;  %vm2052_vm14 = vcmask 786112   ;;  %vm2059_vm15 = vcmask 851712  }
  0x76   : > { %823 = vmatpush1.msra.mxu0 %v800_v14  ;;  %894 = vmatpush1.msra.mxu1 %v802_v15  ;;  %v789_v24 = vld [vmem:[#allocation7 + $0x128] sm:$0xff]  ;;  %v791_v25 = vld [vmem:[#allocation7 + $0x138] sm:$0xff]  ;;  %v788_v26 = vld [vmem:[#allocation7 + $0x120] sm:$0xff] }
  0x77   : > { %824 = vmatprep.subr.mxu0 %v797_v16  ;;  %895 = vmatprep.subr.mxu1 %v799_v17  ;;  %v790_v27 = vld [vmem:[#allocation7 + $0x130] sm:$0xff]  ;;  %v785_v28 = vld [vmem:[#allocation7 + $0x108] sm:$0xff]  ;;  %v787_v29 = vld [vmem:[#allocation7 + $0x118] sm:$0xff] }
  0x78   : > { %825 = vmatpush1.msra.mxu0 %v796_v18  ;;  %896 = vmatpush1.msra.mxu1 %v798_v19  ;;  %v784_v30 = vld [vmem:[#allocation7 + $0x100] sm:$0xff]  ;;  %v786_v31 = vld [vmem:[#allocation7 + $0x110] sm:$0xff]  ;;  %v781_v32 = vld [vmem:[#allocation7 + $0xe8] sm:$0xff] }
  0x79   : > { %826 = vmatprep.subr.mxu0 %v793_v20  ;;  %897 = vmatprep.subr.mxu1 %v795_v21  ;;  %v783_v33 = vld [vmem:[#allocation7 + $0xf8] sm:$0xff]  ;;  %v780_v34 = vld [vmem:[#allocation7 + $0xe0] sm:$0xff]  ;;  %v782_v35 = vld [vmem:[#allocation7 + $0xf0] sm:$0xff]  ;;  %s664_s21 = scalar_lea.vmem %s5806_s6, %s4269_s3  ;;  %s667_s12 = scalar_lea.vmem %s5806_s6, %s4289_s10 }
  0x7a   : > { %827 = vmatpush1.msra.mxu0 %v792_v22  ;;  %898 = vmatpush1.msra.mxu1 %v794_v23  ;;  %v777_v36 = vld [vmem:[#allocation7 + $0xc8] sm:$0xff]  ;;  %v779_v37 = vld [vmem:[#allocation7 + $0xd8] sm:$0xff]  ;;  %v776_v38 = vld [vmem:[#allocation7 + $0xc0] sm:$0xff]  ;;  %s670_s3 = scalar_lea.vmem %s5806_s6, %s4311_s27 }
  0x7b   : > { %828 = vmatprep.subr.mxu0 %v789_v24  ;;  %899 = vmatprep.subr.mxu1 %v791_v25  ;;  %v778_v39 = vld [vmem:[#allocation7 + $0xd0] sm:$0xff]  ;;  %v773_v40 = vld [vmem:[#allocation7 + $0xa8] sm:$0xff]  ;;  %v775_v41 = vld [vmem:[#allocation7 + $0xb8] sm:$0xff] }
  0x7c   : > { %829 = vmatpush1.msra.mxu0 %v788_v26  ;;  %900 = vmatpush1.msra.mxu1 %v790_v27  ;;  %v772_v42 = vld [vmem:[#allocation7 + $0xa0] sm:$0xff]  ;;  %v774_v43 = vld [vmem:[#allocation7 + $0xb0] sm:$0xff]  ;;  %v769_v44 = vld [vmem:[#allocation7 + $0x88] sm:$0xff] }
  0x7d   : > { %830 = vmatprep.subr.mxu0 %v785_v28  ;;  %901 = vmatprep.subr.mxu1 %v787_v29  ;;  %v771_v45 = vld [vmem:[#allocation7 + $0x98] sm:$0xff]  ;;  %v768_v46 = vld [vmem:[#allocation7 + $0x80] sm:$0xff]  ;;  %v770_v47 = vld [vmem:[#allocation7 + $0x90] sm:$0xff] }
  0x7e   : > { %831 = vmatpush1.msra.mxu0 %v784_v30  ;;  %902 = vmatpush1.msra.mxu1 %v786_v31  ;;  %v765_v48 = vld [vmem:[#allocation7 + $0x68] sm:$0xff]  ;;  %v767_v49 = vld [vmem:[#allocation7 + $0x78] sm:$0xff]  ;;  %v764_v50 = vld [vmem:[#allocation7 + $0x60] sm:$0xff] }
  0x7f   : > { %832 = vmatprep.subr.mxu0 %v781_v32  ;;  %903 = vmatprep.subr.mxu1 %v783_v33  ;;  %v766_v51 = vld [vmem:[#allocation7 + $0x70] sm:$0xff]  ;;  %v761_v52 = vld [vmem:[#allocation7 + $0x48] sm:$0xff]  ;;  %v763_v53 = vld [vmem:[#allocation7 + $0x58] sm:$0xff] }
  0x80   : > { %833 = vmatpush1.msra.mxu0 %v780_v34  ;;  %904 = vmatpush1.msra.mxu1 %v782_v35  ;;  %v760_v54 = vld [vmem:[#allocation7 + $0x40] sm:$0xff]  ;;  %v762_v55 = vld [vmem:[#allocation7 + $0x50] sm:$0xff]  ;;  %v757_v56 = vld [vmem:[#allocation7 + $0x28] sm:$0xff] }
  0x81   : > { %834 = vmatprep.subr.mxu0 %v777_v36  ;;  %905 = vmatprep.subr.mxu1 %v779_v37  ;;  %v759_v57 = vld [vmem:[#allocation7 + $0x38] sm:$0xff]  ;;  %v756_v58 = vld [vmem:[#allocation7 + $0x20] sm:$0xff]  ;;  %v758_v59 = vld [vmem:[#allocation7 + $0x30] sm:$0xff] }
  0x82   : > { %835 = vmatpush1.msra.mxu0 %v776_v38  ;;  %906 = vmatpush1.msra.mxu1 %v778_v39  ;;  %v753_v60 = vld [vmem:[#allocation7 + $0x8] sm:$0xff]  ;;  %v755_v61 = vld [vmem:[#allocation7 + $0x18] sm:$0xff]  ;;  %v752_v62 = vld [vmem:[#allocation7] sm:$0xff] }
  0x83   : > { %836 = vmatprep.subr.mxu0 %v773_v40  ;;  %907 = vmatprep.subr.mxu1 %v775_v41  ;;  %v754_v63 = vld [vmem:[#allocation7 + $0x10] sm:$0xff]  ;;  %v748_v1 = vld [vmem:[%s5759_s5 + $0x1e8] sm:$0xff]  ;;  %v749_v5 = vld [vmem:[%s5759_s5 + $0x1f0] sm:$0xff] }
  0x84   : > { %837 = vmatpush1.msra.mxu0 %v772_v42  ;;  %908 = vmatpush1.msra.mxu1 %v774_v43  ;;  %v751_v0 = vld [vmem:[%s5805_s26] sm:$0xf]  ;;  %v750_v3 = vld [vmem:[%s5759_s5 + $0x1f8] sm:$0xff]  ;;  %v744_v6 = vld [vmem:[%s5759_s5 + $0x1c8] sm:$0xff]  ;;  %s661_s26 = scalar_lea.vmem %s5806_s6, %s4297_s25 }
  0x85   : > { %838 = vmatprep.subr.mxu0 %v769_v44  ;;  %909 = vmatprep.subr.mxu1 %v771_v45  ;;  %v747_v4 = vld [vmem:[%s5759_s5 + $0x1e0] sm:$0xff]  ;;  %v746_v7 = vld [vmem:[%s5759_s5 + $0x1d8] sm:$0xff]  ;;  %v745_v9 = vld [vmem:[%s5759_s5 + $0x1d0] sm:$0xff] }
  0x86   : > { %839 = vmatpush1.msra.mxu0 %v768_v46  ;;  %910 = vmatpush1.msra.mxu1 %v770_v47  ;;  %v743_v8 = vld [vmem:[%s5759_s5 + $0x1c0] sm:$0xff]  ;;  %v740_v10 = vld [vmem:[%s5759_s5 + $0x1a8] sm:$0xff]  ;;  %v742_v11 = vld [vmem:[%s5759_s5 + $0x1b8] sm:$0xff] }
  0x87   : > { %840 = vmatprep.subr.mxu0 %v765_v48  ;;  %911 = vmatprep.subr.mxu1 %v767_v49  ;;  %v739_v12 = vld [vmem:[%s5759_s5 + $0x1a0] sm:$0xff]  ;;  %v741_v13 = vld [vmem:[%s5759_s5 + $0x1b0] sm:$0xff]  ;;  %v736_v14 = vld [vmem:[%s5759_s5 + $0x188] sm:$0xff] }
  0x88   : > { %841 = vmatpush1.msra.mxu0 %v764_v50  ;;  %912 = vmatpush1.msra.mxu1 %v766_v51  ;;  %v738_v15 = vld [vmem:[%s5759_s5 + $0x198] sm:$0xff]  ;;  %v735_v16 = vld [vmem:[%s5759_s5 + $0x180] sm:$0xff]  ;;  %v737_v17 = vld [vmem:[%s5759_s5 + $0x190] sm:$0xff] }
  0x89   : > { %842 = vmatprep.subr.mxu0 %v761_v52  ;;  %913 = vmatprep.subr.mxu1 %v763_v53  ;;  %v732_v18 = vld [vmem:[%s5759_s5 + $0x168] sm:$0xff]  ;;  %v734_v19 = vld [vmem:[%s5759_s5 + $0x178] sm:$0xff]  ;;  %v731_v20 = vld [vmem:[%s5759_s5 + $0x160] sm:$0xff] }
  0x8a   : > { %843 = vmatpush1.msra.mxu0 %v760_v54  ;;  %914 = vmatpush1.msra.mxu1 %v762_v55  ;;  %v733_v21 = vld [vmem:[%s5759_s5 + $0x170] sm:$0xff]  ;;  %v728_v22 = vld [vmem:[%s5759_s5 + $0x148] sm:$0xff]  ;;  %v730_v23 = vld [vmem:[%s5759_s5 + $0x158] sm:$0xff] }
  0x8b   : > { %844 = vmatprep.subr.mxu0 %v757_v56  ;;  %915 = vmatprep.subr.mxu1 %v759_v57  ;;  %v727_v24 = vld [vmem:[%s5759_s5 + $0x140] sm:$0xff]  ;;  %v729_v25 = vld [vmem:[%s5759_s5 + $0x150] sm:$0xff]  ;;  %v724_v26 = vld [vmem:[%s5759_s5 + $0x128] sm:$0xff] }
  0x8c   : > { %845 = vmatpush1.msra.mxu0 %v756_v58  ;;  %916 = vmatpush1.msra.mxu1 %v758_v59  ;;  %v726_v27 = vld [vmem:[%s5759_s5 + $0x138] sm:$0xff]  ;;  %v723_v28 = vld [vmem:[%s5759_s5 + $0x120] sm:$0xff]  ;;  %v725_v29 = vld [vmem:[%s5759_s5 + $0x130] sm:$0xff] }
  0x8d   : > { %846 = vmatprep.subr.mxu0 %v753_v60  ;;  %917 = vmatprep.subr.mxu1 %v755_v61  ;;  %v720_v30 = vld [vmem:[%s5759_s5 + $0x108] sm:$0xff]  ;;  %v722_v31 = vld [vmem:[%s5759_s5 + $0x118] sm:$0xff]  ;;  %v719_v32 = vld [vmem:[%s5759_s5 + $0x100] sm:$0xff] }
  0x8e   : > { %847 = vmatpush1.msra.mxu0 %v752_v62  ;;  %880 = vmatprep.mubr.f32.mxu0 %v5778_v2  ;;  %v721_v33 = vld [vmem:[%s5759_s5 + $0x110] sm:$0xff]  ;;  %v716_v34 = vld [vmem:[%s5759_s5 + $0xe8] sm:$0xff]  ;;  %v718_v35 = vld [vmem:[%s5759_s5 + $0xf8] sm:$0xff] }
  0x8f   : > { %918 = vmatpush1.msra.mxu1 %v754_v63  ;;  %881 = vmatmul.mubr.f32.vlgmr.msra.gmra.mxu0 %v751_v0  ;;  %v715_v36 = vld [vmem:[%s5759_s5 + $0xe0] sm:$0xff]  ;;  %v717_v37 = vld [vmem:[%s5759_s5 + $0xf0] sm:$0xff]  ;;  %v712_v38 = vld [vmem:[%s5759_s5 + $0xc8] sm:$0xff] }
  0x90   : > { %951 = vmatprep.mubr.f32.mxu1 %v5778_v2  ;;  %958 = vmatprep.subr.mxu0 %v748_v1  ;;  %v714_v39 = vld [vmem:[%s5759_s5 + $0xd8] sm:$0xff]  ;;  %v711_v40 = vld [vmem:[%s5759_s5 + $0xc0] sm:$0xff]  ;;  %v713_v41 = vld [vmem:[%s5759_s5 + $0xd0] sm:$0xff] }
  0x91   : > { %1029 = vmatprep.subr.mxu1 %v750_v3  ;;  %952 = vmatmul.mubr.f32.vlgmr.msra.gmra.mxu1 %v751_v0  ;;  %v708_v42 = vld [vmem:[%s5759_s5 + $0xa8] sm:$0xff]  ;;  %v710_v43 = vld [vmem:[%s5759_s5 + $0xb8] sm:$0xff]  ;;  %v665_v44 = vld [vmem:[%s664_s21] sm:$0x1] }
  0x92   : > { %959 = vmatpush1.msra.mxu0 %v747_v4  ;;  %1030 = vmatpush1.msra.mxu1 %v749_v5  ;;  %v707_v45 = vld [vmem:[%s5759_s5 + $0xa0] sm:$0xff]  ;;  %v709_v46 = vld [vmem:[%s5759_s5 + $0xb0] sm:$0xff]  ;;  %v704_v47 = vld [vmem:[%s5759_s5 + $0x88] sm:$0xff]  ;;  %v673_v52 = vrot.slane %v665_v44, 7 }
  0x93   : > { %960 = vmatprep.subr.mxu0 %v744_v6  ;;  %1031 = vmatprep.subr.mxu1 %v746_v7  ;;  %v706_v48 = vld [vmem:[%s5759_s5 + $0x98] sm:$0xff]  ;;  %v703_v49 = vld [vmem:[%s5759_s5 + $0x80] sm:$0xff]  ;;  %v705_v50 = vld [vmem:[%s5759_s5 + $0x90] sm:$0xff] }
  0x94   : > { %961 = vmatpush1.msra.mxu0 %v743_v8  ;;  %1032 = vmatpush1.msra.mxu1 %v745_v9  ;;  %v668_v51 = vld [vmem:[%s667_s12] sm:$0x1]  ;;  %v700_v53 = vld [vmem:[%s5759_s5 + $0x68] sm:$0xff]  ;;  %v702_v54 = vld [vmem:[%s5759_s5 + $0x78] sm:$0xff] }
  0x95   : > { %962 = vmatprep.subr.mxu0 %v740_v10  ;;  %1033 = vmatprep.subr.mxu1 %v742_v11  ;;  %v662_v55 = vld [vmem:[%s661_s26] sm:$0x1]  ;;  %v701_v57 = vld [vmem:[%s5759_s5 + $0x70] sm:$0xff]  ;;  %v696_v58 = vld [vmem:[%s5759_s5 + $0x48] sm:$0xff]  ;;  %v676_v61 = vrot.slane %v668_v51, 6 }
  0x96   : > { %963 = vmatpush1.msra.mxu0 %v739_v12  ;;  %1034 = vmatpush1.msra.mxu1 %v741_v13  ;;  %v699_v56 = vld [vmem:[%s5759_s5 + $0x60] sm:$0xff]  ;;  %v698_v59 = vld [vmem:[%s5759_s5 + $0x58] sm:$0xff]  ;;  %v697_v63 = vld [vmem:[%s5759_s5 + $0x50] sm:$0xff]  ;;  %v682_v0 = vsel %vm681_vm0, %v662_v55, %v673_v52  ;;  %vm2066_vm0 = vcmask 917312  }
  0x97   : > { %964 = vmatprep.subr.mxu0 %v736_v14  ;;  %1035 = vmatprep.subr.mxu1 %v738_v15  ;;  %v671_v60 = vld [vmem:[%s670_s3] sm:$0x1]  ;;  %v692_v1 = vld [vmem:[%s5759_s5 + $0x28] sm:$0xff]  ;;  %v694_v3 = vld [vmem:[%s5759_s5 + $0x38] sm:$0xff]  ;;  %v684_v9 = vsel %vm683_vm1, %v682_v0, %v676_v61  ;;  %vm2073_vm1 = vcmask 982912   ;;  %s5836_s3 = sld [smem:[#allocation46_spill]] }
  0x98   : > { %965 = vmatpush1.msra.mxu0 %v735_v16  ;;  %1036 = vmatpush1.msra.mxu1 %v737_v17  ;;  %v695_v62 = vld [vmem:[%s5759_s5 + $0x40] sm:$0xff]  ;;  %v693_v5 = vld [vmem:[%s5759_s5 + $0x30] sm:$0xff]  ;;  %v679_v6 = vrot.slane %v671_v60, 5  ;;  %v688_v7 = vld [vmem:[%s5759_s5 + $0x8] sm:$0xff] }
  0x99   : > { %966 = vmatprep.subr.mxu0 %v732_v18  ;;  %1037 = vmatprep.subr.mxu1 %v734_v19  ;;  %v691_v4 = vld [vmem:[%s5759_s5 + $0x20] sm:$0xff]  ;;  %v690_v8 = vld [vmem:[%s5759_s5 + $0x18] sm:$0xff]  ;;  %v689_v11 = vld [vmem:[%s5759_s5 + $0x10] sm:$0xff] }
  0x9a   : > { %967 = vmatpush1.msra.mxu0 %v731_v20  ;;  %1038 = vmatpush1.msra.mxu1 %v733_v21  ;;  %v687_v10 = vld [vmem:[%s5759_s5] sm:$0xff]  ;;  %v686_v12 = vsel %vm685_vm2, %v684_v9, %v679_v6  ;;  %v1318_v13 = vld [vmem:[%s5763_s9 + $0x78] sm:$0xff]  ;;  %v1317_v15 = vld [vmem:[%s5763_s9 + $0x70] sm:$0xff]  ;;  %vm2080_vm2 = vcmask 1048512  }
  0x9b   : > { %968 = vmatprep.subr.mxu0 %v728_v22  ;;  %1039 = vmatprep.subr.mxu1 %v730_v23  ;;  %v1232_v14 = vld [vmem:[%s5762_s8 + $0x78] sm:$0xff]  ;;  %v1231_v16 = vld [vmem:[%s5762_s8 + $0x70] sm:$0xff]  ;;  %v1316_v17 = vld [vmem:[%s5763_s9 + $0x68] sm:$0xff] }
  0x9c   : > { %969 = vmatpush1.msra.mxu0 %v727_v24  ;;  %1040 = vmatpush1.msra.mxu1 %v729_v25  ;;  %v1230_v18 = vld [vmem:[%s5762_s8 + $0x68] sm:$0xff]  ;;  %v1315_v19 = vld [vmem:[%s5763_s9 + $0x60] sm:$0xff]  ;;  %v1314_v21 = vld [vmem:[%s5763_s9 + $0x58] sm:$0xff] }
  0x9d   : > { %970 = vmatprep.subr.mxu0 %v724_v26  ;;  %1041 = vmatprep.subr.mxu1 %v726_v27  ;;  %v1229_v20 = vld [vmem:[%s5762_s8 + $0x60] sm:$0xff]  ;;  %v1228_v22 = vld [vmem:[%s5762_s8 + $0x58] sm:$0xff]  ;;  %v1313_v23 = vld [vmem:[%s5763_s9 + $0x50] sm:$0xff] }
  0x9e   : > { %971 = vmatpush1.msra.mxu0 %v723_v28  ;;  %1042 = vmatpush1.msra.mxu1 %v725_v29  ;;  %v1227_v24 = vld [vmem:[%s5762_s8 + $0x50] sm:$0xff]  ;;  %v1312_v25 = vld [vmem:[%s5763_s9 + $0x48] sm:$0xff]  ;;  %v1311_v27 = vld [vmem:[%s5763_s9 + $0x40] sm:$0xff] }
  0x9f   : > { %972 = vmatprep.subr.mxu0 %v720_v30  ;;  %1043 = vmatprep.subr.mxu1 %v722_v31  ;;  %v1226_v26 = vld [vmem:[%s5762_s8 + $0x48] sm:$0xff]  ;;  %v1225_v28 = vld [vmem:[%s5762_s8 + $0x40] sm:$0xff]  ;;  %v1310_v29 = vld [vmem:[%s5763_s9 + $0x38] sm:$0xff] }
  0xa0   : > { %973 = vmatpush1.msra.mxu0 %v719_v32  ;;  %1044 = vmatpush1.msra.mxu1 %v721_v33  ;;  %v1224_v30 = vld [vmem:[%s5762_s8 + $0x38] sm:$0xff]  ;;  %v1309_v31 = vld [vmem:[%s5763_s9 + $0x30] sm:$0xff]  ;;  %v1308_v33 = vld [vmem:[%s5763_s9 + $0x28] sm:$0xff] }
  0xa1   : > { %974 = vmatprep.subr.mxu0 %v716_v34  ;;  %1045 = vmatprep.subr.mxu1 %v718_v35  ;;  %v1223_v32 = vld [vmem:[%s5762_s8 + $0x30] sm:$0xff]  ;;  %v1222_v34 = vld [vmem:[%s5762_s8 + $0x28] sm:$0xff]  ;;  %v1307_v35 = vld [vmem:[%s5763_s9 + $0x20] sm:$0xff] }
  0xa2   : > { %975 = vmatpush1.msra.mxu0 %v715_v36  ;;  %1046 = vmatpush1.msra.mxu1 %v717_v37  ;;  %v1221_v36 = vld [vmem:[%s5762_s8 + $0x20] sm:$0xff]  ;;  %v1306_v37 = vld [vmem:[%s5763_s9 + $0x18] sm:$0xff] }
  0xa3   : > { %976 = vmatprep.subr.mxu0 %v712_v38  ;;  %1047 = vmatprep.subr.mxu1 %v714_v39  ;;  %v1220_v38 = vld [vmem:[%s5762_s8 + $0x18] sm:$0xff]  ;;  %v1305_v39 = vld [vmem:[%s5763_s9 + $0x10] sm:$0xff]  ;;  %v1217_v44 = vld [vmem:[%s5762_s8] sm:$0xff] }
  0xa4   : > { %977 = vmatpush1.msra.mxu0 %v711_v40  ;;  %1048 = vmatpush1.msra.mxu1 %v713_v41  ;;  %v1219_v40 = vld [vmem:[%s5762_s8 + $0x10] sm:$0xff]  ;;  %v1304_v41 = vld [vmem:[%s5763_s9 + $0x8] sm:$0xff] }
  0xa5   : > { %978 = vmatprep.subr.mxu0 %v708_v42  ;;  %1049 = vmatprep.subr.mxu1 %v710_v43  ;;  %v1218_v42 = vld [vmem:[%s5762_s8 + $0x8] sm:$0xff]  ;;  %v1303_v43 = vld [vmem:[%s5763_s9] sm:$0xff] }
  0xa6   : > { %979 = vmatpush1.msra.mxu0 %v707_v45  ;;  %1050 = vmatpush1.msra.mxu1 %v709_v46  ;;  %v3991_v45 = vmov 0   ;;  %v1102_v46 = vlaneseq }
  0xa7   : > { %980 = vmatprep.subr.mxu0 %v704_v47  ;;  %1051 = vmatprep.subr.mxu1 %v706_v48 }
  0xa8   : > { %981 = vmatpush1.msra.mxu0 %v703_v49  ;;  %1052 = vmatpush1.msra.mxu1 %v705_v50  ;;  %v4562_v47 = vshrl.u32 %v1102_v46, 7  ;;  %v1100_v50 = vld [vmem:[%s5761_s7] sm:$0xf] }
  0xa9   : > { %982 = vmatprep.subr.mxu0 %v700_v53  ;;  %1053 = vmatprep.subr.mxu1 %v702_v54 }
  0xaa   : > { %983 = vmatpush1.msra.mxu0 %v699_v56  ;;  %1054 = vmatpush1.msra.mxu1 %v701_v57  ;;  %v4565_v49 = vsub.s32 0, %v4562_v47  ;;  %v4571_v52 = vsub.s32 1, %v4562_v47 }
  0xab   : > { %984 = vmatprep.subr.mxu0 %v696_v58  ;;  %1055 = vmatprep.subr.mxu1 %v698_v59 }
  0xac   : > { %985 = vmatpush1.msra.mxu0 %v695_v62  ;;  %1056 = vmatpush1.msra.mxu1 %v697_v63  ;;  %5807 = vst [vmem:[#allocation25_spill] sm:$0xff] %v4565_v49  ;;  %5808 = vst [vmem:[#allocation26_spill] sm:$0xff] %v4571_v52  ;;  %v1105_v54 = vrot.slane %v1100_v50, %v4565_v49  ;;  %v1109_v58 = vrot.slane %v1100_v50, %v4571_v52 }
  0xad   : > { %986 = vmatprep.subr.mxu0 %v692_v1  ;;  %1057 = vmatprep.subr.mxu1 %v694_v3  ;;  %v4576_v1 = vsub.s32 3, %v4562_v47 }
  0xae   : > { %987 = vmatpush1.msra.mxu0 %v691_v4  ;;  %1058 = vmatpush1.msra.mxu1 %v693_v5 }
  0xaf   : > { %988 = vmatprep.subr.mxu0 %v688_v7  ;;  %1059 = vmatprep.subr.mxu1 %v690_v8  ;;  %5809 = vst [vmem:[#allocation27_spill] sm:$0xff] %v4576_v1  ;;  %v1117_v6 = vrot.slane %v1100_v50, %v4576_v1  ;;  %v4580_v7 = vsub.s32 2, %v4562_v47 }
  0xb0   : > { %989 = vmatpush1.msra.mxu0 %v687_v10  ;;  %1022 = vmatprep.mubr.f32.mxu0 %v5778_v2 }
  0xb1   : > { %1060 = vmatpush1.msra.mxu1 %v689_v11  ;;  %1093 = vmatprep.mubr.f32.mxu1 %v5778_v2  ;;  %5810 = vst [vmem:[#allocation28_spill] sm:$0xff] %v4580_v7  ;;  %v1113_v10 = vrot.slane %v1100_v50, %v4580_v7 }
  0xb2   : > { %1023 = vmatmul.mubr.f32.vlgmr.msra.gmra.mxu0 %v686_v12  ;;  %1094 = vmatmul.mubr.f32.vlgmr.msra.gmra.mxu1 %v686_v12 }
  0xb3   : > { %3471 = vmatprep.subr.mxu1 %v5778_v2  ;;  %3436 = vmatprep.subr.mxu0 %v5778_v2 }
  0xb4   : > { %3472 = vmatpush3.msra.mxu1 %v1318_v13  ;;  %3437 = vmatpush3.msra.mxu0 %v1232_v14 }
  0xb5   : > { %3473 = vmatprep.subr.mxu1 %v5778_v2  ;;  %3438 = vmatprep.subr.mxu0 %v5778_v2 }
  0xb6   : > { %3474 = vmatpush3.msra.mxu1 %v1317_v15  ;;  %3439 = vmatpush3.msra.mxu0 %v1231_v16 }
  0xb7   : > { %3475 = vmatprep.subr.mxu1 %v5778_v2  ;;  %3440 = vmatprep.subr.mxu0 %v5778_v2 }
  0xb8   : > { %3476 = vmatpush3.msra.mxu1 %v1316_v17  ;;  %3441 = vmatpush3.msra.mxu0 %v1230_v18 }
  0xb9   : > { %3477 = vmatprep.subr.mxu1 %v5778_v2  ;;  %3442 = vmatprep.subr.mxu0 %v5778_v2 }
  0xba   : > { %3478 = vmatpush3.msra.mxu1 %v1315_v19  ;;  %3443 = vmatpush3.msra.mxu0 %v1229_v20  ;;  %v1145_v19 = vld [vmem:[%s5811_s24] sm:$0xf] }
  0xbb   : > { %3479 = vmatprep.subr.mxu1 %v5778_v2  ;;  %3444 = vmatprep.subr.mxu0 %v5778_v2 }
  0xbc   : > { %3480 = vmatpush3.msra.mxu1 %v1314_v21  ;;  %3445 = vmatpush3.msra.mxu0 %v1228_v22 }
  0xbd   : > { %3481 = vmatprep.subr.mxu1 %v5778_v2  ;;  %3446 = vmatprep.subr.mxu0 %v5778_v2 }
  0xbe   : > { %3482 = vmatpush3.msra.mxu1 %v1313_v23  ;;  %3447 = vmatpush3.msra.mxu0 %v1227_v24 }
  0xbf   : > { %3483 = vmatprep.subr.mxu1 %v5778_v2  ;;  %3448 = vmatprep.subr.mxu0 %v5778_v2 }
  0xc0   : > { %3484 = vmatpush3.msra.mxu1 %v1312_v25  ;;  %3449 = vmatpush3.msra.mxu0 %v1226_v26 }
  0xc1   : > { %3485 = vmatprep.subr.mxu1 %v5778_v2  ;;  %3450 = vmatprep.subr.mxu0 %v5778_v2 }
  0xc2   : > { %3486 = vmatpush3.msra.mxu1 %v1311_v27  ;;  %3451 = vmatpush3.msra.mxu0 %v1225_v28 }
  0xc3   : > { %3487 = vmatprep.subr.mxu1 %v5778_v2  ;;  %3452 = vmatprep.subr.mxu0 %v5778_v2 }
  0xc4   : > { %3488 = vmatpush3.msra.mxu1 %v1310_v29  ;;  %3453 = vmatpush3.msra.mxu0 %v1224_v30  ;;  %v2803_v29 = vld [vmem:[#allocation10 + $0x78] sm:$0xff]  ;;  %v2802_v30 = vld [vmem:[#allocation10 + $0x70] sm:$0xff] }
  0xc5   : > { %3489 = vmatprep.subr.mxu1 %v5778_v2  ;;  %3454 = vmatprep.subr.mxu0 %v5778_v2 }
  0xc6   : > { %3490 = vmatpush3.msra.mxu1 %v1309_v31  ;;  %3455 = vmatpush3.msra.mxu0 %v1223_v32  ;;  %v2801_v31 = vld [vmem:[#allocation10 + $0x68] sm:$0xff]  ;;  %v2800_v32 = vld [vmem:[#allocation10 + $0x60] sm:$0xff] }
  0xc7   : > { %3491 = vmatprep.subr.mxu1 %v5778_v2  ;;  %3456 = vmatprep.subr.mxu0 %v5778_v2 }
  0xc8   : > { %3492 = vmatpush3.msra.mxu1 %v1308_v33  ;;  %3457 = vmatpush3.msra.mxu0 %v1222_v34  ;;  %v2799_v33 = vld [vmem:[#allocation10 + $0x58] sm:$0xff]  ;;  %v2798_v34 = vld [vmem:[#allocation10 + $0x50] sm:$0xff] }
  0xc9   : > { %3493 = vmatprep.subr.mxu1 %v5778_v2  ;;  %3458 = vmatprep.subr.mxu0 %v5778_v2 }
  0xca   : > { %3494 = vmatpush3.msra.mxu1 %v1307_v35  ;;  %3459 = vmatpush3.msra.mxu0 %v1221_v36  ;;  %v2797_v35 = vld [vmem:[#allocation10 + $0x48] sm:$0xff]  ;;  %v2796_v36 = vld [vmem:[#allocation10 + $0x40] sm:$0xff] }
  0xcb   : > { %3495 = vmatprep.subr.mxu1 %v5778_v2  ;;  %3460 = vmatprep.subr.mxu0 %v5778_v2 }
  0xcc   : > { %3496 = vmatpush3.msra.mxu1 %v1306_v37  ;;  %3461 = vmatpush3.msra.mxu0 %v1220_v38  ;;  %v2795_v37 = vld [vmem:[#allocation10 + $0x38] sm:$0xff]  ;;  %v2794_v38 = vld [vmem:[#allocation10 + $0x30] sm:$0xff] }
  0xcd   : > { %3497 = vmatprep.subr.mxu1 %v5778_v2  ;;  %3462 = vmatprep.subr.mxu0 %v5778_v2 }
  0xce   : > { %3498 = vmatpush3.msra.mxu1 %v1305_v39  ;;  %3463 = vmatpush3.msra.mxu0 %v1219_v40  ;;  %v2793_v39 = vld [vmem:[#allocation10 + $0x28] sm:$0xff]  ;;  %v2792_v40 = vld [vmem:[#allocation10 + $0x20] sm:$0xff] }
  0xcf   : > { %3499 = vmatprep.subr.mxu1 %v5778_v2  ;;  %3464 = vmatprep.subr.mxu0 %v5778_v2 }
  0xd0   : > { %3500 = vmatpush3.msra.mxu1 %v1304_v41  ;;  %3465 = vmatpush3.msra.mxu0 %v1218_v42  ;;  %v2791_v41 = vld [vmem:[#allocation10 + $0x18] sm:$0xff]  ;;  %v2790_v42 = vld [vmem:[#allocation10 + $0x10] sm:$0xff] }
  0xd1   : > { %3501 = vmatprep.subr.mxu1 %v5778_v2  ;;  %3466 = vmatprep.subr.mxu0 %v5778_v2 }
  0xd2   : > { %3502 = vmatpush3.msra.mxu1 %v1303_v43  ;;  %3467 = vmatpush3.msra.mxu0 %v1217_v44  ;;  %v2789_v43 = vld [vmem:[#allocation10 + $0x8] sm:$0xff]  ;;  %v2788_v44 = vld [vmem:[#allocation10] sm:$0xff] }
  0xd3   : > { %3468 = vmatprep.mubr.msk.f32.mxu0 %vm3990_vm3, %v5778_v2  ;;  %3503 = vmatprep.mubr.msk.f32.mxu1 %vm3990_vm3, %v5778_v2 }
  0xd4   : > { %3541 = vmatprep.subr.mxu1 %v5778_v2  ;;  %3506 = vmatprep.subr.mxu0 %v5778_v2 }
  0xd5   : > { %3672 = vset.pattern.permute.xlu1 %v3991_v45  ;;  %3673 = vset.pattern.permute.xlu0 %v3991_v45  ;;  %v3992_v45 = vmov 1966171168  }
 0x14f   : > { %v882_v48 = vpop.f32.mrf.mxu0 }
 0x151   : > { %v953_v51 = vpop.f32.mrf.mxu1  ;;  %v884_v53 = vpop.f32.mrf.mxu0 }
 0x153   : > { %v955_v56 = vpop.f32.mrf.mxu1 }
 0x172   : > { %v1024_v55 = vpop.f32.mrf.mxu0  ;;  %v1095_v61 = vpop.f32.mrf.mxu1 }
 0x173   : > { %v1025_v57 = vadd.f32 %v1024_v55, %v882_v48  ;;  %v1096_v9 = vadd.f32 %v1095_v61, %v953_v51  ;;  %v1391_v48 = vunpack.c.l.s4 %v3992_v45  ;;  %v1191_v45 = vld [vmem:[%s5758_s4 + $0x130] sm:$0xff] }
 0x174   : > { %v1026_v59 = vpop.f32.mrf.mxu0  ;;  %v1097_v4 = vpop.f32.mrf.mxu1 }
 0x175   : > { %v1122_v60 = vadd.f32 %v1105_v54, %v1025_v57  ;;  %v1027_v62 = vadd.f32 %v1026_v59, %v884_v53  ;;  %v1098_v5 = vadd.f32 %v1097_v4, %v955_v56  ;;  %v1124_v13 = vadd.f32 %v1113_v10, %v1096_v9  ;;  %v1153_v59 = vld [vmem:[%s5758_s4] sm:$0xff]  ;;  %v1156_v4 = vld [vmem:[%s5758_s4 + $0x18] sm:$0xff]  ;;  %v1162_v9 = vld [vmem:[%s5758_s4 + $0x48] sm:$0xff] }
 0x176   : > { %v1392_v50 = vunpack.c.0.s8 %v1391_v48 }
 0x177   : > { %v3351_v63 = vmul.f32 -1.442695, %v1122_v60  ;;  %v1123_v0 = vadd.f32 %v1109_v58, %v1027_v62  ;;  %v1125_v8 = vadd.f32 %v1117_v6, %v1098_v5  ;;  %v1154_v62 = vld [vmem:[%s5758_s4 + $0x8] sm:$0xff]  ;;  %v1160_v6 = vld [vmem:[%s5758_s4 + $0x38] sm:$0xff] }
 0x178   : > { %v4612_v51 = vsub.s32 %v1392_v50, %v4562_v47 }
 0x179   : > { %3674 = vpow2.f32 %v3351_v63  ;;  %v3352_v3 = vmul.f32 -1.442695, %v1123_v0  ;;  %v3353_v11 = vmul.f32 -1.442695, %v1125_v8  ;;  %v1155_v0 = vld [vmem:[%s5758_s4 + $0x10] sm:$0xff] }
 0x17a   : > { %5812 = vst [vmem:[#allocation29_spill] sm:$0xff] %v4612_v51 }
 0x17b   : > { %3676 = vpow2.f32 %v3352_v3 }
 0x17c   : > { %3678 = vpow2.f32 %v3353_v11 }
 0x186   : > { %v3675_v12 = vpop.eup %3674 }
 0x187   : > { %v1129_v14 = vadd.f32 1.0, %v3675_v12  ;;  %v1163_v12 = vld [vmem:[%s5758_s4 + $0x50] sm:$0xff] }
 0x188   : > { %v3677_v15 = vpop.eup %3676 }
 0x189   : > { %3680 = vrcp.f32 %v1129_v14  ;;  %v1135_v16 = vadd.f32 1.0, %v3677_v15  ;;  %v3679_v17 = vpop.eup %3678 }
 0x18a   : > { %3682 = vtanh.f32 %v1124_v13  ;;  %v1142_v22 = vadd.f32 1.0, %v3679_v17  ;;  %v1157_v17 = vld [vmem:[%s5758_s4 + $0x20] sm:$0xff] }
 0x18b   : > { %3684 = vrcp.f32 %v1135_v16 }
 0x18c   : > { %3686 = vrcp.f32 %v1142_v22 }
 0x196   : > { %v3681_v18 = vpop.eup %3680 }
 0x197   : > { %v3683_v20 = vpop.eup %3682 }
 0x198   : > { %v3685_v21 = vpop.eup %3684  ;;  %v1147_v23 = vmul.f32 %v3683_v20, %v3681_v18  ;;  %v1185_v18 = vld [vmem:[%s5758_s4 + $0x100] sm:$0xff] }
 0x199   : > { %v1146_v24 = vmul.f32 %v3685_v21, %v1145_v19  ;;  %v3687_v26 = vpop.eup %3686 }
 0x19b   : > { %v1148_v25 = vadd.f32 %v1147_v23, %v1146_v24  ;;  %v1158_v23 = vld [vmem:[%s5758_s4 + $0x28] sm:$0xff]  ;;  %v1187_v24 = vld [vmem:[%s5758_s4 + $0x110] sm:$0xff] }
 0x19d   : > { %3688 = vtanh.f32 %v1148_v25  ;;  %1152 = vst [vmem:[%s5771_s17] sm:$0xf] %v1148_v25 }
 0x1aa   : > { %v3689_v27 = vpop.eup %3688 }
 0x1ab   : > { %v1150_v28 = vmul.f32 %v3689_v27, %v3687_v26 }
 0x1ad   : > { %1151 = vst [vmem:[%s5770_s16] sm:$0xf] %v1150_v28  ;;  %3469 = vmatmul.mubr.f32.vlgmr.msra.gmra.mxu0 %v1150_v28  ;;  %3504 = vmatmul.mubr.f32.vlgmr.msra.gmra.mxu1 %v1150_v28 }
 0x1ae   : > { %3542 = vmatpush3.msra.mxu1 %v2803_v29  ;;  %3573 = vmatprep.mubr.msk.f32.mxu1 %vm3990_vm3, %v5778_v2  ;;  %v1173_v29 = vld [vmem:[%s5758_s4 + $0xa0] sm:$0xff] }
 0x1af   : > { %3543 = vmatprep.subr.mxu1 %v5778_v2  ;;  %3538 = vmatprep.mubr.msk.f32.mxu0 %vm3990_vm3, %v5778_v2  ;;  %vm2319_vm3 = vcmask 1041409  }
 0x1b0   : > { %3544 = vmatpush3.msra.mxu1 %v2802_v30 }
 0x1b1   : > { %3545 = vmatprep.subr.mxu1 %v5778_v2 }
 0x1b2   : > { %3546 = vmatpush3.msra.mxu1 %v2801_v31 }
 0x1b3   : > { %3547 = vmatprep.subr.mxu1 %v5778_v2 }
 0x1b4   : > { %3548 = vmatpush3.msra.mxu1 %v2800_v32  ;;  %v1161_v32 = vld [vmem:[%s5758_s4 + $0x40] sm:$0xff] }
 0x1b5   : > { %3549 = vmatprep.subr.mxu1 %v5778_v2 }
 0x1b6   : > { %3550 = vmatpush3.msra.mxu1 %v2799_v33  ;;  %v1174_v33 = vld [vmem:[%s5758_s4 + $0xa8] sm:$0xff] }
 0x1b7   : > { %3551 = vmatprep.subr.mxu1 %v5778_v2 }
 0x1b8   : > { %3552 = vmatpush3.msra.mxu1 %v2798_v34 }
 0x1b9   : > { %3553 = vmatprep.subr.mxu1 %v5778_v2 }
 0x1ba   : > { %3554 = vmatpush3.msra.mxu1 %v2797_v35 }
 0x1bb   : > { %3555 = vmatprep.subr.mxu1 %v5778_v2 }
 0x1bc   : > { %3556 = vmatpush3.msra.mxu1 %v2796_v36  ;;  %v1164_v36 = vld [vmem:[%s5758_s4 + $0x58] sm:$0xff] }
 0x1bd   : > { %3557 = vmatprep.subr.mxu1 %v5778_v2 }
 0x1be   : > { %3558 = vmatpush3.msra.mxu1 %v2795_v37  ;;  %v1175_v37 = vld [vmem:[%s5758_s4 + $0xb0] sm:$0xff] }
 0x1bf   : > { %3559 = vmatprep.subr.mxu1 %v5778_v2 }
 0x1c0   : > { %3560 = vmatpush3.msra.mxu1 %v2794_v38 }
 0x1c1   : > { %3561 = vmatprep.subr.mxu1 %v5778_v2 }
 0x1c2   : > { %3562 = vmatpush3.msra.mxu1 %v2793_v39 }
 0x1c3   : > { %3563 = vmatprep.subr.mxu1 %v5778_v2 }
 0x1c4   : > { %3564 = vmatpush3.msra.mxu1 %v2792_v40  ;;  %v1165_v40 = vld [vmem:[%s5758_s4 + $0x60] sm:$0xff] }
 0x1c5   : > { %3565 = vmatprep.subr.mxu1 %v5778_v2 }
 0x1c6   : > { %3566 = vmatpush3.msra.mxu1 %v2791_v41  ;;  %v1176_v41 = vld [vmem:[%s5758_s4 + $0xb8] sm:$0xff] }
 0x1c7   : > { %3567 = vmatprep.subr.mxu1 %v5778_v2 }
 0x1c8   : > { %3568 = vmatpush3.msra.mxu1 %v2790_v42 }
 0x1c9   : > { %3569 = vmatprep.subr.mxu1 %v5778_v2 }
 0x1ca   : > { %3570 = vmatpush3.msra.mxu1 %v2789_v43 }
 0x1cb   : > { %3571 = vmatprep.subr.mxu1 %v5778_v2 }
 0x1cc   : > { %3572 = vmatpush3.msra.mxu1 %v2788_v44  ;;  %v1166_v44 = vld [vmem:[%s5758_s4 + $0x68] sm:$0xff] }
 0x1cd   : > { %3574 = vmatmul.mubr.f32.vlgmr.msra.gmra.mxu1 %v1150_v28  ;;  %v1159_v28 = vld [vmem:[%s5758_s4 + $0x30] sm:$0xff] }
 0x26d   : > { %v1299_v53 = vpop.f32.mrf.mxu0  ;;  %v1385_v54 = vpop.f32.mrf.mxu1 }
 0x26e   : > { %v1396_v55 = vrot.slane %v1299_v53, %v4612_v51  ;;  %1628 = vperm.xlu1 %3672, %v1385_v54   ;;  %v1167_v53 = vld [vmem:[%s5758_s4 + $0x70] sm:$0xff]  ;;  %v1177_v54 = vld [vmem:[%s5758_s4 + $0xc0] sm:$0xff] }
 0x26f   : > { %v3470_v56 = vpop.f32.mrf.mxu0  ;;  %v3505_v57 = vpop.f32.mrf.mxu1 }
 0x270   : > { %v1404_v58 = vrot.slane %v1396_v55, %v4612_v51  ;;  %v1397_v13 = vcombine.high %v1396_v55, %v1396_v55  ;;  %v1168_v57 = vld [vmem:[%s5758_s4 + $0x78] sm:$0xff] }
 0x272   : > { %v4620_v60 = vrot.slane %v1404_v58, %v4565_v49  ;;  %v1412_v10 = vcombine.high %v1404_v58, %v1404_v58  ;;  %v4659_v20 = vrot.slane %v1397_v13, %v4612_v51  ;;  %v1192_v58 = vld [vmem:[%s5758_s4 + $0x138] sm:$0xff]  ;;  %v1186_v13 = vld [vmem:[%s5758_s4 + $0x108] sm:$0xff] }
 0x274   : > { %v1434_v61 = vmul.f32 %v4620_v60, %v1153_v59  ;;  %v1435_v63 = vmul.f32 %v4620_v60, %v1154_v62  ;;  %v1436_v3 = vmul.f32 %v4620_v60, %v1155_v0  ;;  %v1437_v5 = vmul.f32 %v4620_v60, %v1156_v4  ;;  %v1178_v62 = vld [vmem:[%s5758_s4 + $0xc8] sm:$0xff] }
 0x275   : > { %v1441_v8 = vmul.f32 %v4620_v60, %v1160_v6  ;;  %v1443_v11 = vmul.f32 %v4620_v60, %v1162_v9  ;;  %v4647_v14 = vrot.slane %v1412_v10, %v4565_v49  ;;  %v1444_v15 = vmul.f32 %v4620_v60, %v1163_v12  ;;  %v1170_v4 = vld [vmem:[%s5758_s4 + $0x88] sm:$0xff]  ;;  %v1171_v9 = vld [vmem:[%s5758_s4 + $0x90] sm:$0xff]  ;;  %v1180_v12 = vld [vmem:[%s5758_s4 + $0xd8] sm:$0xff] }
 0x276   : > { %1498 = vadd.xlane.f32.xlu0 %v1434_v61  ;;  %v1438_v21 = vmul.f32 %v4620_v60, %v1157_v17  ;;  %v4671_v25 = vrot.slane %v4659_v20, %v4565_v49  ;;  %v1439_v26 = vmul.f32 %v4620_v60, %v1158_v23  ;;  %v1440_v30 = vmul.f32 %v4620_v60, %v1159_v28  ;;  %v1182_v23 = vld [vmem:[%s5758_s4 + $0xe8] sm:$0xff]  ;;  %v1183_v28 = vld [vmem:[%s5758_s4 + $0xf0] sm:$0xff] }
 0x277   : > { %v1466_v22 = vmul.f32 %v4647_v14, %v1185_v18  ;;  %v1468_v27 = vmul.f32 %v4647_v14, %v1187_v24  ;;  %v1442_v34 = vmul.f32 %v4620_v60, %v1161_v32  ;;  %v1445_v38 = vmul.f32 %v4620_v60, %v1164_v36  ;;  %v1181_v18 = vld [vmem:[%s5758_s4 + $0xe0] sm:$0xff]  ;;  %v1188_v24 = vld [vmem:[%s5758_s4 + $0x118] sm:$0xff] }
 0x278   : > { %v1454_v31 = vmul.f32 %v4671_v25, %v1173_v29  ;;  %v1455_v35 = vmul.f32 %v4671_v25, %v1174_v33  ;;  %v1456_v39 = vmul.f32 %v4671_v25, %v1175_v37  ;;  %v1446_v42 = vmul.f32 %v4620_v60, %v1165_v40  ;;  %v1189_v29 = vld [vmem:[%s5758_s4 + $0x120] sm:$0xff]  ;;  %v1184_v33 = vld [vmem:[%s5758_s4 + $0xf8] sm:$0xff]  ;;  %v1194_v37 = vld [vmem:[%s5758_s4 + $0x148] sm:$0xff] }
 0x279   : > { %v1457_v43 = vmul.f32 %v4671_v25, %v1176_v41  ;;  %v1447_v48 = vmul.f32 %v4620_v60, %v1166_v44  ;;  %v1472_v50 = vmul.f32 %v4647_v14, %v1191_v45  ;;  %v1448_v55 = vmul.f32 %v4620_v60, %v1167_v53  ;;  %v1203_v41 = vld [vmem:[%s5758_s4 + $0x190] sm:$0xff]  ;;  %v1196_v44 = vld [vmem:[%s5758_s4 + $0x158] sm:$0xff]  ;;  %v1197_v53 = vld [vmem:[%s5758_s4 + $0x160] sm:$0xff] }
 0x27a   : > { %1500 = vadd.xlane.f32.xlu0 %v1435_v63  ;;  %v1458_v56 = vmul.f32 %v4671_v25, %v1177_v54  ;;  %v1449_v59 = vmul.f32 %v4620_v60, %v1168_v57  ;;  %v1473_v61 = vmul.f32 %v4647_v14, %v1192_v58  ;;  %v1169_v63 = vld [vmem:[%s5758_s4 + $0x80] sm:$0xff]  ;;  %v1459_v0 = vmul.f32 %v4671_v25, %v1178_v62  ;;  %v1204_v45 = vld [vmem:[%s5758_s4 + $0x198] sm:$0xff]  ;;  %v1198_v57 = vld [vmem:[%s5758_s4 + $0x168] sm:$0xff] }
 0x27b   : > { %v1193_v60 = vld [vmem:[%s5758_s4 + $0x140] sm:$0xff]  ;;  %v1451_v6 = vmul.f32 %v4671_v25, %v1170_v4  ;;  %v1467_v17 = vmul.f32 %v4647_v14, %v1186_v13  ;;  %v1470_v32 = vmul.f32 %v4647_v14, %v1189_v29  ;;  %v1465_v36 = vmul.f32 %v4671_v25, %v1184_v33  ;;  %v1206_v58 = vld [vmem:[%s5758_s4 + $0x1a8] sm:$0xff]  ;;  %v1199_v62 = vld [vmem:[%s5758_s4 + $0x170] sm:$0xff] }
 0x27c   : > { %v1205_v54 = vld [vmem:[%s5758_s4 + $0x1a0] sm:$0xff]  ;;  %v1208_v4 = vld [vmem:[%s5758_s4 + $0x1b8] sm:$0xff] }
 0x27e   : > { %1502 = vadd.xlane.f32.xlu0 %v1436_v3  ;;  %v1450_v3 = vmul.f32 %v4671_v25, %v1169_v63  ;;  %v1207_v63 = vld [vmem:[%s5758_s4 + $0x1b0] sm:$0xff] }
 0x282   : > { %1504 = vadd.xlane.f32.xlu0 %v1437_v5  ;;  %v1474_v5 = vmul.f32 %v4647_v14, %v1193_v60  ;;  %v1200_v60 = vld [vmem:[%s5758_s4 + $0x178] sm:$0xff] }
 0x286   : > { %1512 = vadd.xlane.f32.xlu0 %v1441_v8  ;;  %v1179_v8 = vld [vmem:[%s5758_s4 + $0xd0] sm:$0xff] }
 0x287   : > { %v1460_v10 = vmul.f32 %v4671_v25, %v1179_v8  ;;  %v1201_v8 = vld [vmem:[%s5758_s4 + $0x180] sm:$0xff] }
 0x28a   : > { %1516 = vadd.xlane.f32.xlu0 %v1443_v11  ;;  %v1452_v11 = vmul.f32 %v4671_v25, %v1171_v9  ;;  %v1209_v9 = vld [vmem:[%s5758_s4 + $0x1c0] sm:$0xff] }
 0x28d   : > { %v4650_v16 = vpop.f32.mrf.mxu1 }
 0x28e   : > { %5813 = vst [vmem:[#allocation30_spill] sm:$0xff] %v4650_v16  ;;  %1518 = vadd.xlane.f32.xlu0 %v1444_v15  ;;  %v1461_v15 = vmul.f32 %v4671_v25, %v1180_v12  ;;  %v1210_v12 = vld [vmem:[%s5758_s4 + $0x1c8] sm:$0xff] }
 0x28f   : > { %v3575_v19 = vpop.f32.mrf.mxu1 }
 0x290   : > { %v1172_v19 = vld [vmem:[%s5758_s4 + $0x98] sm:$0xff] }
 0x292   : > { %1506 = vadd.xlane.f32.xlu1 %v1438_v21  ;;  %1562 = vadd.xlane.f32.xlu0 %v1466_v22  ;;  %v1462_v21 = vmul.f32 %v4671_v25, %v1181_v18  ;;  %v1453_v22 = vmul.f32 %v4671_v25, %v1172_v19  ;;  %v1212_v19 = vld [vmem:[%s5758_s4 + $0x1d8] sm:$0xff] }
 0x296   : > { %1508 = vadd.xlane.f32.xlu1 %v1439_v26  ;;  %1566 = vadd.xlane.f32.xlu0 %v1468_v27  ;;  %v1463_v26 = vmul.f32 %v4671_v25, %v1182_v23  ;;  %v1469_v27 = vmul.f32 %v4647_v14, %v1188_v24 }
 0x29a   : > { %1510 = vadd.xlane.f32.xlu1 %v1440_v30  ;;  %1538 = vadd.xlane.f32.xlu0 %v1454_v31  ;;  %v1413_v30 = vcombine.high %v4659_v20, %v4659_v20  ;;  %v1464_v31 = vmul.f32 %v4671_v25, %v1183_v28  ;;  %v1195_v25 = vld [vmem:[%s5758_s4 + $0x150] sm:$0xff]  ;;  %v1214_v28 = vld [vmem:[%s5758_s4 + $0x1e8] sm:$0xff] }
 0x29e   : > { %1514 = vadd.xlane.f32.xlu1 %v1442_v34  ;;  %1540 = vadd.xlane.f32.xlu0 %v1455_v35  ;;  %v1190_v34 = vld [vmem:[%s5758_s4 + $0x128] sm:$0xff]  ;;  %v4796_v35 = vrot.slane %v1413_v30, %v4565_v49 }
 0x29f   : > { %v1471_v20 = vmul.f32 %v4647_v14, %v1190_v34 }
 0x2a2   : > { %1520 = vadd.xlane.f32.xlu1 %v1445_v38  ;;  %1542 = vadd.xlane.f32.xlu0 %v1456_v39  ;;  %v1202_v38 = vld [vmem:[%s5758_s4 + $0x188] sm:$0xff]  ;;  %v1475_v39 = vmul.f32 %v4647_v14, %v1194_v37 }
 0x2a3   : > { %v1483_v40 = vmul.f32 %v4796_v35, %v1202_v38 }
 0x2a6   : > { %1522 = vadd.xlane.f32.xlu1 %v1446_v42  ;;  %1544 = vadd.xlane.f32.xlu0 %v1457_v43  ;;  %v1476_v42 = vmul.f32 %v4647_v14, %v1195_v25  ;;  %v1484_v43 = vmul.f32 %v4796_v35, %v1203_v41 }
 0x2aa   : > { %1524 = vadd.xlane.f32.xlu1 %v1447_v48  ;;  %1574 = vadd.xlane.f32.xlu0 %v1472_v50  ;;  %v1477_v48 = vmul.f32 %v4647_v14, %v1196_v44  ;;  %v1485_v50 = vmul.f32 %v4796_v35, %v1204_v45 }
 0x2ae   : > { %1526 = vadd.xlane.f32.xlu1 %v1448_v55  ;;  %1546 = vadd.xlane.f32.xlu0 %v1458_v56  ;;  %v1478_v55 = vmul.f32 %v4647_v14, %v1197_v53  ;;  %v1486_v56 = vmul.f32 %v4796_v35, %v1205_v54 }
 0x2b2   : > { %1528 = vadd.xlane.f32.xlu1 %v1449_v59  ;;  %1576 = vadd.xlane.f32.xlu0 %v1473_v61  ;;  %v1479_v59 = vmul.f32 %v4647_v14, %v1198_v57  ;;  %v1487_v61 = vmul.f32 %v4796_v35, %v1206_v58 }
 0x2b6   : > { %1548 = vadd.xlane.f32.xlu0 %v1459_v0  ;;  %1530 = vadd.xlane.f32.xlu1 %v1450_v3  ;;  %v1480_v0 = vmul.f32 %v4647_v14, %v1199_v62  ;;  %v1488_v3 = vmul.f32 %v4796_v35, %v1207_v63 }
 0x2ba   : > { %1578 = vadd.xlane.f32.xlu0 %v1474_v5  ;;  %1532 = vadd.xlane.f32.xlu1 %v1451_v6  ;;  %v1481_v5 = vmul.f32 %v4647_v14, %v1200_v60  ;;  %v1489_v6 = vmul.f32 %v4796_v35, %v1208_v4  ;;  %v1216_v14 = vld [vmem:[%s5758_s4 + $0x1f8] sm:$0xff] }
 0x2bb   : > { %v1497_v13 = vmul.f32 %v4796_v35, %v1216_v14 }
 0x2be   : > { %1550 = vadd.xlane.f32.xlu0 %v1460_v10  ;;  %1534 = vadd.xlane.f32.xlu1 %v1452_v11  ;;  %v1482_v10 = vmul.f32 %v4796_v35, %v1201_v8  ;;  %v1490_v11 = vmul.f32 %v4796_v35, %v1209_v9 }
 0x2c2   : > { %1552 = vadd.xlane.f32.xlu0 %v1461_v15  ;;  %1564 = vadd.xlane.f32.xlu1 %v1467_v17  ;;  %v1491_v15 = vmul.f32 %v4796_v35, %v1210_v12  ;;  %v1211_v17 = vld [vmem:[%s5758_s4 + $0x1d0] sm:$0xff] }
 0x2c3   : > { %v1492_v18 = vmul.f32 %v4796_v35, %v1211_v17 }
 0x2c6   : > { %1554 = vadd.xlane.f32.xlu0 %v1462_v21  ;;  %1536 = vadd.xlane.f32.xlu1 %v1453_v22  ;;  %v1493_v21 = vmul.f32 %v4796_v35, %v1212_v19  ;;  %v1213_v22 = vld [vmem:[%s5758_s4 + $0x1e0] sm:$0xff] }
 0x2ca   : > { %1556 = vadd.xlane.f32.xlu0 %v1463_v26  ;;  %1568 = vadd.xlane.f32.xlu1 %v1469_v27  ;;  %v1494_v26 = vmul.f32 %v4796_v35, %v1213_v22 }
 0x2ce   : > { %1558 = vadd.xlane.f32.xlu0 %v1464_v31  ;;  %1570 = vadd.xlane.f32.xlu1 %v1470_v32  ;;  %v1495_v31 = vmul.f32 %v4796_v35, %v1214_v28  ;;  %v1215_v32 = vld [vmem:[%s5758_s4 + $0x1f0] sm:$0xff] }
 0x2d2   : > { %1560 = vadd.xlane.f32.xlu0 %v1465_v36  ;;  %1572 = vadd.xlane.f32.xlu1 %v1471_v20  ;;  %v1496_v36 = vmul.f32 %v4796_v35, %v1215_v32 }
 0x2d6   : > { %1580 = vadd.xlane.f32.xlu1 %v1475_v39  ;;  %1596 = vadd.xlane.f32.xlu0 %v1483_v40 }
 0x2da   : > { %1582 = vadd.xlane.f32.xlu1 %v1476_v42  ;;  %1598 = vadd.xlane.f32.xlu0 %v1484_v43 }
 0x2de   : > { %1584 = vadd.xlane.f32.xlu1 %v1477_v48  ;;  %1600 = vadd.xlane.f32.xlu0 %v1485_v50 }
 0x2e2   : > { %1586 = vadd.xlane.f32.xlu1 %v1478_v55  ;;  %1602 = vadd.xlane.f32.xlu0 %v1486_v56 }
 0x2e6   : > { %1588 = vadd.xlane.f32.xlu1 %v1479_v59  ;;  %1604 = vadd.xlane.f32.xlu0 %v1487_v61 }
 0x2e9   : > { %v4883_v23 = vpop.permute.xlu1 %1628 }
 0x2ea   : > { %1590 = vadd.xlane.f32.xlu1 %v1480_v0  ;;  %1606 = vadd.xlane.f32.xlu0 %v1488_v3  ;;  %v4888_v27 = vrot.slane %v4883_v23, %v4565_v49  ;;  %v4927_v9 = vrot.slane %v4883_v23, %v4571_v52 }
 0x2ee   : > { %1592 = vadd.xlane.f32.xlu1 %v1481_v5  ;;  %1608 = vadd.xlane.f32.xlu0 %v1489_v6 }
 0x2f2   : > { %1594 = vadd.xlane.f32.xlu1 %v1482_v10  ;;  %1610 = vadd.xlane.f32.xlu0 %v1490_v11 }
 0x2f6   : > { %1624 = vadd.xlane.f32.xlu1 %v1497_v13  ;;  %1612 = vadd.xlane.f32.xlu0 %v1491_v15 }
 0x2fa   : > { %1614 = vadd.xlane.f32.xlu0 %v1492_v18 }
 0x2fe   : > { %1616 = vadd.xlane.f32.xlu0 %v1493_v21 }
 0x2ff   : > { %v1499_v24 = vpop.xlane.xlu0 %1498 }
 0x300   : > { %v1650_v42 = vadd.f32 %v4888_v27, %v1499_v24 }
 0x302   : > { %1618 = vadd.xlane.f32.xlu0 %v1494_v26  ;;  %v4939_v26 = vrot.slane %v4883_v23, %v4580_v7 }
 0x303   : > { %v1501_v29 = vpop.xlane.xlu0 %1500 }
 0x304   : > { %v1651_v30 = vadd.f32 %v4888_v27, %v1501_v29 }
 0x306   : > { %1620 = vadd.xlane.f32.xlu0 %v1495_v31 }
 0x307   : > { %v1503_v33 = vpop.xlane.xlu0 %1502  ;;  %1785 = vperm.xlu1 %3672, %v1651_v30  }
 0x308   : > { %v1652_v34 = vadd.f32 %v4888_v27, %v1503_v33 }
 0x30a   : > { %1622 = vadd.xlane.f32.xlu0 %v1496_v36 }
 0x30b   : > { %v1505_v20 = vpop.xlane.xlu0 %1504  ;;  %1788 = vperm.xlu1 %3672, %v1652_v34  }
 0x30c   : > { %v1653_v37 = vadd.f32 %v4888_v27, %v1505_v20 }
 0x30f   : > { %v1513_v38 = vpop.xlane.xlu0 %1512  ;;  %1791 = vperm.xlu1 %3672, %v1653_v37  }
 0x310   : > { %v1657_v58 = vadd.f32 %v4888_v27, %v1513_v38 }
 0x313   : > { %v1517_v39 = vpop.xlane.xlu0 %1516 }
 0x314   : > { %v1659_v3 = vadd.f32 %v4888_v27, %v1517_v39 }
 0x317   : > { %v1519_v40 = vpop.xlane.xlu0 %1518 }
 0x318   : > { %v1660_v5 = vadd.f32 %v4888_v27, %v1519_v40 }
 0x31b   : > { %v1507_v25 = vpop.xlane.xlu1 %1506  ;;  %v1563_v41 = vpop.xlane.xlu0 %1562 }
 0x31c   : > { %v1654_v45 = vadd.f32 %v4888_v27, %v1507_v25  ;;  %v1682_v31 = vadd.f32 %v4939_v26, %v1563_v41 }
 0x31f   : > { %v1509_v43 = vpop.xlane.xlu1 %1508  ;;  %v4902_v44 = vpop.xlane.xlu0 %1566 }
 0x320   : > { %1782 = vperm.xlu0 %3673, %v1650_v42   ;;  %v1655_v50 = vadd.f32 %v4888_v27, %v1509_v43  ;;  %v1684_v38 = vadd.f32 %v4939_v26, %v4902_v44 }
 0x323   : > { %v1511_v35 = vpop.xlane.xlu1 %1510  ;;  %v4905_v48 = vpop.xlane.xlu0 %1538 }
 0x324   : > { %1794 = vperm.xlu0 %3673, %v1654_v45   ;;  %v1656_v55 = vadd.f32 %v4888_v27, %v1511_v35  ;;  %v1670_v41 = vadd.f32 %v4927_v9, %v4905_v48 }
 0x327   : > { %v1515_v53 = vpop.xlane.xlu1 %1514  ;;  %v4908_v54 = vpop.xlane.xlu0 %1540 }
 0x328   : > { %1797 = vperm.xlu0 %3673, %v1655_v50   ;;  %v1658_v62 = vadd.f32 %v4888_v27, %v1515_v53  ;;  %v1671_v35 = vadd.f32 %v4927_v9, %v4908_v54 }
 0x32b   : > { %v1521_v56 = vpop.xlane.xlu1 %1520  ;;  %v4911_v57 = vpop.xlane.xlu0 %1542 }
 0x32c   : > { %1800 = vperm.xlu0 %3673, %v1656_v55   ;;  %v1661_v10 = vadd.f32 %v4888_v27, %v1521_v56  ;;  %v1672_v55 = vadd.f32 %v4927_v9, %v4911_v57 }
 0x32f   : > { %v1523_v59 = vpop.xlane.xlu1 %1522  ;;  %v4914_v61 = vpop.xlane.xlu0 %1544 }
 0x330   : > { %1803 = vperm.xlu0 %3673, %v1657_v58   ;;  %v1662_v13 = vadd.f32 %v4888_v27, %v1523_v59  ;;  %v1673_v59 = vadd.f32 %v4927_v9, %v4914_v61 }
 0x333   : > { %v1525_v63 = vpop.xlane.xlu1 %1524  ;;  %v4917_v0 = vpop.xlane.xlu0 %1574 }
 0x334   : > { %1806 = vperm.xlu0 %3673, %v1658_v62   ;;  %v1663_v19 = vadd.f32 %v4888_v27, %v1525_v63  ;;  %v1688_v48 = vadd.f32 %v4939_v26, %v4917_v0 }
 0x337   : > { %v1527_v60 = vpop.xlane.xlu1 %1526  ;;  %v4920_v4 = vpop.xlane.xlu0 %1546 }
 0x338   : > { %1809 = vperm.xlu0 %3673, %v1659_v3   ;;  %v1664_v28 = vadd.f32 %v4888_v27, %v1527_v60  ;;  %v1674_v3 = vadd.f32 %v4927_v9, %v4920_v4 }
 0x33b   : > { %v4923_v6 = vpop.xlane.xlu1 %1528  ;;  %v1577_v8 = vpop.xlane.xlu0 %1576 }
 0x33c   : > { %1812 = vperm.xlu0 %3673, %v1660_v5   ;;  %v1689_v54 = vadd.f32 %v4939_v26, %v1577_v8 }
 0x33f   : > { %v4930_v11 = vpop.xlane.xlu0 %1548  ;;  %v1531_v14 = vpop.xlane.xlu1 %1530 }
 0x340   : > { %v1666_v12 = vadd.f32 %v4927_v9, %v1531_v14  ;;  %1815 = vperm.xlu0 %3673, %v1661_v10   ;;  %v1675_v5 = vadd.f32 %v4927_v9, %v4930_v11 }
 0x342   : > { %1830 = vperm.xlu1 %3672, %v1666_v12  }
 0x343   : > { %v1579_v15 = vpop.xlane.xlu0 %1578  ;;  %v1533_v17 = vpop.xlane.xlu1 %1532 }
 0x344   : > { %v1667_v18 = vadd.f32 %v4927_v9, %v1533_v17  ;;  %1818 = vperm.xlu0 %3673, %v1662_v13   ;;  %v1690_v57 = vadd.f32 %v4939_v26, %v1579_v15 }
 0x346   : > { %1833 = vperm.xlu1 %3672, %v1667_v18  }
 0x347   : > { %v1551_v21 = vpop.xlane.xlu0 %1550  ;;  %v1535_v22 = vpop.xlane.xlu1 %1534 }
 0x348   : > { %v1668_v24 = vadd.f32 %v4927_v9, %v1535_v22  ;;  %1821 = vperm.xlu0 %3673, %v1663_v19   ;;  %v1676_v14 = vadd.f32 %v4927_v9, %v1551_v21 }
 0x34a   : > { %1836 = vperm.xlu1 %3672, %v1668_v24  }
 0x34b   : > { %v1553_v29 = vpop.xlane.xlu0 %1552  ;;  %v1565_v30 = vpop.xlane.xlu1 %1564 }
 0x34c   : > { %1824 = vperm.xlu0 %3673, %v1664_v28   ;;  %v1683_v34 = vadd.f32 %v4939_v26, %v1565_v30  ;;  %v1677_v13 = vadd.f32 %v4927_v9, %v1553_v29  ;;  %v1645_v29 = vrot.slane %v4883_v23, %v4576_v1 }
 0x34e   : > { %1878 = vperm.xlu1 %3672, %v1682_v31  }
 0x34f   : > { %v1555_v32 = vpop.xlane.xlu0 %1554  ;;  %v1537_v33 = vpop.xlane.xlu1 %1536 }
 0x350   : > { %v1669_v36 = vadd.f32 %v4927_v9, %v1537_v33  ;;  %v1678_v18 = vadd.f32 %v4927_v9, %v1555_v32 }
 0x352   : > { %1839 = vperm.xlu0 %3673, %v1669_v36   ;;  %1881 = vperm.xlu1 %3672, %v1683_v34   ;;  %v1665_v34 = vadd.f32 %v4888_v27, %v4923_v6 }
 0x353   : > { %v1557_v20 = vpop.xlane.xlu0 %1556  ;;  %v1569_v37 = vpop.xlane.xlu1 %1568 }
 0x354   : > { %v1685_v39 = vadd.f32 %v4939_v26, %v1569_v37  ;;  %v1679_v21 = vadd.f32 %v4927_v9, %v1557_v20 }
 0x356   : > { %1887 = vperm.xlu0 %3673, %v1685_v39   ;;  %1884 = vperm.xlu1 %3672, %v1684_v38  }
 0x357   : > { %v1559_v40 = vpop.xlane.xlu0 %1558  ;;  %v1571_v25 = vpop.xlane.xlu1 %1570 }
 0x358   : > { %v1686_v42 = vadd.f32 %v4939_v26, %v1571_v25  ;;  %v1680_v31 = vadd.f32 %v4927_v9, %v1559_v40 }
 0x35a   : > { %1890 = vperm.xlu0 %3673, %v1686_v42   ;;  %1842 = vperm.xlu1 %3672, %v1670_v41  }
 0x35b   : > { %v1561_v43 = vpop.xlane.xlu0 %1560  ;;  %v1573_v45 = vpop.xlane.xlu1 %1572 }
 0x35c   : > { %v1687_v44 = vadd.f32 %v4939_v26, %v1573_v45  ;;  %v1681_v36 = vadd.f32 %v4927_v9, %v1561_v43 }
 0x35e   : > { %1893 = vperm.xlu0 %3673, %v1687_v44   ;;  %1845 = vperm.xlu1 %3672, %v1671_v35  }
 0x35f   : > { %v1581_v50 = vpop.xlane.xlu1 %1580  ;;  %v1597_v53 = vpop.xlane.xlu0 %1596 }
 0x360   : > { %v1691_v61 = vadd.f32 %v4939_v26, %v1581_v50  ;;  %v1699_v37 = vadd.f32 %v1645_v29, %v1597_v53 }
 0x362   : > { %1896 = vperm.xlu0 %3673, %v1688_v48   ;;  %1848 = vperm.xlu1 %3672, %v1672_v55  }
 0x363   : > { %v1583_v56 = vpop.xlane.xlu1 %1582  ;;  %v1599_v58 = vpop.xlane.xlu0 %1598 }
 0x364   : > { %v1692_v12 = vadd.f32 %v4939_v26, %v1583_v56  ;;  %v1700_v39 = vadd.f32 %v1645_v29, %v1599_v58 }
 0x366   : > { %1899 = vperm.xlu0 %3673, %v1689_v54   ;;  %1851 = vperm.xlu1 %3672, %v1673_v59  }
 0x367   : > { %v1585_v62 = vpop.xlane.xlu1 %1584  ;;  %v1601_v63 = vpop.xlane.xlu0 %1600 }
 0x368   : > { %v1693_v15 = vadd.f32 %v4939_v26, %v1585_v62  ;;  %v1701_v42 = vadd.f32 %v1645_v29, %v1601_v63 }
 0x36a   : > { %1902 = vperm.xlu0 %3673, %v1690_v57   ;;  %1854 = vperm.xlu1 %3672, %v1674_v3  }
 0x36b   : > { %v1587_v0 = vpop.xlane.xlu1 %1586  ;;  %v1603_v60 = vpop.xlane.xlu0 %1602 }
 0x36c   : > { %v1694_v19 = vadd.f32 %v4939_v26, %v1587_v0  ;;  %v1702_v9 = vadd.f32 %v1645_v29, %v1603_v60 }
 0x36e   : > { %1905 = vperm.xlu0 %3673, %v1691_v61   ;;  %1857 = vperm.xlu1 %3672, %v1675_v5  }
 0x36f   : > { %v1589_v8 = vpop.xlane.xlu1 %1588  ;;  %v1605_v10 = vpop.xlane.xlu0 %1604 }
 0x370   : > { %v1695_v24 = vadd.f32 %v4939_v26, %v1589_v8  ;;  %v1703_v43 = vadd.f32 %v1645_v29, %v1605_v10 }
 0x372   : > { %1908 = vperm.xlu0 %3673, %v1692_v12   ;;  %1860 = vperm.xlu1 %3672, %v1676_v14  }
 0x373   : > { %v1591_v4 = vpop.xlane.xlu1 %1590  ;;  %v1607_v17 = vpop.xlane.xlu0 %1606 }
 0x374   : > { %v1696_v38 = vadd.f32 %v4939_v26, %v1591_v4  ;;  %v1704_v35 = vadd.f32 %v1645_v29, %v1607_v17 }
 0x376   : > { %1911 = vperm.xlu0 %3673, %v1693_v15   ;;  %1863 = vperm.xlu1 %3672, %v1677_v13  }
 0x377   : > { %v1593_v11 = vpop.xlane.xlu1 %1592  ;;  %v1609_v22 = vpop.xlane.xlu0 %1608 }
 0x378   : > { %v1697_v40 = vadd.f32 %v4939_v26, %v1593_v11  ;;  %v1705_v50 = vadd.f32 %v1645_v29, %v1609_v22 }
 0x37a   : > { %1914 = vperm.xlu0 %3673, %v1694_v19   ;;  %1866 = vperm.xlu1 %3672, %v1678_v18  }
 0x37b   : > { %v1611_v28 = vpop.xlane.xlu0 %1610  ;;  %v1595_v30 = vpop.xlane.xlu1 %1594 }
 0x37c   : > { %v1698_v33 = vadd.f32 %v1645_v29, %v1595_v30  ;;  %v1706_v53 = vadd.f32 %v1645_v29, %v1611_v28 }
 0x37e   : > { %1917 = vperm.xlu0 %3673, %v1695_v24   ;;  %1869 = vperm.xlu1 %3672, %v1679_v21  }
 0x37f   : > { %v1613_v32 = vpop.xlane.xlu0 %1612  ;;  %v1625_v41 = vpop.xlane.xlu1 %1624 }
 0x380   : > { %v1713_v27 = vadd.f32 %v1645_v29, %v1625_v41  ;;  %v1707_v48 = vadd.f32 %v1645_v29, %v1613_v32 }
 0x382   : > { %1872 = vperm.xlu1 %3672, %v1680_v31   ;;  %1926 = vperm.xlu0 %3673, %v1698_v33  }
 0x383   : > { %v1615_v20 = vpop.xlane.xlu0 %1614  ;;  %v4993_v54 = vpop.permute.xlu1 %1785 }
 0x384   : > { %v1708_v58 = vadd.f32 %v1645_v29, %v1615_v20 }
 0x386   : > { %1875 = vperm.xlu1 %3672, %v1681_v36   ;;  %1827 = vperm.xlu0 %3673, %v1665_v34  }
 0x387   : > { %v1617_v23 = vpop.xlane.xlu0 %1616  ;;  %v4997_v3 = vpop.permute.xlu1 %1788 }
 0x388   : > { %v1709_v62 = vadd.f32 %v1645_v29, %v1617_v23 }
 0x38a   : > { %1929 = vperm.xlu1 %3672, %v1699_v37   ;;  %1920 = vperm.xlu0 %3673, %v1696_v38  }
 0x38b   : > { %v1619_v25 = vpop.xlane.xlu0 %1618  ;;  %v5001_v5 = vpop.permute.xlu1 %1791 }
 0x38c   : > { %v1710_v57 = vadd.f32 %v1645_v29, %v1619_v25 }
 0x38e   : > { %1932 = vperm.xlu1 %3672, %v1700_v39   ;;  %1923 = vperm.xlu0 %3673, %v1697_v40  }
 0x38f   : > { %v1621_v6 = vpop.xlane.xlu0 %1620 }
 0x390   : > { %v1711_v60 = vadd.f32 %v1645_v29, %v1621_v6  ;;  %v5068_v6 = vand.u32 127, %v1102_v46 }
 0x392   : > { %1935 = vperm.xlu1 %3672, %v1701_v42   ;;  %1971 = vperm.xlu0 %3673, %v1713_v27   ;;  %v1991_v46 = vadd.s32 4294967272, %v5068_v6  ;;  %v2012_v16 = vadd.s32 4294967248, %v5068_v6 }
 0x393   : > { %v1623_v45 = vpop.xlane.xlu0 %1622 }
 0x394   : > { %v1712_v61 = vadd.f32 %v1645_v29, %v1623_v45  ;;  %v1977_v45 = vadd.s32 4294967288, %v5068_v6  ;;  %v5101_v1 = vsub.s32 %v1991_v46, %v4562_v47 }
 0x396   : > { %1938 = vperm.xlu1 %3672, %v1702_v9  }
 0x39a   : > { %1941 = vperm.xlu1 %3672, %v1703_v43  }
 0x39b   : > { %v4983_v44 = vpop.permute.xlu0 %1782 }
 0x39e   : > { %1944 = vperm.xlu1 %3672, %v1704_v35   ;;  %v5077_v35 = vsub.s32 %v5068_v6, %v4562_v47 }
 0x39f   : > { %v4985_v26 = vpop.permute.xlu0 %1794 }
 0x3a2   : > { %1947 = vperm.xlu1 %3672, %v1705_v50   ;;  %v1984_v50 = vadd.s32 4294967280, %v5068_v6 }
 0x3a3   : > { %v4987_v55 = vpop.permute.xlu0 %1797 }
 0x3a6   : > { %1950 = vperm.xlu1 %3672, %v1706_v53  }
 0x3a7   : > { %v4989_v56 = vpop.permute.xlu0 %1800 }
 0x3aa   : > { %1953 = vperm.xlu1 %3672, %v1707_v48   ;;  %v5083_v48 = vsub.s32 %v1977_v45, %v4562_v47  ;;  %v2005_v45 = vadd.s32 4294967256, %v5068_v6 }
 0x3ab   : > { %v4991_v59 = vpop.permute.xlu0 %1803 }
 0x3ac   : > { %v1981_v2 = vrot.slane %v4993_v54, %v5083_v48  ;;  %v2026_v54 = vadd.s32 4294967232, %v5068_v6  ;;  %v5116_v46 = vsub.s32 %v2005_v45, %v4562_v47 }
 0x3ae   : > { %1956 = vperm.xlu1 %3672, %v1708_v58  }
 0x3af   : > { %v4995_v63 = vpop.permute.xlu0 %1806 }
 0x3b2   : > { %1959 = vperm.xlu1 %3672, %v1709_v62   ;;  %v1976_v62 = vrot.slane %v4983_v44, %v5077_v35 }
 0x3b3   : > { %v4999_v0 = vpop.permute.xlu0 %1809 }
 0x3b4   : > { %v1983_v44 = vsel %vm1982_vm4, %v1981_v2, %v1976_v62  ;;  %v5121_v62 = vsub.s32 %v2012_v16, %v4562_v47 }
 0x3b6   : > { %1962 = vperm.xlu1 %3672, %v1710_v57   ;;  %v5091_v57 = vsub.s32 %v1984_v50, %v4562_v47  ;;  %v2019_v50 = vadd.s32 4294967240, %v5068_v6 }
 0x3b7   : > { %v5003_v8 = vpop.permute.xlu0 %1812 }
 0x3b8   : > { %v1988_v52 = vrot.slane %v4997_v3, %v5091_v57  ;;  %v1995_v3 = vrot.slane %v5001_v5, %v5101_v1  ;;  %v2009_v5 = vrot.slane %v4987_v55, %v5116_v46  ;;  %v2061_v55 = vadd.s32 4294967192, %v5068_v6 }
 0x3ba   : > { %1965 = vperm.xlu1 %3672, %v1711_v60   ;;  %v1998_v60 = vadd.s32 4294967264, %v5068_v6  ;;  %v1990_v2 = vsel %vm1989_vm5, %v1988_v52, %v1983_v44  ;;  %v2040_v52 = vadd.s32 4294967216, %v5068_v6 }
 0x3bb   : > { %v5009_v12 = vpop.permute.xlu0 %1815  ;;  %v1997_v16 = vsel %vm1996_vm6, %v1995_v3, %v1990_v2 }
 0x3bc   : > { %v5110_v49 = vsub.s32 %v1998_v60, %v4562_v47  ;;  %v5126_v60 = vsub.s32 %v2019_v50, %v4562_v47  ;;  %v2047_v50 = vadd.s32 4294967208, %v5068_v6 }
 0x3bd   : > { %v5005_v10 = vpop.permute.xlu1 %1830 }
 0x3be   : > { %1968 = vperm.xlu1 %3672, %v1712_v61   ;;  %v2002_v45 = vrot.slane %v4985_v26, %v5110_v49  ;;  %v2016_v26 = vrot.slane %v4989_v56, %v5121_v62  ;;  %v2023_v2 = vrot.slane %v4991_v59, %v5126_v60 }
 0x3bf   : > { %v5013_v13 = vpop.permute.xlu0 %1818 }
 0x3c0   : > { %v2004_v3 = vsel %vm2003_vm7, %v2002_v45, %v1997_v16 }
 0x3c1   : > { %v5007_v14 = vpop.permute.xlu1 %1833 }
 0x3c3   : > { %v5019_v11 = vpop.permute.xlu0 %1821 }
 0x3c5   : > { %v5011_v4 = vpop.permute.xlu1 %1836 }
 0x3c7   : > { %v5023_v19 = vpop.permute.xlu0 %1824 }
 0x3c9   : > { %v5015_v15 = vpop.permute.xlu1 %1878 }
 0x3cd   : > { %v5017_v17 = vpop.permute.xlu1 %1881  ;;  %v5027_v21 = vpop.permute.xlu0 %1839 }
 0x3d1   : > { %v5021_v18 = vpop.permute.xlu1 %1884  ;;  %v5033_v30 = vpop.permute.xlu0 %1887 }
 0x3d5   : > { %v5025_v22 = vpop.permute.xlu1 %1842  ;;  %v5037_v31 = vpop.permute.xlu0 %1890 }
 0x3d9   : > { %v5029_v24 = vpop.permute.xlu1 %1845  ;;  %v5043_v34 = vpop.permute.xlu0 %1893 }
 0x3dd   : > { %v5031_v28 = vpop.permute.xlu1 %1848  ;;  %v5047_v20 = vpop.permute.xlu0 %1896 }
 0x3e1   : > { %v5035_v29 = vpop.permute.xlu1 %1851  ;;  %v5053_v23 = vpop.permute.xlu0 %1899 }
 0x3e5   : > { %v5039_v33 = vpop.permute.xlu1 %1854  ;;  %v5057_v40 = vpop.permute.xlu0 %1902 }
 0x3e9   : > { %v5041_v32 = vpop.permute.xlu1 %1857  ;;  %v5063_v42 = vpop.permute.xlu0 %1905 }
 0x3ed   : > { %v5045_v36 = vpop.permute.xlu1 %1860  ;;  %v5070_v9 = vpop.permute.xlu0 %1908 }
 0x3f1   : > { %v5049_v37 = vpop.permute.xlu1 %1863  ;;  %v5085_v58 = vpop.permute.xlu0 %1911 }
 0x3f5   : > { %v5051_v38 = vpop.permute.xlu1 %1866  ;;  %v5105_v7 = vpop.permute.xlu0 %1914 }
 0x3f6   : > { %5814 = vst [vmem:[#allocation31_spill] sm:$0xff] %v5051_v38  ;;  %5818 = vst [vmem:[#allocation35_spill] sm:$0xff] %v5105_v7  ;;  %v5156_v7 = vsub.s32 %v2040_v52, %v4562_v47 }
 0x3f9   : > { %v5055_v39 = vpop.permute.xlu1 %1869  ;;  %v5143_v38 = vpop.permute.xlu0 %1917 }
 0x3fa   : > { %5815 = vst [vmem:[#allocation32_spill] sm:$0xff] %v5055_v39  ;;  %5821 = vst [vmem:[#allocation38_spill] sm:$0xff] %v5143_v38 }
 0x3fd   : > { %v5059_v25 = vpop.permute.xlu1 %1872 }
 0x3fe   : > { %5816 = vst [vmem:[#allocation33_spill] sm:$0xff] %v5059_v25  ;;  %v5131_v25 = vsub.s32 %v2026_v54, %v4562_v47  ;;  %v2054_v54 = vadd.s32 4294967200, %v5068_v6 }
 0x400   : > { %v2030_v38 = vrot.slane %v4995_v63, %v5131_v25  ;;  %v5168_v16 = vsub.s32 %v2054_v54, %v4562_v47  ;;  %v2168_v63 = vrot.slane %v5017_v17, %v5083_v48  ;;  %v2164_v17 = vrot.slane %v5015_v15, %v5077_v35 }
 0x401   : > { %v5061_v41 = vpop.permute.xlu1 %1875  ;;  %v2075_v54 = vadd.s32 4294967176, %v5068_v6  ;;  %v2099_v15 = vrot.slane %v5027_v21, %v5101_v1 }
 0x402   : > { %5817 = vst [vmem:[#allocation34_spill] sm:$0xff] %v5061_v41  ;;  %v2033_v41 = vadd.s32 4294967224, %v5068_v6 }
 0x404   : > { %v5140_v39 = vsub.s32 %v2033_v41, %v4562_v47  ;;  %v2068_v41 = vadd.s32 4294967184, %v5068_v6 }
 0x405   : > { %v5065_v27 = vpop.permute.xlu1 %1929 }
 0x406   : > { %v2037_v59 = vrot.slane %v4999_v0, %v5140_v39  ;;  %v5177_v0 = vsub.s32 %v2068_v41, %v4562_v47  ;;  %v2044_v41 = vrot.slane %v5003_v8, %v5156_v7  ;;  %v2058_v8 = vrot.slane %v5013_v13, %v5168_v16 }
 0x409   : > { %v5072_v43 = vpop.permute.xlu1 %1932 }
 0x40d   : > { %v5080_v53 = vpop.permute.xlu1 %1935 }
 0x411   : > { %v5094_v61 = vpop.permute.xlu1 %1938 }
 0x415   : > { %v5113_v51 = vpop.permute.xlu1 %1941 }
 0x416   : > { %5819 = vst [vmem:[#allocation36_spill] sm:$0xff] %v5113_v51  ;;  %v5164_v51 = vsub.s32 %v2047_v50, %v4562_v47  ;;  %v2173_v50 = vrot.slane %v5021_v18, %v5091_v57 }
 0x418   : > { %v2051_v18 = vrot.slane %v5009_v12, %v5164_v51  ;;  %v2183_v12 = vrot.slane %v5037_v31, %v5110_v49 }
 0x419   : > { %v5134_v44 = vpop.permute.xlu1 %1944 }
 0x41a   : > { %5820 = vst [vmem:[#allocation37_spill] sm:$0xff] %v5134_v44  ;;  %v2011_v44 = vsel %vm2010_vm8, %v2009_v5, %v2004_v3  ;;  %v5174_v5 = vsub.s32 %v2061_v55, %v4562_v47  ;;  %v5181_v3 = vpop.permute.xlu0 %1926 }
 0x41b   : > { %v2018_v45 = vsel %vm2017_vm9, %v2016_v26, %v2011_v44  ;;  %v2089_v26 = vrot.slane %v5007_v14, %v5083_v48  ;;  %v2085_v14 = vrot.slane %v5005_v10, %v5077_v35 }
 0x41c   : > { %v2025_v52 = vsel %vm2024_vm10, %v2023_v2, %v2018_v45  ;;  %v2169_v45 = vsel %vm1982_vm4, %v2168_v63, %v2164_v17  ;;  %v2065_v21 = vrot.slane %v5019_v11, %v5174_v5  ;;  %v2188_v63 = vrot.slane %v5043_v34, %v5116_v46 }
 0x41d   : > { %v5158_v56 = vpop.permute.xlu1 %1947  ;;  %v2032_v44 = vsel %vm2031_vm11, %v2030_v38, %v2025_v52  ;;  %v2094_v38 = vrot.slane %v5011_v4, %v5091_v57  ;;  %v2174_v52 = vsel %vm1989_vm5, %v2173_v50, %v2169_v45  ;;  %v2104_v4 = vrot.slane %v5025_v22, %v5110_v49 }
 0x41e   : > { %v2039_v55 = vsel %vm2038_vm12, %v2037_v59, %v2032_v44  ;;  %v2178_v59 = vrot.slane %v5033_v30, %v5101_v1  ;;  %v2090_v10 = vsel %vm1982_vm4, %v2089_v26, %v2085_v14  ;;  %v2109_v30 = vrot.slane %v5029_v24, %v5116_v46  ;;  %v5227_v26 = vpop.permute.xlu0 %1827 }
 0x41f   : > { %v2046_v50 = vsel %vm2045_vm13, %v2044_v41, %v2039_v55  ;;  %v2095_v31 = vsel %vm1989_vm5, %v2094_v38, %v2090_v10  ;;  %v2193_v22 = vrot.slane %v5047_v20, %v5121_v62  ;;  %v2114_v44 = vrot.slane %v5031_v28, %v5121_v62 }
 0x420   : > { %v2053_v11 = vsel %vm2052_vm14, %v2051_v18, %v2046_v50  ;;  %v2100_v34 = vsel %vm1996_vm6, %v2099_v15, %v2095_v31  ;;  %v2179_v24 = vsel %vm1996_vm6, %v2178_v59, %v2174_v52  ;;  %v2198_v17 = vrot.slane %v5053_v23, %v5126_v60 }
 0x421   : > { %v5189_v2 = vpop.permute.xlu1 %1950  ;;  %v2060_v55 = vsel %vm2059_vm15, %v2058_v8, %v2053_v11  ;;  %v2184_v41 = vsel %vm2003_vm7, %v2183_v12, %v2179_v24  ;;  %v2105_v20 = vsel %vm2003_vm7, %v2104_v4, %v2100_v34  ;;  %v2119_v28 = vrot.slane %v5035_v29, %v5126_v60  ;;  %v5823_v50 = vld [vmem:[#allocation37_spill] sm:$0xff]  ;;  %v5824_v11 = vld [vmem:[#allocation35_spill] sm:$0xff] }
 0x422   : > { %v5240_v38 = vsel %vm2066_vm0, %v2065_v21, %v2060_v55  ;;  %v2189_v18 = vsel %vm2010_vm8, %v2188_v63, %v2184_v41  ;;  %v2110_v14 = vsel %vm2010_vm8, %v2109_v30, %v2105_v20  ;;  %v5245_v15 = vsub.s32 %v2075_v54, %v4562_v47  ;;  %v5825_v24 = vld [vmem:[#allocation31_spill] sm:$0xff]  ;;  %v5826_v20 = vld [vmem:[#allocation38_spill] sm:$0xff] }
 0x423   : > { %v2194_v45 = vsel %vm2017_vm9, %v2193_v22, %v2189_v18  ;;  %v2115_v59 = vsel %vm2017_vm9, %v2114_v44, %v2110_v14  ;;  %v2203_v8 = vrot.slane %v5057_v40, %v5131_v25  ;;  %v2124_v29 = vrot.slane %v5039_v33, %v5131_v25  ;;  %v1921_v33 = vpop.permute.xlu0 %1920  ;;  %v5827_v18 = vld [vmem:[#allocation32_spill] sm:$0xff] }
 0x424   : > { %v2199_v52 = vsel %vm2024_vm10, %v2198_v17, %v2194_v45  ;;  %v2208_v12 = vrot.slane %v5063_v42, %v5140_v39  ;;  %v2129_v47 = vrot.slane %v5041_v32, %v5140_v39  ;;  %v2247_v54 = vrot.slane %v5065_v27, %v5083_v48  ;;  %v5828_v45 = vld [vmem:[#allocation33_spill] sm:$0xff] }
 0x425   : > { %v5219_v13 = vpop.permute.xlu1 %1953  ;;  %v2120_v4 = vsel %vm2024_vm10, %v2119_v28, %v2115_v59  ;;  %v2213_v10 = vrot.slane %v5070_v9, %v5156_v7  ;;  %v2134_v40 = vrot.slane %v5045_v36, %v5156_v7  ;;  %v2252_v21 = vrot.slane %v5072_v43, %v5091_v57 }
 0x426   : > { %v2218_v42 = vrot.slane %v5085_v58, %v5164_v51  ;;  %v2139_v32 = vrot.slane %v5049_v37, %v5164_v51  ;;  %v2243_v27 = vrot.slane %v5181_v3, %v5077_v35  ;;  %v2257_v9 = vrot.slane %v5080_v53, %v5101_v1  ;;  %v5822_v1 = vld [vmem:[#allocation36_spill] sm:$0xff] }
 0x427   : > { %v2072_v36 = vrot.slane %v5023_v19, %v5177_v0  ;;  %v2204_v63 = vsel %vm2031_vm11, %v2203_v8, %v2199_v52  ;;  %v2125_v43 = vsel %vm2031_vm11, %v2124_v29, %v2120_v4  ;;  %v2262_v58 = vrot.slane %v5094_v61, %v5110_v49  ;;  %v1924_v55 = vpop.permute.xlu0 %1923 }
 0x428   : > { %v2209_v37 = vsel %vm2038_vm12, %v2208_v12, %v2204_v63  ;;  %v2130_v57 = vsel %vm2038_vm12, %v2129_v47, %v2125_v43  ;;  %v2248_v35 = vsel %vm1982_vm4, %v2247_v54, %v2243_v27  ;;  %v2267_v53 = vrot.slane %v5822_v1, %v5116_v46 }
 0x429   : > { %v5247_v23 = vpop.permute.xlu1 %1956  ;;  %v2214_v3 = vsel %vm2045_vm13, %v2213_v10, %v2209_v37  ;;  %v2135_v19 = vsel %vm2045_vm13, %v2134_v40, %v2130_v57  ;;  %v2253_v30 = vsel %vm1989_vm5, %v2252_v21, %v2248_v35  ;;  %v2272_v31 = vrot.slane %v5823_v50, %v5121_v62 }
 0x42a   : > { %v2219_v49 = vsel %vm2052_vm14, %v2218_v42, %v2214_v3  ;;  %v2140_v61 = vsel %vm2052_vm14, %v2139_v32, %v2135_v19  ;;  %v2258_v22 = vsel %vm1996_vm6, %v2257_v9, %v2253_v30  ;;  %v2277_v44 = vrot.slane %v5158_v56, %v5126_v60 }
 0x42b   : > { %v2223_v34 = vrot.slane %v5824_v11, %v5168_v16  ;;  %v2144_v17 = vrot.slane %v5825_v24, %v5168_v16  ;;  %v2263_v62 = vsel %vm2003_vm7, %v2262_v58, %v2258_v22  ;;  %v2282_v41 = vrot.slane %v5189_v2, %v5131_v25  ;;  %v5829_v2 = vld [vmem:[#allocation34_spill] sm:$0xff]  ;;  %v1972_v32 = vpop.permute.xlu0 %1971  ;;  %v5831_v11 = vld [vmem:[#allocation25_spill] sm:$0xff] }
 0x42c   : > { %v2228_v28 = vrot.slane %v5826_v20, %v5174_v5  ;;  %v2149_v14 = vrot.slane %v5827_v18, %v5174_v5  ;;  %v2268_v60 = vsel %vm2010_vm8, %v2267_v53, %v2263_v62  ;;  %v2287_v56 = vrot.slane %v5219_v13, %v5140_v39  ;;  %v5833_v18 = vld [vmem:[#allocation28_spill] sm:$0xff] }
 0x42d   : > { %v1960_v48 = vpop.permute.xlu1 %1959  ;;  %v2154_v59 = vrot.slane %v5828_v45, %v5177_v0  ;;  %v2079_v8 = vrot.slane %v5227_v26, %v5245_v15  ;;  %v2273_v29 = vsel %vm2017_vm9, %v2272_v31, %v2268_v60  ;;  %v2292_v25 = vrot.slane %v5247_v23, %v5156_v7  ;;  %v5834_v60 = vld [vmem:[#allocation27_spill] sm:$0xff] }
 0x42e   : > { %v2159_v52 = vrot.slane %v5829_v2, %v5245_v15  ;;  %v2233_v12 = vrot.slane %v1921_v33, %v5177_v0  ;;  %v2278_v47 = vsel %vm2024_vm10, %v2277_v44, %v2273_v29  ;;  %v2297_v39 = vrot.slane %v1960_v48, %v5164_v51  ;;  %v5830_v44 = vld [vmem:[#allocation29_spill] sm:$0xff]  ;;  %v2819_v45 = vld [vmem:[#allocation12 + $0x78] sm:$0xff] }
 0x42f   : > { %v2145_v54 = vsel %vm2059_vm15, %v2144_v17, %v2140_v61  ;;  %v2238_v4 = vrot.slane %v1924_v55, %v5245_v15  ;;  %v2283_v26 = vsel %vm2031_vm11, %v2282_v41, %v2278_v47  ;;  %v2224_v7 = vsel %vm2059_vm15, %v2223_v34, %v2219_v49  ;;  %v5832_v41 = vld [vmem:[#allocation26_spill] sm:$0xff]  ;;  %3507 = vmatpush3.msra.mxu0 %v2819_v45  ;;  %v2817_v29 = vld [vmem:[#allocation12 + $0x68] sm:$0xff] }
 0x430   : > { %v2150_v23 = vsel %vm2066_vm0, %v2149_v14, %v2145_v54  ;;  %v2288_v40 = vsel %vm2038_vm12, %v2287_v56, %v2283_v26  ;;  %v2074_v51 = vsel %vm2073_vm1, %v2072_v36, %v5240_v38  ;;  %v2229_v21 = vsel %vm2066_vm0, %v2228_v28, %v2224_v7  ;;  %v3695_v47 = vld [vmem:[%s5758_s4] sm:$0xff]  ;;  %v3707_v45 = vld [vmem:[%s5758_s4 + $0x190] sm:$0xff] }
 0x431   : > { %v1963_v46 = vpop.permute.xlu1 %1962  ;;  %v2155_v42 = vsel %vm2073_vm1, %v2154_v59, %v2150_v23  ;;  %v2293_v27 = vsel %vm2045_vm13, %v2292_v25, %v2288_v40  ;;  %v2234_v48 = vsel %vm2073_vm1, %v2233_v12, %v2229_v21  ;;  %vm2321_vm4 = vcmask 1042434   ;;  %v3696_v7 = vld [vmem:[%s5758_s4 + $0x80] sm:$0xff]  ;;  %v3697_v40 = vld [vmem:[%s5758_s4 + $0x88] sm:$0xff] }
 0x432   : > { %v2302_v10 = vrot.slane %v1963_v46, %v5168_v16  ;;  %v2081_v16 = vsel %vm2080_vm2, %v2079_v8, %v2074_v51  ;;  %v2160_v9 = vsel %vm2080_vm2, %v2159_v52, %v2155_v42  ;;  %v2298_v63 = vsel %vm2052_vm14, %v2297_v39, %v2293_v27  ;;  %v2818_v8 = vld [vmem:[#allocation12 + $0x70] sm:$0xff]  ;;  %v3694_v52 = vld [vmem:[%s5758_s4 + $0x8] sm:$0xff]  ;;  %v2813_v27 = vld [vmem:[#allocation12 + $0x48] sm:$0xff] }
 0x433   : > { %v2317_v58 = vrot.slane %v1972_v32, %v5245_v15  ;;  %vm2323_vm5 = vcmask 1043459   ;;  %v2320_v57 = vsel %vm2319_vm3, %v2160_v9, %v2081_v16  ;;  %vm1716_vm6 = vcmp.lt.s32.totalorder %v5068_v6, 8  ;;  %v2814_v51 = vld [vmem:[#allocation12 + $0x50] sm:$0xff] }
 0x434   : > { %v2303_v38 = vsel %vm2059_vm15, %v2302_v10, %v2298_v63  ;;  %vm2327_vm7 = vcmask 1043456   ;;  %v5835_v59 = vmov 0.0   ;;  %v3698_v16 = vld [vmem:[%s5758_s4 + $0x100] sm:$0xff]  ;;  %vm2979_vm8 = vcmask 3072  }
 0x435   : > { %v1966_v13 = vpop.permute.xlu1 %1965  ;;  %3508 = vmatprep.subr.mxu0 %v5835_v59  ;;  %2981 = vst.msk [vmem:[#allocation4] sm:$0xf] %vm2979_vm8, %v5835_v59 }
 0x436   : > { %v2307_v33 = vrot.slane %v1966_v13, %v5174_v5  ;;  %v2239_v5 = vsel %vm2080_vm2, %v2238_v4, %v2234_v48  ;;  %3509 = vmatpush3.msra.mxu0 %v2818_v8  ;;  %v2816_v13 = vld [vmem:[#allocation12 + $0x60] sm:$0xff]  ;;  %v2815_v4 = vld [vmem:[#allocation12 + $0x58] sm:$0xff] }
 0x437   : > { %v2322_v53 = vsel %vm2321_vm4, %v2239_v5, %v2320_v57  ;;  %3510 = vmatprep.subr.mxu0 %v5835_v59  ;;  %v3699_v48 = vld [vmem:[%s5758_s4 + $0x108] sm:$0xff] }
 0x438   : > { %v2308_v37 = vsel %vm2066_vm0, %v2307_v33, %v2303_v38  ;;  %3511 = vmatpush3.msra.mxu0 %v2817_v29  ;;  %v2804_v29 = vld [vmem:[#allocation12] sm:$0xff] }
 0x439   : > { %v1969_v43 = vpop.permute.xlu1 %1968  ;;  %3512 = vmatprep.subr.mxu0 %v5835_v59 }
 0x43a   : > { %v2312_v36 = vrot.slane %v1969_v43, %v5177_v0  ;;  %3513 = vmatpush3.msra.mxu0 %v2816_v13  ;;  %v2812_v43 = vld [vmem:[#allocation12 + $0x40] sm:$0xff]  ;;  %v3709_v13 = vld [vmem:[%s5758_s4 + $0x20] sm:$0xff] }
 0x43b   : > { %3514 = vmatprep.subr.mxu0 %v5835_v59 }
 0x43c   : > { %v2313_v35 = vsel %vm2073_vm1, %v2312_v36, %v2308_v37  ;;  %3515 = vmatpush3.msra.mxu0 %v2815_v4  ;;  %v3700_v37 = vld [vmem:[%s5758_s4 + $0x10] sm:$0xff] }
 0x43d   : > { %v2318_v1 = vsel %vm2080_vm2, %v2317_v58, %v2313_v35  ;;  %3516 = vmatprep.subr.mxu0 %v5835_v59  ;;  %v2811_v58 = vld [vmem:[#allocation12 + $0x38] sm:$0xff]  ;;  %v3701_v35 = vld [vmem:[%s5758_s4 + $0x90] sm:$0xff] }
 0x43e   : > { %v2324_v3 = vsel %vm2323_vm5, %v2318_v1, %v2322_v53  ;;  %3517 = vmatpush3.msra.mxu0 %v2814_v51  ;;  %v2810_v53 = vld [vmem:[#allocation12 + $0x30] sm:$0xff] }
 0x43f   : > { %v2326_v0 = vsel %vm1716_vm6, %v2324_v3, -1e+30  ;;  %3518 = vmatprep.subr.mxu0 %v5835_v59 }
 0x440   : > { %v2328_v19 = vsel %vm2327_vm7, %v2326_v0, -inf  ;;  %3519 = vmatpush3.msra.mxu0 %v2813_v27 }
 0x441   : > { %2329 = vmax.xlane.f32.xlu1 %v2328_v19  ;;  %3520 = vmatprep.subr.mxu0 %v5835_v59 }
 0x442   : > { %3521 = vmatpush3.msra.mxu0 %v2812_v43 }
 0x443   : > { %3522 = vmatprep.subr.mxu0 %v5835_v59 }
 0x444   : > { %3523 = vmatpush3.msra.mxu0 %v2811_v58 }
 0x445   : > { %3524 = vmatprep.subr.mxu0 %v5835_v59 }
 0x446   : > { %3525 = vmatpush3.msra.mxu0 %v2810_v53 }
 0x447   : > { %3526 = vmatprep.subr.mxu0 %v5835_v59 }
 0x4ca   : > { %v2330_v15 = vpop.xlane.xlu1 %2329 }
 0x4cb   : > { %v2331_v30 = vsub.f32 %v2326_v0, %v2330_v15 }
 0x4cd   : > { %v2332_v50 = vmul.f32 1.442695, %v2331_v30  ;;  %v2809_v30 = vld [vmem:[#allocation12 + $0x28] sm:$0xff] }
 0x4ce   : > { %3527 = vmatpush3.msra.mxu0 %v2809_v30 }
 0x4cf   : > { %3690 = vpow2.f32 %v2332_v50  ;;  %v3702_v50 = vld [vmem:[%s5758_s4 + $0x180] sm:$0xff]  ;;  %3528 = vmatprep.subr.mxu0 %v5835_v59 }
 0x4dc   : > { %v3691_v31 = vpop.eup %3690 }
 0x4dd   : > { %v2334_v49 = vsel %vm2327_vm7, %v3691_v31, 0.0 }
 0x4de   : > { %2335 = vadd.xlane.f32.xlu0 %v2334_v49  ;;  %v3703_v49 = vld [vmem:[%s5758_s4 + $0x188] sm:$0xff] }
 0x567   : > { %v2336_v61 = vpop.xlane.xlu0 %2335 }
 0x568   : > { %3692 = vrcp.f32 %v2336_v61 }
 0x575   : > { %v3693_v6 = vpop.eup %3692 }
 0x576   : > { %v2338_v22 = vmul.f32 %v3693_v6, %v3691_v31  ;;  %v2808_v6 = vld [vmem:[#allocation12 + $0x20] sm:$0xff] }
 0x577   : > { %3529 = vmatpush3.msra.mxu0 %v2808_v6 }
 0x578   : > { %v2346_v46 = vrot.slane %v2338_v22, %v5830_v44  ;;  %v5354_v34 = vrot.slane %v2338_v22, %v5831_v11  ;;  %v5361_v20 = vrot.slane %v2338_v22, %v5832_v41  ;;  %v5366_v14 = vrot.slane %v2338_v22, %v5833_v18  ;;  %v2807_v11 = vld [vmem:[#allocation12 + $0x18] sm:$0xff]  ;;  %3530 = vmatprep.subr.mxu0 %v5835_v59 }
 0x579   : > { %v5373_v56 = vrot.slane %v2338_v22, %v5834_v60  ;;  %3531 = vmatpush3.msra.mxu0 %v2807_v11  ;;  %v3706_v60 = vld [vmem:[%s5758_s4 + $0x98] sm:$0xff] }
 0x57a   : > { %v2347_v24 = vcombine.high %v2346_v46, %v2346_v46  ;;  %v2354_v17 = vrot.slane %v2346_v46, %v5830_v44  ;;  %3354 = vst.sshfl [vmem:[#allocation15] sm:$0x1 pattern:$0x73625140] %v2346_v46  ;;  %2381 = vbcast.lane.b32.xlu1 %v5354_v34, 264  ;;  %2377 = vbcast.lane.b32.xlu0 %v5354_v34, 256 }
 0x57b   : > { %3532 = vmatprep.subr.mxu0 %v5835_v59 }
 0x57c   : > { %v2361_v55 = vrot.slane %v2347_v24, %v5830_v44  ;;  %v2362_v62 = vcombine.high %v2354_v17, %v2354_v17  ;;  %3355 = vst.sshfl [vmem:[#allocation15 + $0x1] sm:$0x1 pattern:$0x73625140] %v2347_v24  ;;  %v3705_v17 = vld [vmem:[%s5758_s4 + $0x18] sm:$0xff] }
 0x57e   : > { %v2363_v28 = vcombine.high %v2361_v55, %v2361_v55  ;;  %2370 = vst [vmem:[#allocation15 + $0x2] sm:$0x1] %v2362_v62  ;;  %2444 = vbcast.lane.b32.xlu1 %v5361_v20, 256  ;;  %2448 = vbcast.lane.b32.xlu0 %v5361_v20, 264  ;;  %v2806_v62 = vld [vmem:[#allocation12 + $0x10] sm:$0xff] }
 0x57f   : > { %3533 = vmatpush3.msra.mxu0 %v2806_v62 }
 0x580   : > { %2371 = vst [vmem:[#allocation15 + $0x3] sm:$0x1] %v2363_v28  ;;  %3534 = vmatprep.subr.mxu0 %v5835_v59 }
 0x582   : > { %2511 = vbcast.lane.b32.xlu1 %v5366_v14, 256  ;;  %2515 = vbcast.lane.b32.xlu0 %v5366_v14, 264 }
 0x586   : > { %2385 = vbcast.lane.b32.xlu1 %v5354_v34, 272  ;;  %2452 = vbcast.lane.b32.xlu0 %v5361_v20, 272 }
 0x58a   : > { %2578 = vbcast.lane.b32.xlu1 %v5373_v56, 256  ;;  %2582 = vbcast.lane.b32.xlu0 %v5373_v56, 264 }
 0x58e   : > { %2519 = vbcast.lane.b32.xlu1 %v5366_v14, 272  ;;  %2389 = vbcast.lane.b32.xlu0 %v5354_v34, 280 }
 0x592   : > { %2456 = vbcast.lane.b32.xlu1 %v5361_v20, 280  ;;  %2586 = vbcast.lane.b32.xlu0 %v5373_v56, 272 }
 0x596   : > { %2523 = vbcast.lane.b32.xlu1 %v5366_v14, 280  ;;  %2393 = vbcast.lane.b32.xlu0 %v5354_v34, 288 }
 0x59a   : > { %2460 = vbcast.lane.b32.xlu1 %v5361_v20, 288  ;;  %2590 = vbcast.lane.b32.xlu0 %v5373_v56, 280 }
 0x59e   : > { %2527 = vbcast.lane.b32.xlu1 %v5366_v14, 288  ;;  %2397 = vbcast.lane.b32.xlu0 %v5354_v34, 296 }
 0x5a2   : > { %2464 = vbcast.lane.b32.xlu1 %v5361_v20, 296  ;;  %2594 = vbcast.lane.b32.xlu0 %v5373_v56, 288 }
 0x5a6   : > { %2531 = vbcast.lane.b32.xlu1 %v5366_v14, 296  ;;  %2401 = vbcast.lane.b32.xlu0 %v5354_v34, 304 }
 0x5aa   : > { %2468 = vbcast.lane.b32.xlu1 %v5361_v20, 304  ;;  %2598 = vbcast.lane.b32.xlu0 %v5373_v56, 296 }
 0x5ae   : > { %2535 = vbcast.lane.b32.xlu1 %v5366_v14, 304  ;;  %2405 = vbcast.lane.b32.xlu0 %v5354_v34, 312 }
 0x5b2   : > { %2472 = vbcast.lane.b32.xlu1 %v5361_v20, 312  ;;  %2602 = vbcast.lane.b32.xlu0 %v5373_v56, 304 }
 0x5b6   : > { %2539 = vbcast.lane.b32.xlu1 %v5366_v14, 312  ;;  %2409 = vbcast.lane.b32.xlu0 %v5354_v34, 320 }
 0x5ba   : > { %2476 = vbcast.lane.b32.xlu1 %v5361_v20, 320  ;;  %2606 = vbcast.lane.b32.xlu0 %v5373_v56, 312 }
 0x5be   : > { %2543 = vbcast.lane.b32.xlu1 %v5366_v14, 320  ;;  %2413 = vbcast.lane.b32.xlu0 %v5354_v34, 328 }
 0x5c2   : > { %2480 = vbcast.lane.b32.xlu1 %v5361_v20, 328  ;;  %2610 = vbcast.lane.b32.xlu0 %v5373_v56, 320 }
 0x5c6   : > { %2547 = vbcast.lane.b32.xlu1 %v5366_v14, 328  ;;  %2417 = vbcast.lane.b32.xlu0 %v5354_v34, 336 }
 0x5ca   : > { %2484 = vbcast.lane.b32.xlu1 %v5361_v20, 336  ;;  %2614 = vbcast.lane.b32.xlu0 %v5373_v56, 328 }
 0x5ce   : > { %2551 = vbcast.lane.b32.xlu1 %v5366_v14, 336  ;;  %2421 = vbcast.lane.b32.xlu0 %v5354_v34, 344 }
 0x5d2   : > { %2488 = vbcast.lane.b32.xlu1 %v5361_v20, 344  ;;  %2618 = vbcast.lane.b32.xlu0 %v5373_v56, 336 }
 0x5d6   : > { %2555 = vbcast.lane.b32.xlu1 %v5366_v14, 344  ;;  %2425 = vbcast.lane.b32.xlu0 %v5354_v34, 352 }
 0x5da   : > { %2492 = vbcast.lane.b32.xlu1 %v5361_v20, 352  ;;  %2622 = vbcast.lane.b32.xlu0 %v5373_v56, 344 }
 0x5de   : > { %2559 = vbcast.lane.b32.xlu1 %v5366_v14, 352  ;;  %2429 = vbcast.lane.b32.xlu0 %v5354_v34, 360 }
 0x5e2   : > { %2496 = vbcast.lane.b32.xlu1 %v5361_v20, 360  ;;  %2626 = vbcast.lane.b32.xlu0 %v5373_v56, 352 }
 0x5e6   : > { %2563 = vbcast.lane.b32.xlu1 %v5366_v14, 360  ;;  %2433 = vbcast.lane.b32.xlu0 %v5354_v34, 368 }
 0x5ea   : > { %2500 = vbcast.lane.b32.xlu1 %v5361_v20, 368  ;;  %2630 = vbcast.lane.b32.xlu0 %v5373_v56, 360 }
 0x5ec   : > { %v2382_v25 = vpop.permute.xlu1 %2381  ;;  %v2378_v2 = vpop.permute.xlu0 %2377 }
 0x5ed   : > { %v2641_v12 = vmul.f32 %v3694_v52, %v2382_v25  ;;  %v2640_v39 = vmul.f32 %v3695_v47, %v2378_v2  ;;  %v3708_v47 = vld [vmem:[%s5758_s4 + $0x118] sm:$0xff] }
 0x5ee   : > { %2567 = vbcast.lane.b32.xlu1 %v5366_v14, 368  ;;  %2437 = vbcast.lane.b32.xlu0 %v5354_v34, 376  ;;  %v3704_v34 = vld [vmem:[%s5758_s4 + $0x110] sm:$0xff] }
 0x5ef   : > { %v2704_v54 = vadd.f32 %v2641_v12, %v2640_v39 }
 0x5f0   : > { %v2445_v26 = vpop.permute.xlu1 %2444  ;;  %v2449_v10 = vpop.permute.xlu0 %2448 }
 0x5f1   : > { %v2656_v23 = vmul.f32 %v3696_v7, %v2445_v26  ;;  %v2657_v33 = vmul.f32 %v3697_v40, %v2449_v10 }
 0x5f2   : > { %2504 = vbcast.lane.b32.xlu1 %v5361_v20, 376  ;;  %2634 = vbcast.lane.b32.xlu0 %v5373_v56, 368 }
 0x5f3   : > { %v2725_v21 = vadd.f32 %v2657_v33, %v2656_v23  ;;  %v3710_v23 = vld [vmem:[%s5758_s4 + $0xa0] sm:$0xff]  ;;  %v3711_v33 = vld [vmem:[%s5758_s4 + $0x198] sm:$0xff] }
 0x5f4   : > { %v2512_v42 = vpop.permute.xlu1 %2511  ;;  %v2516_v32 = vpop.permute.xlu0 %2515 }
 0x5f5   : > { %v2672_v9 = vmul.f32 %v3698_v16, %v2512_v42  ;;  %v2673_v63 = vmul.f32 %v3699_v48, %v2516_v32  ;;  %v3712_v16 = vld [vmem:[%s5758_s4 + $0x120] sm:$0xff]  ;;  %v3713_v48 = vld [vmem:[%s5758_s4 + $0x28] sm:$0xff] }
 0x5f6   : > { %2571 = vbcast.lane.b32.xlu1 %v5366_v14, 376  ;;  %2638 = vbcast.lane.b32.xlu0 %v5373_v56, 376  ;;  %v2805_v14 = vld [vmem:[#allocation12 + $0x8] sm:$0xff] }
 0x5f7   : > { %v2746_v5 = vadd.f32 %v2673_v63, %v2672_v9  ;;  %3535 = vmatpush3.msra.mxu0 %v2805_v14 }
 0x5f8   : > { %v2386_v38 = vpop.permute.xlu1 %2385  ;;  %v2453_v36 = vpop.permute.xlu0 %2452  ;;  %3536 = vmatprep.subr.mxu0 %v5835_v59 }
 0x5f9   : > { %v2642_v57 = vmul.f32 %v3700_v37, %v2386_v38  ;;  %v2658_v1 = vmul.f32 %v3701_v35, %v2453_v36  ;;  %3537 = vmatpush3.msra.mxu0 %v2804_v29  ;;  %v3717_v29 = vld [vmem:[%s5758_s4 + $0x1a0] sm:$0xff] }
 0x5fb   : > { %v2705_v3 = vadd.f32 %v2704_v54, %v2642_v57  ;;  %v2726_v0 = vadd.f32 %v2725_v21, %v2658_v1 }
 0x5fc   : > { %v2579_v19 = vpop.permute.xlu1 %2578  ;;  %v2583_v15 = vpop.permute.xlu0 %2582 }
 0x5fd   : > { %v2688_v31 = vmul.f32 %v3702_v50, %v2579_v19  ;;  %v2689_v61 = vmul.f32 %v3703_v49, %v2583_v15 }
 0x5ff   : > { %v2767_v22 = vadd.f32 %v2689_v61, %v2688_v31 }
 0x600   : > { %v2520_v44 = vpop.permute.xlu1 %2519  ;;  %v2390_v46 = vpop.permute.xlu0 %2389 }
 0x601   : > { %v2674_v24 = vmul.f32 %v3704_v34, %v2520_v44  ;;  %v2643_v55 = vmul.f32 %v3705_v17, %v2390_v46 }
 0x603   : > { %v2747_v41 = vadd.f32 %v2746_v5, %v2674_v24  ;;  %v2706_v20 = vadd.f32 %v2705_v3, %v2643_v55 }
 0x604   : > { %v2457_v28 = vpop.permute.xlu1 %2456  ;;  %v2587_v18 = vpop.permute.xlu0 %2586 }
 0x605   : > { %v2659_v56 = vmul.f32 %v3706_v60, %v2457_v28  ;;  %v2690_v8 = vmul.f32 %v3707_v45, %v2587_v18  ;;  %v3714_v18 = vld [vmem:[%s5758_s4 + $0x30] sm:$0xff]  ;;  %v3715_v60 = vld [vmem:[%s5758_s4 + $0xa8] sm:$0xff]  ;;  %v3716_v45 = vld [vmem:[%s5758_s4 + $0x38] sm:$0xff] }
 0x607   : > { %v2727_v25 = vadd.f32 %v2726_v0, %v2659_v56  ;;  %v2768_v2 = vadd.f32 %v2767_v22, %v2690_v8 }
 0x608   : > { %v2524_v52 = vpop.permute.xlu1 %2523  ;;  %v2394_v12 = vpop.permute.xlu0 %2393 }
 0x609   : > { %v2675_v39 = vmul.f32 %v3708_v47, %v2524_v52  ;;  %v2644_v54 = vmul.f32 %v3709_v13, %v2394_v12  ;;  %v3718_v47 = vld [vmem:[%s5758_s4 + $0xb0] sm:$0xff]  ;;  %v3719_v13 = vld [vmem:[%s5758_s4 + $0x40] sm:$0xff] }
 0x60b   : > { %v2748_v4 = vadd.f32 %v2747_v41, %v2675_v39  ;;  %v2707_v26 = vadd.f32 %v2706_v20, %v2644_v54 }
 0x60c   : > { %v2461_v10 = vpop.permute.xlu1 %2460  ;;  %v2591_v7 = vpop.permute.xlu0 %2590 }
 0x60d   : > { %v2660_v40 = vmul.f32 %v3710_v23, %v2461_v10  ;;  %v2691_v51 = vmul.f32 %v3711_v33, %v2591_v7  ;;  %v3721_v10 = vld [vmem:[%s5758_s4 + $0x1a8] sm:$0xff]  ;;  %v3722_v33 = vld [vmem:[%s5758_s4 + $0xb8] sm:$0xff] }
 0x60f   : > { %v2728_v21 = vadd.f32 %v2727_v25, %v2660_v40  ;;  %v5500_v42 = vadd.f32 %v2768_v2, %v2691_v51 }
 0x610   : > { %v2528_v32 = vpop.permute.xlu1 %2527  ;;  %v2398_v27 = vpop.permute.xlu0 %2397 }
 0x611   : > { %v2676_v9 = vmul.f32 %v3712_v16, %v2528_v32  ;;  %v2645_v63 = vmul.f32 %v3713_v48, %v2398_v27  ;;  %v3723_v32 = vld [vmem:[%s5758_s4 + $0x48] sm:$0xff] }
 0x613   : > { %v5508_v43 = vadd.f32 %v2748_v4, %v2676_v9  ;;  %v2708_v5 = vadd.f32 %v2707_v26, %v2645_v63  ;;  %v3720_v4 = vld [vmem:[%s5758_s4 + $0x128] sm:$0xff]  ;;  %v3724_v9 = vld [vmem:[%s5758_s4 + $0x130] sm:$0xff] }
 0x614   : > { %v2465_v38 = vpop.permute.xlu1 %2464  ;;  %v2595_v36 = vpop.permute.xlu0 %2594 }
 0x615   : > { %v2661_v56 = vmul.f32 %v3715_v60, %v2465_v38  ;;  %v2692_v25 = vmul.f32 %v3717_v29, %v2595_v36 }
 0x617   : > { %v2729_v23 = vadd.f32 %v2728_v21, %v2661_v56  ;;  %v2770_v16 = vadd.f32 %v5500_v42, %v2692_v25  ;;  %v3725_v21 = vld [vmem:[%s5758_s4 + $0x1b0] sm:$0xff]  ;;  %v3726_v42 = vld [vmem:[%s5758_s4 + $0xc0] sm:$0xff] }
 0x618   : > { %v2532_v58 = vpop.permute.xlu1 %2531  ;;  %v2402_v37 = vpop.permute.xlu0 %2401 }
 0x619   : > { %v2646_v14 = vmul.f32 %v3714_v18, %v2402_v37  ;;  %v2677_v26 = vmul.f32 %v3720_v4, %v2532_v58 }
 0x61b   : > { %v2709_v12 = vadd.f32 %v2708_v5, %v2646_v14  ;;  %v3730_v14 = vld [vmem:[%s5758_s4 + $0xc8] sm:$0xff] }
 0x61c   : > { %v2469_v57 = vpop.permute.xlu1 %2468  ;;  %v2599_v35 = vpop.permute.xlu0 %2598 }
 0x61d   : > { %v2662_v39 = vmul.f32 %v3718_v47, %v2469_v57  ;;  %v2693_v7 = vmul.f32 %v3721_v10, %v2599_v35  ;;  %v3727_v57 = vld [vmem:[%s5758_s4 + $0x50] sm:$0xff]  ;;  %v3737_v10 = vld [vmem:[%s5758_s4 + $0x1c8] sm:$0xff] }
 0x61f   : > { %v2730_v36 = vadd.f32 %v2729_v23, %v2662_v39 }
 0x620   : > { %v2536_v1 = vpop.permute.xlu1 %2535  ;;  %v2406_v53 = vpop.permute.xlu0 %2405 }
 0x621   : > { %v2647_v8 = vmul.f32 %v3716_v45, %v2406_v53  ;;  %v2678_v48 = vmul.f32 %v3724_v9, %v2536_v1  ;;  %v2750_v1 = vadd.f32 %v5508_v43, %v2677_v26  ;;  %v2771_v53 = vadd.f32 %v2770_v16, %v2693_v7  ;;  %v3731_v43 = vld [vmem:[%s5758_s4 + $0x58] sm:$0xff]  ;;  %v3741_v16 = vld [vmem:[%s5758_s4 + $0x1d0] sm:$0xff] }
 0x623   : > { %v2710_v40 = vadd.f32 %v2709_v12, %v2647_v8  ;;  %v2751_v56 = vadd.f32 %v2750_v1, %v2678_v48  ;;  %v3733_v8 = vld [vmem:[%s5758_s4 + $0x1c0] sm:$0xff] }
 0x624   : > { %v2473_v3 = vpop.permute.xlu1 %2472  ;;  %v2603_v0 = vpop.permute.xlu0 %2602 }
 0x625   : > { %v2663_v51 = vmul.f32 %v3722_v33, %v2473_v3  ;;  %v2694_v63 = vmul.f32 %v3725_v21, %v2603_v0  ;;  %v3728_v3 = vld [vmem:[%s5758_s4 + $0x138] sm:$0xff]  ;;  %v3739_v33 = vld [vmem:[%s5758_s4 + $0x68] sm:$0xff] }
 0x627   : > { %v2731_v18 = vadd.f32 %v2730_v36, %v2663_v51  ;;  %v2772_v45 = vadd.f32 %v2771_v53, %v2694_v63 }
 0x628   : > { %v2540_v19 = vpop.permute.xlu1 %2539  ;;  %v2410_v15 = vpop.permute.xlu0 %2409 }
 0x629   : > { %v2648_v54 = vmul.f32 %v3719_v13, %v2410_v15  ;;  %v2679_v0 = vmul.f32 %v3728_v3, %v2540_v19  ;;  %v3729_v15 = vld [vmem:[%s5758_s4 + $0x1b8] sm:$0xff]  ;;  %v3732_v19 = vld [vmem:[%s5758_s4 + $0x140] sm:$0xff]  ;;  %v3746_v3 = vld [vmem:[%s5758_s4 + $0xe8] sm:$0xff] }
 0x62b   : > { %v2711_v58 = vadd.f32 %v2710_v40, %v2648_v54  ;;  %v2752_v54 = vadd.f32 %v2751_v56, %v2679_v0 }
 0x62c   : > { %v2477_v30 = vpop.permute.xlu1 %2476  ;;  %v2607_v50 = vpop.permute.xlu0 %2606 }
 0x62d   : > { %v2664_v37 = vmul.f32 %v3726_v42, %v2477_v30 }
 0x62f   : > { %v2732_v12 = vadd.f32 %v2731_v18, %v2664_v37 }
 0x630   : > { %v5510_v31 = vpop.permute.xlu1 %2543  ;;  %v2414_v49 = vpop.permute.xlu0 %2413 }
 0x631   : > { %v2649_v27 = vmul.f32 %v3723_v32, %v2414_v49  ;;  %v2695_v49 = vmul.f32 %v3729_v15, %v2607_v50  ;;  %v2680_v50 = vmul.f32 %v3732_v19, %v5510_v31  ;;  %v3735_v31 = vld [vmem:[%s5758_s4 + $0x60] sm:$0xff] }
 0x633   : > { %v2712_v30 = vadd.f32 %v2711_v58, %v2649_v27  ;;  %v2773_v4 = vadd.f32 %v2772_v45, %v2695_v49  ;;  %v2753_v51 = vadd.f32 %v2752_v54, %v2680_v50  ;;  %v3750_v45 = vld [vmem:[%s5758_s4 + $0x78] sm:$0xff] }
 0x634   : > { %v2481_v61 = vpop.permute.xlu1 %2480  ;;  %v5512_v6 = vpop.permute.xlu0 %2610 }
 0x635   : > { %v2696_v29 = vmul.f32 %v3733_v8, %v5512_v6  ;;  %v3736_v6 = vld [vmem:[%s5758_s4 + $0x148] sm:$0xff] }
 0x637   : > { %v2774_v32 = vadd.f32 %v2773_v4, %v2696_v29  ;;  %v3752_v29 = vld [vmem:[%s5758_s4 + $0x1e8] sm:$0xff] }
 0x638   : > { %v5514_v22 = vpop.permute.xlu1 %2547  ;;  %v2418_v44 = vpop.permute.xlu0 %2417 }
 0x639   : > { %v2650_v35 = vmul.f32 %v3727_v57, %v2418_v44  ;;  %v2665_v44 = vmul.f32 %v3730_v14, %v2481_v61  ;;  %v2681_v26 = vmul.f32 %v3736_v6, %v5514_v22 }
 0x63b   : > { %v2713_v47 = vadd.f32 %v2712_v30, %v2650_v35  ;;  %v2733_v7 = vadd.f32 %v2732_v12, %v2665_v44  ;;  %v2754_v42 = vadd.f32 %v2753_v51, %v2681_v26  ;;  %v3745_v35 = vld [vmem:[%s5758_s4 + $0x1d8] sm:$0xff] }
 0x63c   : > { %v5516_v46 = vpop.permute.xlu1 %2484  ;;  %v5518_v11 = vpop.permute.xlu0 %2614 }
 0x640   : > { %v5520_v34 = vpop.permute.xlu1 %2551  ;;  %v2422_v24 = vpop.permute.xlu0 %2421 }
 0x641   : > { %v2651_v60 = vmul.f32 %v3731_v43, %v2422_v24  ;;  %v3734_v24 = vld [vmem:[%s5758_s4 + $0xd0] sm:$0xff] }
 0x642   : > { %v2666_v39 = vmul.f32 %v3734_v24, %v5516_v46  ;;  %v2697_v46 = vmul.f32 %v3737_v10, %v5518_v11  ;;  %v3740_v11 = vld [vmem:[%s5758_s4 + $0x150] sm:$0xff] }
 0x643   : > { %v2714_v23 = vadd.f32 %v2713_v47, %v2651_v60  ;;  %v2682_v27 = vmul.f32 %v3740_v11, %v5520_v34  ;;  %v3743_v34 = vld [vmem:[%s5758_s4 + $0x70] sm:$0xff] }
 0x644   : > { %v5522_v17 = vpop.permute.xlu1 %2488  ;;  %v5524_v55 = vpop.permute.xlu0 %2618  ;;  %v2734_v21 = vadd.f32 %v2733_v7, %v2666_v39  ;;  %v2775_v37 = vadd.f32 %v2774_v32, %v2697_v46  ;;  %v3755_v46 = vld [vmem:[%s5758_s4 + $0x1f0] sm:$0xff] }
 0x645   : > { %v2755_v15 = vadd.f32 %v2754_v42, %v2682_v27 }
 0x648   : > { %v5526_v62 = vpop.permute.xlu1 %2555  ;;  %v5528_v41 = vpop.permute.xlu0 %2425 }
 0x649   : > { %v2652_v13 = vmul.f32 %v3735_v31, %v5528_v41  ;;  %v3738_v41 = vld [vmem:[%s5758_s4 + $0xd8] sm:$0xff]  ;;  %v3753_v31 = vld [vmem:[%s5758_s4 + $0x170] sm:$0xff] }
 0x64a   : > { %v2667_v40 = vmul.f32 %v3738_v41, %v5522_v17  ;;  %v2698_v17 = vmul.f32 %v3741_v16, %v5524_v55  ;;  %v3744_v55 = vld [vmem:[%s5758_s4 + $0x158] sm:$0xff] }
 0x64b   : > { %v2715_v63 = vadd.f32 %v2714_v23, %v2652_v13  ;;  %v2683_v57 = vmul.f32 %v3744_v55, %v5526_v62  ;;  %v3747_v62 = vld [vmem:[%s5758_s4 + $0x160] sm:$0xff] }
 0x64c   : > { %v5530_v20 = vpop.permute.xlu1 %2492  ;;  %v5532_v28 = vpop.permute.xlu0 %2622  ;;  %v2776_v49 = vadd.f32 %v2775_v37, %v2698_v17  ;;  %v3756_v17 = vld [vmem:[%s5758_s4 + $0x178] sm:$0xff] }
 0x64d   : > { %v2699_v1 = vmul.f32 %v3745_v35, %v5532_v28  ;;  %v3748_v28 = vld [vmem:[%s5758_s4 + $0x1e0] sm:$0xff]  ;;  %v2756_v19 = vadd.f32 %v2755_v15, %v2683_v57 }
 0x64f   : > { %v2777_v50 = vadd.f32 %v2776_v49, %v2699_v1 }
 0x650   : > { %v5546_v2 = vpop.permute.xlu1 %2559  ;;  %v5548_v52 = vpop.permute.xlu0 %2429 }
 0x651   : > { %v2653_v22 = vmul.f32 %v3739_v33, %v5548_v52  ;;  %v3742_v52 = vld [vmem:[%s5758_s4 + $0xe0] sm:$0xff]  ;;  %v2684_v18 = vmul.f32 %v3747_v62, %v5546_v2 }
 0x652   : > { %v2668_v36 = vmul.f32 %v3742_v52, %v5530_v20  ;;  %v2735_v20 = vadd.f32 %v2734_v21, %v2667_v40 }
 0x653   : > { %v2716_v53 = vadd.f32 %v2715_v63, %v2653_v22  ;;  %v2757_v24 = vadd.f32 %v2756_v19, %v2684_v18 }
 0x654   : > { %v5575_v5 = vpop.permute.xlu1 %2496  ;;  %v5577_v38 = vpop.permute.xlu0 %2626  ;;  %v2736_v43 = vadd.f32 %v2735_v20, %v2668_v36 }
 0x655   : > { %v2669_v0 = vmul.f32 %v3746_v3, %v5575_v5  ;;  %v2700_v30 = vmul.f32 %v3748_v28, %v5577_v38  ;;  %v3749_v5 = vld [vmem:[%s5758_s4 + $0xf0] sm:$0xff]  ;;  %v3751_v38 = vld [vmem:[%s5758_s4 + $0x168] sm:$0xff] }
 0x657   : > { %v2737_v12 = vadd.f32 %v2736_v43, %v2669_v0  ;;  %v2778_v39 = vadd.f32 %v2777_v50, %v2700_v30 }
 0x658   : > { %v2564_v61 = vpop.permute.xlu1 %2563  ;;  %v2434_v25 = vpop.permute.xlu0 %2433 }
 0x659   : > { %v2654_v58 = vmul.f32 %v3743_v34, %v2434_v25  ;;  %v2685_v8 = vmul.f32 %v3751_v38, %v2564_v61  ;;  %v3754_v61 = vld [vmem:[%s5758_s4 + $0xf8] sm:$0xff] }
 0x65b   : > { %v2717_v60 = vadd.f32 %v2716_v53, %v2654_v58  ;;  %v2758_v23 = vadd.f32 %v2757_v24, %v2685_v8 }
 0x65c   : > { %v2501_v9 = vpop.permute.xlu1 %2500  ;;  %v2631_v48 = vpop.permute.xlu0 %2630 }
 0x65d   : > { %v2670_v56 = vmul.f32 %v3749_v5, %v2501_v9  ;;  %v2701_v25 = vmul.f32 %v3752_v29, %v2631_v48  ;;  %v3757_v48 = vld [vmem:[%s5758_s4 + $0x1f8] sm:$0xff]  ;;  %v3993_v5 = vmov -1e+30  }
 0x65e   : > { %2980 = vst.msk [vmem:[#allocation3] sm:$0xf] %vm2979_vm8, %v3993_v5 }
 0x65f   : > { %v2738_v6 = vadd.f32 %v2737_v12, %v2670_v56  ;;  %v2779_v41 = vadd.f32 %v2778_v39, %v2701_v25 }
 0x660   : > { %v2568_v14 = vpop.permute.xlu1 %2567  ;;  %v2438_v44 = vpop.permute.xlu0 %2437 }
 0x661   : > { %v2655_v2 = vmul.f32 %v3750_v45, %v2438_v44  ;;  %v2686_v13 = vmul.f32 %v3753_v31, %v2568_v14  ;;  %v3356_v45 = vld [vmem:[%s5836_s3] ss:$0 sm:$0xff] }
 0x663   : > { %v2718_v47 = vadd.f32 %v2717_v60, %v2655_v2  ;;  %v2759_v22 = vadd.f32 %v2758_v23, %v2686_v13  ;;  %v5837_v2 = vld [vmem:[#allocation30_spill] sm:$0xff] }
 0x664   : > { %v2505_v54 = vpop.permute.xlu1 %2504  ;;  %v2635_v4 = vpop.permute.xlu0 %2634 }
 0x665   : > { %v2719_v26 = vrot.slane %v2718_v47, 4  ;;  %v2671_v10 = vmul.f32 %v3754_v61, %v2505_v54  ;;  %v2702_v7 = vmul.f32 %v3755_v46, %v2635_v4 }
 0x667   : > { %v2720_v40 = vadd.f32 %v2719_v26, %v2718_v47  ;;  %v2739_v33 = vadd.f32 %v2738_v6, %v2671_v10  ;;  %v2780_v51 = vadd.f32 %v2779_v41, %v2702_v7 }
 0x668   : > { %v2572_v32 = vpop.permute.xlu1 %2571  ;;  %v2639_v11 = vpop.permute.xlu0 %2638 }
 0x669   : > { %v2721_v27 = vrot.slane %v2720_v40, 2  ;;  %v2740_v16 = vrot.slane %v2739_v33, 4  ;;  %v2687_v9 = vmul.f32 %v3756_v17, %v2572_v32  ;;  %v2703_v21 = vmul.f32 %v3757_v48, %v2639_v11 }
 0x66b   : > { %v2722_v63 = vadd.f32 %v2721_v27, %v2720_v40  ;;  %v2741_v52 = vadd.f32 %v2740_v16, %v2739_v33  ;;  %v2760_v36 = vadd.f32 %v2759_v22, %v2687_v9  ;;  %v2781_v34 = vadd.f32 %v2780_v51, %v2703_v21 }
 0x66d   : > { %v2742_v58 = vrot.slane %v2741_v52, 2  ;;  %v2761_v42 = vrot.slane %v2760_v36, 4  ;;  %v2782_v37 = vrot.slane %v2781_v34, 4  ;;  %v2723_v55 = vrot.slane %v2722_v63, 1 }
 0x66f   : > { %v2743_v57 = vadd.f32 %v2742_v58, %v2741_v52  ;;  %v2762_v35 = vadd.f32 %v2761_v42, %v2760_v36  ;;  %v2783_v1 = vadd.f32 %v2782_v37, %v2781_v34  ;;  %v2724_v0 = vadd.f32 %v2723_v55, %v2722_v63 }
 0x671   : > { %v2744_v20 = vrot.slane %v2743_v57, 1  ;;  %v2763_v53 = vrot.slane %v2762_v35, 2  ;;  %v2784_v3 = vrot.slane %v2783_v1, 2 }
 0x673   : > { %v2745_v15 = vadd.f32 %v2744_v20, %v2743_v57  ;;  %v2764_v49 = vadd.f32 %v2763_v53, %v2762_v35  ;;  %v2785_v62 = vadd.f32 %v2784_v3, %v2783_v1 }
 0x675   : > { %v2765_v18 = vrot.slane %v2764_v49, 1  ;;  %v2786_v28 = vrot.slane %v2785_v62, 1  ;;  %v2824_v30 = vsel %vm2319_vm3, %v2745_v15, %v2724_v0 }
 0x677   : > { %v2766_v14 = vadd.f32 %v2765_v18, %v2764_v49  ;;  %v2787_v44 = vadd.f32 %v2786_v28, %v2785_v62 }
 0x679   : > { %v2825_v43 = vsel %vm2321_vm4, %v2766_v14, %v2824_v30 }
 0x67a   : > { %v2826_v60 = vsel %vm2323_vm5, %v2787_v44, %v2825_v43 }
 0x67b   : > { %3539 = vmatmul.mubr.f32.vlgmr.msra.gmra.mxu0 %v2826_v60 }
 0x73b   : > { %v2894_v56 = vpop.f32.mrf.mxu0 }
 0x73c   : > { %v2965_v19 = vadd.f32 %v5837_v2, %v2894_v56 }
 0x73d   : > { %v3540_v50 = vpop.f32.mrf.mxu0 }
 0x73e   : > { %v2975_v38 = vadd.f32 %v3356_v45, %v2965_v19 }
 0x740   : > { %v2976_v8 = vmax.f32 %v2975_v38, 0.0 }
 0x742   : > { %2977 = vst [vmem:[#allocation16] sm:$0xf] %v2976_v8  ;;  %2978 = vst [vmem:[#allocation2] sm:$0xf] %v2976_v8 }
 0x743 PF: > { %v3014_v29 = vld [vmem:[#allocation13 + $0xf8] sm:$0xff]  ;;  %v3013_v25 = vld [vmem:[#allocation13 + $0xf0] sm:$0xff]  ;;  %v3012_v12 = vld [vmem:[#allocation13 + $0xe8] sm:$0xff]  ;;  %v3994_v24 = vmov 0.0   ;;  %v3017_v34 = vlaneseq  ;;  %p3357_p7 = scmp.ne.s32.totalorder %s3968_s22, 0 }
 0x744   : > { %3027 = vmatprep.subr.mxu0 %v3014_v29  ;;  %v3011_v47 = vld [vmem:[#allocation13 + $0xe0] sm:$0xff]  ;;  %3091 = vmatprep.mubr.f32.mxu0 %v3994_v24  ;;  %v3010_v59 = vld [vmem:[#allocation13 + $0xd8] sm:$0xff]  ;;  %v3009_v39 = vld [vmem:[#allocation13 + $0xd0] sm:$0xff] }
 0x745   : > { %3028 = vmatpush1.msra.mxu0 %v3013_v25  ;;  %v3008_v31 = vld [vmem:[#allocation13 + $0xc8] sm:$0xff]  ;;  %v3007_v13 = vld [vmem:[#allocation13 + $0xc0] sm:$0xff]  ;;  %v3006_v54 = vld [vmem:[#allocation13 + $0xb8] sm:$0xff]  ;;  %v3018_v58 = vshrl.u32 %v3017_v34, 7 }
 0x746   : > { %3029 = vmatprep.subr.mxu0 %v3012_v12  ;;  %v3005_v4 = vld [vmem:[#allocation13 + $0xb0] sm:$0xff]  ;;  %v3004_v6 = vld [vmem:[#allocation13 + $0xa8] sm:$0xff]  ;;  %v3003_v26 = vld [vmem:[#allocation13 + $0xa0] sm:$0xff] }
 0x747   : > { %3030 = vmatpush1.msra.mxu0 %v3011_v47  ;;  %v3002_v61 = vld [vmem:[#allocation13 + $0x98] sm:$0xff]  ;;  %v3001_v10 = vld [vmem:[#allocation13 + $0x90] sm:$0xff]  ;;  %v3000_v46 = vld [vmem:[#allocation13 + $0x88] sm:$0xff]  ;;  %v3019_v42 = vsub.s32 0, %v3018_v58  ;;  %v3023_v55 = vsub.s32 1, %v3018_v58 }
 0x748   : > { %3031 = vmatprep.subr.mxu0 %v3010_v59  ;;  %v2999_v7 = vld [vmem:[#allocation13 + $0x80] sm:$0xff]  ;;  %v2998_v23 = vld [vmem:[#allocation13 + $0x78] sm:$0xff]  ;;  %v2997_v41 = vld [vmem:[#allocation13 + $0x70] sm:$0xff] }
 0x749   : > { %3032 = vmatpush1.msra.mxu0 %v3009_v39  ;;  %v2996_v40 = vld [vmem:[#allocation13 + $0x68] sm:$0xff]  ;;  %v2995_v33 = vld [vmem:[#allocation13 + $0x60] sm:$0xff]  ;;  %v2994_v22 = vld [vmem:[#allocation13 + $0x58] sm:$0xff] }
 0x74a   : > { %3033 = vmatprep.subr.mxu0 %v3008_v31  ;;  %v2993_v51 = vld [vmem:[#allocation13 + $0x50] sm:$0xff]  ;;  %v2992_v32 = vld [vmem:[#allocation13 + $0x48] sm:$0xff]  ;;  %v2991_v11 = vld [vmem:[#allocation13 + $0x40] sm:$0xff] }
 0x74b   : > { %3034 = vmatpush1.msra.mxu0 %v3007_v13  ;;  %v2990_v27 = vld [vmem:[#allocation13 + $0x38] sm:$0xff]  ;;  %v2989_v16 = vld [vmem:[#allocation13 + $0x30] sm:$0xff]  ;;  %v2988_v17 = vld [vmem:[#allocation13 + $0x28] sm:$0xff] }
 0x74c   : > { %3035 = vmatprep.subr.mxu0 %v3006_v54  ;;  %v2987_v9 = vld [vmem:[#allocation13 + $0x20] sm:$0xff]  ;;  %v2986_v48 = vld [vmem:[#allocation13 + $0x18] sm:$0xff]  ;;  %v2985_v21 = vld [vmem:[#allocation13 + $0x10] sm:$0xff] }
 0x74d   : > { %3036 = vmatpush1.msra.mxu0 %v3005_v4  ;;  %v2984_v63 = vld [vmem:[#allocation13 + $0x8] sm:$0xff]  ;;  %v2983_v52 = vld [vmem:[#allocation13] sm:$0xff]  ;;  %v2982_v36 = vld [vmem:[#allocation2] sm:$0xf] }
 0x74e   : > { %3037 = vmatprep.subr.mxu0 %v3004_v6  ;;  %v3015_v37 = vld [vmem:[%s5768_s14] sm:$0x3] }
 0x74f   : > { %3038 = vmatpush1.msra.mxu0 %v3003_v26  ;;  %v3020_v57 = vrot.slane %v3015_v37, %v3019_v42  ;;  %v3024_v35 = vrot.slane %v3015_v37, %v3023_v55 }
 0x750   : > { %3039 = vmatprep.subr.mxu0 %v3002_v61 }
 0x751   : > { %3040 = vmatpush1.msra.mxu0 %v3001_v10 }
 0x752   : > { %3041 = vmatprep.subr.mxu0 %v3000_v46 }
 0x753   : > { %3042 = vmatpush1.msra.mxu0 %v2999_v7 }
 0x754   : > { %3043 = vmatprep.subr.mxu0 %v2998_v23 }
 0x755   : > { %3044 = vmatpush1.msra.mxu0 %v2997_v41 }
 0x756   : > { %3045 = vmatprep.subr.mxu0 %v2996_v40 }
 0x757   : > { %3046 = vmatpush1.msra.mxu0 %v2995_v33 }
 0x758   : > { %3047 = vmatprep.subr.mxu0 %v2994_v22 }
 0x759   : > { %3048 = vmatpush1.msra.mxu0 %v2993_v51 }
 0x75a   : > { %3049 = vmatprep.subr.mxu0 %v2992_v32 }
 0x75b   : > { %3050 = vmatpush1.msra.mxu0 %v2991_v11 }
 0x75c   : > { %3051 = vmatprep.subr.mxu0 %v2990_v27 }
 0x75d   : > { %3052 = vmatpush1.msra.mxu0 %v2989_v16 }
 0x75e   : > { %3053 = vmatprep.subr.mxu0 %v2988_v17 }
 0x75f   : > { %3054 = vmatpush1.msra.mxu0 %v2987_v9 }
 0x760   : > { %3055 = vmatprep.subr.mxu0 %v2986_v48 }
 0x761   : > { %3056 = vmatpush1.msra.mxu0 %v2985_v21 }
 0x762   : > { %3057 = vmatprep.subr.mxu0 %v2984_v63 }
 0x763   : > { %3058 = vmatpush1.msra.mxu0 %v2983_v52 }
 0x764   : > { %3092 = vmatmul.mubr.f32.vlgmr.msra.gmra.mxu0 %v2982_v36 }
 0x823   : > { %3100 = sbr.rel (%p3357_p7) target bundleno = 2519 (0x9d7), region = 100 }
 0x824   : > { %v3093_v1 = vpop.f32.mrf.mxu0 }
 0x825   : > { %v3094_v20 = vadd.f32 %v3093_v1, %v3020_v57 }
 0x826   : > { %v3095_v53 = vpop.f32.mrf.mxu0 }
 0x827   : > { %v3096_v3 = vadd.f32 %v3095_v53, %v3024_v35 }
 0x828   : > { %vm3102_vm9 = vcmask 1043456   ;;  %v3995_v62 = vmov 0   ;;  %v3101_v18 = vld [vmem:[#allocation3] sm:$0xf]  ;;  %vm3131_vm10 = vcmask 3072  }
 0x829   : > { %v3103_v0 = vsel %vm3102_vm9, %v3094_v20, -inf  ;;  %v3104_v15 = vsel %vm3102_vm9, %v3096_v3, -inf  ;;  %3758 = vset.pattern.permute.xlu0 %v3995_v62  ;;  %v3136_v8 = vcombine.low %v3094_v20, %v3096_v3  ;;  %v3109_v12 = vld [vmem:[#allocation4] sm:$0xf] }
 0x82a   : > { %v3105_v49 = vmax.f32 %v3103_v0, %v3104_v15 }
 0x82b   : > { %3138 = vst [vmem:[%s5769_s15] sm:$0xff] %v3136_v8 }
 0x82c   : > { %3106 = vmax.xlane.f32.xlu0 %v3105_v49 }
 0x8b5   : > { %v3107_v28 = vpop.xlane.xlu0 %3106 }
 0x8b6   : > { %v3108_v30 = vmax.f32 %v3101_v18, %v3107_v28 }
 0x8b8   : > { %v3110_v14 = vsub.f32 %v3101_v18, %v3108_v30  ;;  %3133 = vst.msk [vmem:[#allocation3] sm:$0xf] %vm3131_vm10, %v3108_v30  ;;  %3116 = vperm.xlu0 %3758, %v3108_v30  }
 0x8ba   : > { %v3111_v29 = vmul.f32 1.442695, %v3110_v14 }
 0x933   : > { %v3117_v44 = vpop.permute.xlu0 %3116 }
 0x934   : > { %v3119_v43 = vsub.f32 %v3094_v20, %v3117_v44  ;;  %v3120_v60 = vsub.f32 %v3096_v3, %v3117_v44 }
 0x936   : > { %v3121_v5 = vmul.f32 1.442695, %v3119_v43  ;;  %v3123_v56 = vmul.f32 1.442695, %v3120_v60 }
 0x938   : > { %3759 = vpow2.f32 %v3121_v5 }
 0x939   : > { %3761 = vpow2.f32 %v3123_v56 }
 0x93a   : > { %3763 = vpow2.f32 %v3111_v29 }
 0x945   : > { %v3760_v45 = vpop.eup %3759 }
 0x946   : > { %v3762_v2 = vpop.eup %3761  ;;  %v3125_v19 = vsel %vm3102_vm9, %v3760_v45, 0.0 }
 0x947   : > { %v3126_v50 = vsel %vm3102_vm9, %v3762_v2, 0.0  ;;  %v3764_v25 = vpop.eup %3763 }
 0x948   : > { %v3127_v38 = vadd.f32 %v3126_v50, %v3125_v19  ;;  %v3113_v47 = vmul.f32 %v3764_v25, %v3109_v12 }
 0x94a   : > { %3128 = vadd.xlane.f32.xlu1 %v3127_v38 }
 0x9d3   : > { %v3129_v24 = vpop.xlane.xlu1 %3128 }
 0x9d4   : > { %v3130_v59 = vadd.f32 %v3129_v24, %v3113_v47 }
 0x9d6   : > { %3132 = vst.msk [vmem:[#allocation4] sm:$0xf] %vm3131_vm10, %v3130_v59 }
 0x9d7 PF: > { %p3358_p10 = scmp.ne.s32.totalorder %s3968_s22, 1 }
 0x9d9   : > { %3142 = sbr.rel (%p3358_p10) target bundleno = 2672 (0xa70), region = 104 }
 0x9de   : > { %v3143_v39 = vld [vmem:[#allocation3] sm:$0xf]  ;;  %v3151_v31 = vld [vmem:[#allocation4] sm:$0xf]  ;;  %v3996_v13 = vmov 0  }
 0x9df   : > { %3765 = vset.pattern.permute.xlu0 %v3996_v13  ;;  %3766 = vlog2.f32 %v3151_v31 }
 0x9e0   : > { %3146 = vperm.xlu0 %3765, %v3143_v39  }
 0x9ec   : > { %v3767_v54 = vpop.eup %3766 }
 0x9ed   : > { %v3153_v4 = vmul.f32 0.6931472, %v3767_v54 }
 0x9ef   : > { %3156 = vperm.xlu0 %3765, %v3153_v4  }
 0xa5b   : > { %v3147_v6 = vpop.permute.xlu0 %3146 }
 0xa5c   : > { %v3149_v26 = vsub.f32 %v3094_v20, %v3147_v6  ;;  %v3150_v61 = vsub.f32 %v3096_v3, %v3147_v6 }
 0xa6a   : > { %v3157_v10 = vpop.permute.xlu0 %3156 }
 0xa6b   : > { %v3159_v46 = vsub.f32 %v3149_v26, %v3157_v10  ;;  %v3160_v7 = vsub.f32 %v3150_v61, %v3157_v10 }
 0xa6d   : > { %v3163_v23 = vcombine.low %v3159_v46, %v3160_v7 }
 0xa6f   : > { %3165 = vst [vmem:[%s5769_s15] sm:$0xff] %v3163_v23 }
 0xa70 PF: > { %s5838_s22 = sadd.s32 4294967295, %s3976_s23   ;;  %s3997_s25 = smov [#allocation15]  }
 0xa71   : > { %p5719_p12 = scmp.eq.s32.totalorder %s5838_s22, 1  ;;  %s3187_s26 = sshll.u32 %s3997_s25, 4  ;;  %s3188_s26 = int_to_ptr.vmem [resolvable:$true] %s3187_s26 }
 0xa72   : > { %s3884_s29 = scalar_lea.vmem %s3188_s26, 64  ;;  %p3891_p1 = scmp.lt.s32.totalorder %s3188_s26, %s3188_s26 }
 0xa73   : > { %p3885_p9 = scmp.ne.s32.totalorder %s3188_s26, %s3884_s29  ;;  %p3892_p2 = scmp.lt.s32.totalorder %s3884_s29, %s3884_s29 }
 0xa75   : > { %p3886_p13 = pnand %p3885_p9, %p5719_p12  ;;  %p3893_p3 = por %p3892_p2, %p3891_p1 }
 0xa77   : > { %p3887_p0 = pneg %p3886_p13 }
 0xa79   : > { %p3894_p11 = pnand %p3893_p3, %p3887_p0 }
 0xa7b   : > { %3897 = shalt.err (!%p3894_p11)
}
 0xa7c   : > { %s3998_s0 = smov 16   ;;  %s3999_s21 = smov 1  }
 0xa7d   : > { %3593 = dma.vmem_to_hbm [thread:$0]  (%p5719_p12), %s3188_s26, 64, %s5772_s18, [#allocation9], %s3998_s0, %s3998_s0, %s3999_s21  }
 0xa7e   : > { %s4000_s3 = smov [#allocation16]  }
 0xa7f   : > { %s3201_s12 = sshll.u32 %s4000_s3, 4  ;;  %s3202_s12 = int_to_ptr.vmem [resolvable:$true] %s3201_s12 }
 0xa80   : > { %s3908_s20 = scalar_lea.vmem %s3202_s12, 64  ;;  %p3915_p8 = scmp.lt.s32.totalorder %s3202_s12, %s3202_s12 }
 0xa81   : > { %p3909_p4 = scmp.ne.s32.totalorder %s3202_s12, %s3908_s20  ;;  %p3916_p7 = scmp.lt.s32.totalorder %s3908_s20, %s3908_s20 }
 0xa83   : > { %p3910_p5 = pnand %p3909_p4, %p5719_p12  ;;  %p3917_p10 = por %p3916_p7, %p3915_p8 }
 0xa85   : > { %p3911_p6 = pneg %p3910_p5 }
 0xa87   : > { %p3918_p9 = pnand %p3917_p10, %p3911_p6 }
 0xa89   : > { %3921 = shalt.err (!%p3918_p9)
}
 0xa8a   : > { %3595 = dma.vmem_to_hbm [thread:$0]  (%p5719_p12), %s3202_s12, 64, %s5773_s19, [#allocation17]  }
 0xa8b   : > { %3959 = dma.done.wait (%p5719_p12), [#allocation9], 64  }
 0xa8c   : > { %3961 = vsyncadd (%p5719_p12), [#allocation9], 4294967232 }
 0xa8d   : > { %3963 = dma.done.wait (%p5719_p12), [#allocation17], 64  }
 0xa8e   : > { %3965 = vsyncadd (%p5719_p12), [#allocation17], 4294967232 }
 0xa8f PF: > { %s41_s23 = sadd.s32 1, %s3976_s23   ;;  %s5840_s1 = sld [smem:[#allocation24_spill]] }
 0xa90   : > { %p38_p13 = scmp.ge.s32.totalorder %s41_s23, 4   ;;  %s5841_s22 = smov %s3972_s2 }
 0xa92   :  { %40 = sbr.rel (!%p38_p13) target bundleno = 35 (0x23), region = 173 }
 0xa95   : > { %s5842_s2 = smov %s5840_s1 }
 0xa97   :  { %3232 = vsyncpa [#allocation8], 1 }
 0xa98   :  { %3234 = vsyncpa [#allocation8 + $0x1], 1 }
 0xa99   :  { %3235 = vsyncpa [#allocation11], 1 }
 0xa9a   :  { %3236 = vsyncpa [#allocation14], 1 }
 0xa9b   :  { %3237 = vsyncpa [#allocation9], 1 }
 0xa9c   :  { %3239 = vsyncpa [#allocation9 + $0x1], 1 }
 0xa9d   :  { %3240 = vsyncpa [#allocation17], 1 }

</bundles_post_ra>
